<compile_context>
chip_gen: v7x
topology: tpu7x:2x2x1
jax: 0.10.0
libtpu: 0.0.40
codegen_flags: <defaults>
</compile_context>

<pallas_src>
import jax
import jax.numpy as jnp
from jax import lax
from jax.experimental import pallas as pl
from jax.experimental.pallas import tpu as pltpu


def timing_meta_kernel(x_ref, wih0_ref, b0_ref, whh0_ref, b1_ref, wl1_hbm,
                       y_ref, xp_ref, wl1_vmem, dma_sem):
    """Single grid step: layer-0 input projection + full 2-layer LSTM recurrence.

    x_ref    : (seq, batch, Dp)  time-major input, feature dim zero-padded to Dp=128
    wih0_ref : (Dp, 4H)          layer-0 input->gates weights (gate order i, f, o, g)
    b0_ref   : (1, 4H)           layer-0 bias (b_ih + b_hh)
    whh0_ref : (H, 4H)           layer-0 hidden->gates weights
    b1_ref   : (1, 4H)           layer-1 bias (b_ih + b_hh)
    wl1_hbm  : (2H, 4H)          fused layer-1 [W_ih1 ; W_hh1], raw HBM ref (manual DMA)
    y_ref    : (seq, batch, H)   lane-dense output slab tanh(h1_t)
    xp_ref   : (seq, batch, 4H)  VMEM scratch: layer-0 input projection, all timesteps
    wl1_vmem : (2H, 4H)          VMEM scratch: landing buffer for the wl1 DMA
    dma_sem  : DMA semaphore for the wl1 copy
    """
    seq, batch, dp = x_ref.shape
    H = whh0_ref.shape[0]
    H3 = 3 * H
    G = 4 * H

    # Kick off the layer-1 weight DMA (largest input) so it overlaps with the layer-0
    # input-projection matmul below instead of sitting in the exposed prologue.
    wl1_cp = pltpu.make_async_copy(wl1_hbm, wl1_vmem, dma_sem)
    wl1_cp.start()

    # Layer-0 input projection for ALL timesteps: one (seq*batch, Dp) @ (Dp, 4H) matmul.
    # Bias b0 (= b_ih0 + b_hh0) is added once here, outside the recurrence.
    x2d = x_ref[...].reshape(seq * batch, dp)
    xp = jnp.dot(x2d, wih0_ref[...], preferred_element_type=jnp.float32) + b0_ref[...]
    xp_ref[...] = xp.reshape(seq, batch, G)

    # Layer-1 weights are first needed at the first layer-1 matmul; waiting here keeps
    # the DMA hidden behind the projection matmul above.
    wl1_cp.wait()

    # Hoisted layer-1 bias broadcast (JAX does not CSE broadcast_in_dim inside loops).
    b1b = jnp.broadcast_to(b1_ref[...], (batch, G))

    def cell(gates, c):
        # Gate order along the 4H axis: i, f, o, g — one sigmoid covers the contiguous
        # [:, :3H] slice and tanh covers the last H.
        sg = jax.nn.sigmoid(gates[:, :H3])
        i_g = sg[:, 0 * H:1 * H]
        f_g = sg[:, 1 * H:2 * H]
        o_g = sg[:, 2 * H:H3]
        g_g = jnp.tanh(gates[:, H3:])
        c_new = f_g * c + i_g * g_g
        h_new = o_g * jnp.tanh(c_new)
        return h_new, c_new

    def step(t, carry):
        h0, c0, h1, c1 = carry

        # Layer 0: input projection already in xp; only h @ W_hh sits on the serial chain.
        gates0 = xp_ref[t] + jnp.dot(h0, whh0_ref[...],
                                     preferred_element_type=jnp.float32)
        h0, c0 = cell(gates0, c0)

        # Layer 1: fused [x ; h] @ [W_ih ; W_hh] -> single K = 2H = 256 contraction.
        # (Dropout between layers omitted — eval semantics.)
        hcat = jnp.concatenate([h0, h1], axis=1)                    # (batch, 2H)
        gates1 = jnp.dot(hcat, wl1_vmem[...],
                         preferred_element_type=jnp.float32) + b1b
        h1, c1 = cell(gates1, c1)

        # Lane-dense (H = 128) store; Linear(H, 2) happens once, outside the kernel.
        y_ref[t] = jnp.tanh(h1)
        return (h0, c0, h1, c1)

    # self.init_hidden(): zero hidden / cell for both layers; state carried in vregs.
    z = jnp.zeros((batch, H), jnp.float32)
    lax.fori_loop(0, seq, step, (z, z, z, z), unroll=True)


@jax.jit
def timing_meta_forward(X, params):
    """X: (batch, seq, input_dim) float32 — PyTorch batch_first layout.
    Returns y_hat: (batch, seq, 2)."""
    batch, seq, input_dim = X.shape
    dp, G = params["wih0"].shape
    H = params["whh0"].shape[0]
    # Layout assumptions of the kernel (sublane / lane tiling).
    assert batch % 8 == 0 and H % 128 == 0 and dp % 128 == 0 and input_dim <= dp

    # Time-major layout + zero-pad the feature dim to dp lanes (weights are pre-padded,
    # so the extra zero columns contribute nothing to the projection).
    x_tm = jnp.transpose(X, (1, 0, 2))
    x_tm = jnp.pad(x_tm, ((0, 0), (0, 0), (0, dp - input_dim)))      # (seq, batch, dp)

    y = pl.pallas_call(
        timing_meta_kernel,
        out_shape=jax.ShapeDtypeStruct((seq, batch, H), jnp.float32),
        grid=(1,),
        in_specs=[
            pl.BlockSpec((seq, batch, dp), lambda i: (0, 0, 0)),   # x (padded, time-major)
            pl.BlockSpec((dp, G), lambda i: (0, 0)),               # W_ih layer 0 (padded)
            pl.BlockSpec((1, G), lambda i: (0, 0)),                # layer-0 bias
            pl.BlockSpec((H, G), lambda i: (0, 0)),                # W_hh layer 0
            pl.BlockSpec((1, G), lambda i: (0, 0)),                # layer-1 bias
            pl.BlockSpec(memory_space=pl.ANY),                     # fused layer-1 W (HBM)
        ],
        out_specs=pl.BlockSpec((seq, batch, H), lambda i: (0, 0, 0)),
        scratch_shapes=[
            pltpu.VMEM((seq, batch, G), jnp.float32),   # xp (layer-0 projection)
            pltpu.VMEM((2 * H, G), jnp.float32),        # wl1 landing buffer
            pltpu.SemaphoreType.DMA,                    # wl1 copy semaphore
        ],
        compiler_params=pltpu.CompilerParams(
            dimension_semantics=("arbitrary",)),        # time recurrence is serial
    )(x_tm, params["wih0"], params["b0"], params["whh0"], params["b1"], params["wl1"])

    # tanh(LSTM output) -> Linear(H, 2): one (seq*batch, 128) @ (128, 2) matmul, fused
    # with the time-major -> batch_first reordering.
    return jnp.einsum("sbh,ho->bso", y, params["wy"]) + params["by"]


def init_raw_params(key, input_dim, H):
    """Synthetic parameters in PyTorch nn.LSTM / nn.Linear layout & default init
    U(-1/sqrt(H), 1/sqrt(H))."""
    bound = float(H) ** -0.5
    keys = jax.random.split(key, 10)

    def u(k, shape):
        return jax.random.uniform(k, shape, jnp.float32, -bound, bound)

    return dict(
        w_ih_l0=u(keys[0], (4 * H, input_dim)),
        w_hh_l0=u(keys[1], (4 * H, H)),
        b_ih_l0=u(keys[2], (4 * H,)),
        b_hh_l0=u(keys[3], (4 * H,)),
        w_ih_l1=u(keys[4], (4 * H, H)),
        w_hh_l1=u(keys[5], (4 * H, H)),
        b_ih_l1=u(keys[6], (4 * H,)),
        b_hh_l1=u(keys[7], (4 * H,)),
        w_y=u(keys[8], (2, H)),
        b_y=u(keys[9], (2,)),
    )


def pack_params(raw, lane=128):
    """Repack torch-layout params for the kernel:
      * transpose for right-multiplication (x @ W),
      * fold b_ih + b_hh,
      * reorder gate blocks (i,f,g,o) -> (i,f,o,g),
      * fuse layer-1 [W_ih ; W_hh] along K,
      * zero-pad the layer-0 input (K) dim up to a lane multiple (33 -> 128)."""
    def reorder(w):  # rows along the 4H axis, PyTorch (i,f,g,o) -> (i,f,o,g)
        i, f, g, o = jnp.split(w, 4, axis=0)
        return jnp.concatenate([i, f, o, g], axis=0)

    wih0 = reorder(raw["w_ih_l0"]).T                                  # (D, 4H)
    D = wih0.shape[0]
    dp = ((D + lane - 1) // lane) * lane
    wih0 = jnp.pad(wih0, ((0, dp - D), (0, 0)))                       # (Dp, 4H)

    return dict(
        wih0=wih0,                                                    # (Dp, 4H)
        b0=reorder(raw["b_ih_l0"] + raw["b_hh_l0"])[None, :],         # (1, 4H)
        whh0=reorder(raw["w_hh_l0"]).T,                               # (H, 4H)
        wl1=jnp.concatenate([reorder(raw["w_ih_l1"]).T,
                             reorder(raw["w_hh_l1"]).T], axis=0),     # (2H, 4H)
        b1=reorder(raw["b_ih_l1"] + raw["b_hh_l1"])[None, :],         # (1, 4H)
        wy=raw["w_y"].T,                                              # (H, 2)
        by=raw["b_y"][None, :],                                       # (1, 2)
    )


def reference_forward(X, raw):
    """Pure-JAX reference of TimingMeta.forward (eval mode, zero initial hidden),
    using the untouched PyTorch-layout parameters and (i,f,g,o) gate order."""
    batch, seq, _ = X.shape
    H = raw["w_hh_l0"].shape[1]

    def cell(x, h, c, w_ih, w_hh, b_ih, b_hh):
        gates = x @ w_ih.T + h @ w_hh.T + b_ih + b_hh
        i = jax.nn.sigmoid(gates[:, 0 * H:1 * H])
        f = jax.nn.sigmoid(gates[:, 1 * H:2 * H])
        g = jnp.tanh(gates[:, 2 * H:3 * H])
        o = jax.nn.sigmoid(gates[:, 3 * H:4 * H])
        c_new = f * c + i * g
        return o * jnp.tanh(c_new), c_new

    z = jnp.zeros((batch, H), jnp.float32)
    h0, c0, h1, c1 = z, z, z, z
    outs = []
    for t in range(seq):
        x = X[:, t]
        h0, c0 = cell(x, h0, c0, raw["w_ih_l0"], raw["w_hh_l0"],
                      raw["b_ih_l0"], raw["b_hh_l0"])
        h1, c1 = cell(h0, h1, c1, raw["w_ih_l1"], raw["w_hh_l1"],
                      raw["b_ih_l1"], raw["b_hh_l1"])
        outs.append(jnp.tanh(h1) @ raw["w_y"].T + raw["b_y"])
    return jnp.stack(outs, axis=1)   # (batch, seq, 2)


if __name__ == "__main__":
    key = jax.random.PRNGKey(0)
    # Small shapes consistent with the module: HIDDEN_DIM -> 32 (input_dim = 33),
    # nb_lstm_units -> 128, nb_layers = 2, batch = 8, seq = 8.
    batch, seq = 8, 8
    hidden_dim = 32
    input_dim = hidden_dim + 1
    lstm_units = 128

    k_params, k_x = jax.random.split(key)
    raw = init_raw_params(k_params, input_dim, lstm_units)
    params = pack_params(raw)
    X = jax.random.normal(k_x, (batch, seq, input_dim), jnp.float32)

    y_hat = timing_meta_forward(X, params)
    jax.block_until_ready(y_hat)

    assert y_hat.shape == (batch, seq, 2)
    y_ref = reference_forward(X, raw)
    max_err = float(jnp.max(jnp.abs(y_hat - y_ref)))
    assert jnp.allclose(y_hat, y_ref, atol=1e-3, rtol=1e-3), max_err
    print("KERNEL_OK")
</pallas_src>

<mosaic_0001>
module attributes {stable_mosaic.version = 11 : i64} {
  func.func @timing_meta_kernel(%arg0: i32, %arg1: memref<8x8x128xf32, #tpu.memory_space<vmem>>, %arg2: memref<128x512xf32, #tpu.memory_space<vmem>>, %arg3: memref<1x512xf32, #tpu.memory_space<vmem>>, %arg4: memref<128x512xf32, #tpu.memory_space<vmem>>, %arg5: memref<1x512xf32, #tpu.memory_space<vmem>>, %arg6: memref<256x512xf32, #tpu.memory_space<any>>, %arg7: memref<8x8x128xf32, #tpu.memory_space<vmem>>, %arg8: memref<8x8x512xf32, #tpu.memory_space<vmem>>, %arg9: memref<256x512xf32, #tpu.memory_space<vmem>>, %arg10: memref<!tpu.dma_semaphore, #tpu.memory_space<semaphore_mem>>) attributes {dimension_semantics = [#tpu.dimension_semantics<arbitrary>], iteration_bounds = array<i64: 1>, scalar_prefetch = 0 : i64, scratch_operands = 3 : i64, tpu.core_type = #tpu.core_type<tc>, window_params = [{pipeline_mode = #tpu.pipeline_mode<synchronous>, transform_indices = @transform_0, window_bounds = array<i64: 8, 8, 128>}, {pipeline_mode = #tpu.pipeline_mode<synchronous>, transform_indices = @transform_1, window_bounds = array<i64: 128, 512>}, {pipeline_mode = #tpu.pipeline_mode<synchronous>, transform_indices = @transform_2, window_bounds = array<i64: 1, 512>}, {pipeline_mode = #tpu.pipeline_mode<synchronous>, transform_indices = @transform_3, window_bounds = array<i64: 128, 512>}, {pipeline_mode = #tpu.pipeline_mode<synchronous>, transform_indices = @transform_4, window_bounds = array<i64: 1, 512>}, {}, {pipeline_mode = #tpu.pipeline_mode<synchronous>, transform_indices = @transform_6, window_bounds = array<i64: 8, 8, 128>}]} {
    tpu.enqueue_dma source(%arg6 : memref<256x512xf32, #tpu.memory_space<any>>) target(%arg9 : memref<256x512xf32, #tpu.memory_space<vmem>>) target_semaphore(%arg10 : memref<!tpu.dma_semaphore, #tpu.memory_space<semaphore_mem>>)
    %c0 = arith.constant 0 : index
    %c0_0 = arith.constant 0 : index
    %c0_1 = arith.constant 0 : index
    %0 = vector.load %arg1[%c0, %c0_0, %c0_1] : memref<8x8x128xf32, #tpu.memory_space<vmem>>, vector<8x8x128xf32>
    %1 = vector.shape_cast %0 : vector<8x8x128xf32> to vector<64x128xf32>
    %c0_2 = arith.constant 0 : index
    %c0_3 = arith.constant 0 : index
    %2 = vector.load %arg2[%c0_2, %c0_3] : memref<128x512xf32, #tpu.memory_space<vmem>>, vector<128x512xf32>
    %cst = arith.constant dense<0.000000e+00> : vector<64x512xf32>
    %3 = tpu.matmul %1, %2, %cst {dimension_numbers = #tpu.dot_dimension_numbers<[1], [0], [0], [1], [0, 0, 1, 1], [], []>} : vector<64x128xf32>, vector<128x512xf32>, vector<64x512xf32> -> vector<64x512xf32>
    %c0_4 = arith.constant 0 : index
    %c0_5 = arith.constant 0 : index
    %4 = vector.load %arg3[%c0_4, %c0_5] : memref<1x512xf32, #tpu.memory_space<vmem>>, vector<1x512xf32>
    %5 = vector.broadcast %4 : vector<1x512xf32> to vector<64x512xf32>
    %6 = arith.addf %3, %5 : vector<64x512xf32>
    %7 = vector.shape_cast %6 : vector<64x512xf32> to vector<8x8x512xf32>
    %c0_6 = arith.constant 0 : index
    %c0_7 = arith.constant 0 : index
    %c0_8 = arith.constant 0 : index
    %8 = vector.load %arg8[%c0_6, %c0_7, %c0_8] : memref<8x8x512xf32, #tpu.memory_space<vmem>>, vector<8x8x512xf32>
    tpu.vector_store %arg8[%c0_6, %c0_7, %c0_8], %7 {strides = array<i32>} : memref<8x8x512xf32, #tpu.memory_space<vmem>>, vector<8x8x512xf32>,
    tpu.wait_dma2 semaphore(%arg10 : memref<!tpu.dma_semaphore, #tpu.memory_space<semaphore_mem>>) src(%arg6 : memref<256x512xf32, #tpu.memory_space<any>>) dst(%arg9 : memref<256x512xf32, #tpu.memory_space<vmem>>)
    %c0_9 = arith.constant 0 : index
    %c0_10 = arith.constant 0 : index
    %9 = vector.load %arg5[%c0_9, %c0_10] : memref<1x512xf32, #tpu.memory_space<vmem>>, vector<1x512xf32>
    %10 = vector.shape_cast %9 : vector<1x512xf32> to vector<1x512xf32>
    %11 = vector.broadcast %10 : vector<1x512xf32> to vector<8x512xf32>
    %cst_11 = arith.constant 0.000000e+00 : f32
    %12 = vector.broadcast %cst_11 : f32 to vector<8x128xf32>
    %c0_i32 = arith.constant 0 : i32
    %13 = arith.index_cast %c0_i32 : i32 to index
    %c0_12 = arith.constant 0 : index
    %c0_13 = arith.constant 0 : index
    %14 = vector.load %arg8[%13, %c0_12, %c0_13] : memref<8x8x512xf32, #tpu.memory_space<vmem>>, vector<1x8x512xf32>
    %15 = vector.shape_cast %14 : vector<1x8x512xf32> to vector<8x512xf32>
    %c0_14 = arith.constant 0 : index
    %c0_15 = arith.constant 0 : index
    %16 = vector.load %arg4[%c0_14, %c0_15] : memref<128x512xf32, #tpu.memory_space<vmem>>, vector<128x512xf32>
    %cst_16 = arith.constant dense<0.000000e+00> : vector<8x512xf32>
    %17 = tpu.matmul %12, %16, %cst_16 {dimension_numbers = #tpu.dot_dimension_numbers<[1], [0], [0], [1], [0, 0, 1, 1], [], []>} : vector<8x128xf32>, vector<128x512xf32>, vector<8x512xf32> -> vector<8x512xf32>
    %18 = arith.addf %15, %17 : vector<8x512xf32>
    %19 = vector.extract_strided_slice %18 {offsets = [0, 0], sizes = [8, 384], strides = [1, 1]} : vector<8x512xf32> to vector<8x384xf32>
    %20 = arith.negf %19 : vector<8x384xf32>
    %21 = math.exp %20 : vector<8x384xf32>
    %cst_17 = arith.constant 1.000000e+00 : f32
    %22 = vector.broadcast %cst_17 : f32 to vector<8x384xf32>
    %23 = arith.addf %22, %21 : vector<8x384xf32>
    %24 = arith.divf %22, %23 : vector<8x384xf32>
    %25 = vector.extract_strided_slice %24 {offsets = [0, 0], sizes = [8, 128], strides = [1, 1]} : vector<8x384xf32> to vector<8x128xf32>
    %26 = vector.extract_strided_slice %24 {offsets = [0, 128], sizes = [8, 128], strides = [1, 1]} : vector<8x384xf32> to vector<8x128xf32>
    %27 = vector.extract_strided_slice %24 {offsets = [0, 256], sizes = [8, 128], strides = [1, 1]} : vector<8x384xf32> to vector<8x128xf32>
    %28 = vector.extract_strided_slice %18 {offsets = [0, 384], sizes = [8, 128], strides = [1, 1]} : vector<8x512xf32> to vector<8x128xf32>
    %29 = math.tanh %28 : vector<8x128xf32>
    %30 = arith.mulf %26, %12 : vector<8x128xf32>
    %31 = arith.mulf %25, %29 : vector<8x128xf32>
    %32 = arith.addf %30, %31 : vector<8x128xf32>
    %33 = math.tanh %32 : vector<8x128xf32>
    %34 = arith.mulf %27, %33 : vector<8x128xf32>
    %35 = tpu.concatenate %34, %12 in 1 : vector<8x128xf32>, vector<8x128xf32> -> vector<8x256xf32>
    %c0_18 = arith.constant 0 : index
    %c0_19 = arith.constant 0 : index
    %36 = vector.load %arg9[%c0_18, %c0_19] : memref<256x512xf32, #tpu.memory_space<vmem>>, vector<256x512xf32>
    %cst_20 = arith.constant dense<0.000000e+00> : vector<8x512xf32>
    %37 = tpu.matmul %35, %36, %cst_20 {dimension_numbers = #tpu.dot_dimension_numbers<[1], [0], [0], [1], [0, 0, 1, 1], [], []>} : vector<8x256xf32>, vector<256x512xf32>, vector<8x512xf32> -> vector<8x512xf32>
    %38 = arith.addf %37, %11 : vector<8x512xf32>
    %39 = vector.extract_strided_slice %38 {offsets = [0, 0], sizes = [8, 384], strides = [1, 1]} : vector<8x512xf32> to vector<8x384xf32>
    %40 = arith.negf %39 : vector<8x384xf32>
    %41 = math.exp %40 : vector<8x384xf32>
    %cst_21 = arith.constant 1.000000e+00 : f32
    %42 = vector.broadcast %cst_21 : f32 to vector<8x384xf32>
    %43 = arith.addf %42, %41 : vector<8x384xf32>
    %44 = arith.divf %42, %43 : vector<8x384xf32>
    %45 = vector.extract_strided_slice %44 {offsets = [0, 0], sizes = [8, 128], strides = [1, 1]} : vector<8x384xf32> to vector<8x128xf32>
    %46 = vector.extract_strided_slice %44 {offsets = [0, 128], sizes = [8, 128], strides = [1, 1]} : vector<8x384xf32> to vector<8x128xf32>
    %47 = vector.extract_strided_slice %44 {offsets = [0, 256], sizes = [8, 128], strides = [1, 1]} : vector<8x384xf32> to vector<8x128xf32>
    %48 = vector.extract_strided_slice %38 {offsets = [0, 384], sizes = [8, 128], strides = [1, 1]} : vector<8x512xf32> to vector<8x128xf32>
    %49 = math.tanh %48 : vector<8x128xf32>
    %50 = arith.mulf %46, %12 : vector<8x128xf32>
    %51 = arith.mulf %45, %49 : vector<8x128xf32>
    %52 = arith.addf %50, %51 : vector<8x128xf32>
    %53 = math.tanh %52 : vector<8x128xf32>
    %54 = arith.mulf %47, %53 : vector<8x128xf32>
    %55 = math.tanh %54 : vector<8x128xf32>
    %56 = arith.index_cast %c0_i32 : i32 to index
    %c0_22 = arith.constant 0 : index
    %c0_23 = arith.constant 0 : index
    %57 = vector.load %arg7[%56, %c0_22, %c0_23] : memref<8x8x128xf32, #tpu.memory_space<vmem>>, vector<1x8x128xf32>
    %58 = vector.shape_cast %57 : vector<1x8x128xf32> to vector<8x128xf32>
    %59 = vector.shape_cast %55 : vector<8x128xf32> to vector<1x8x128xf32>
    tpu.vector_store %arg7[%56, %c0_22, %c0_23], %59 {strides = array<i32>} : memref<8x8x128xf32, #tpu.memory_space<vmem>>, vector<1x8x128xf32>,
    %c1_i32 = arith.constant 1 : i32
    %60 = arith.index_cast %c1_i32 : i32 to index
    %c0_24 = arith.constant 0 : index
    %c0_25 = arith.constant 0 : index
    %61 = vector.load %arg8[%60, %c0_24, %c0_25] : memref<8x8x512xf32, #tpu.memory_space<vmem>>, vector<1x8x512xf32>
    %62 = vector.shape_cast %61 : vector<1x8x512xf32> to vector<8x512xf32>
    %c0_26 = arith.constant 0 : index
    %c0_27 = arith.constant 0 : index
    %63 = vector.load %arg4[%c0_26, %c0_27] : memref<128x512xf32, #tpu.memory_space<vmem>>, vector<128x512xf32>
    %cst_28 = arith.constant dense<0.000000e+00> : vector<8x512xf32>
    %64 = tpu.matmul %34, %63, %cst_28 {dimension_numbers = #tpu.dot_dimension_numbers<[1], [0], [0], [1], [0, 0, 1, 1], [], []>} : vector<8x128xf32>, vector<128x512xf32>, vector<8x512xf32> -> vector<8x512xf32>
    %65 = arith.addf %62, %64 : vector<8x512xf32>
    %66 = vector.extract_strided_slice %65 {offsets = [0, 0], sizes = [8, 384], strides = [1, 1]} : vector<8x512xf32> to vector<8x384xf32>
    %67 = arith.negf %66 : vector<8x384xf32>
    %68 = math.exp %67 : vector<8x384xf32>
    %cst_29 = arith.constant 1.000000e+00 : f32
    %69 = vector.broadcast %cst_29 : f32 to vector<8x384xf32>
    %70 = arith.addf %69, %68 : vector<8x384xf32>
    %71 = arith.divf %69, %70 : vector<8x384xf32>
    %72 = vector.extract_strided_slice %71 {offsets = [0, 0], sizes = [8, 128], strides = [1, 1]} : vector<8x384xf32> to vector<8x128xf32>
    %73 = vector.extract_strided_slice %71 {offsets = [0, 128], sizes = [8, 128], strides = [1, 1]} : vector<8x384xf32> to vector<8x128xf32>
    %74 = vector.extract_strided_slice %71 {offsets = [0, 256], sizes = [8, 128], strides = [1, 1]} : vector<8x384xf32> to vector<8x128xf32>
    %75 = vector.extract_strided_slice %65 {offsets = [0, 384], sizes = [8, 128], strides = [1, 1]} : vector<8x512xf32> to vector<8x128xf32>
    %76 = math.tanh %75 : vector<8x128xf32>
    %77 = arith.mulf %73, %32 : vector<8x128xf32>
    %78 = arith.mulf %72, %76 : vector<8x128xf32>
    %79 = arith.addf %77, %78 : vector<8x128xf32>
    %80 = math.tanh %79 : vector<8x128xf32>
    %81 = arith.mulf %74, %80 : vector<8x128xf32>
    %82 = tpu.concatenate %81, %54 in 1 : vector<8x128xf32>, vector<8x128xf32> -> vector<8x256xf32>
    %c0_30 = arith.constant 0 : index
    %c0_31 = arith.constant 0 : index
    %83 = vector.load %arg9[%c0_30, %c0_31] : memref<256x512xf32, #tpu.memory_space<vmem>>, vector<256x512xf32>
    %cst_32 = arith.constant dense<0.000000e+00> : vector<8x512xf32>
    %84 = tpu.matmul %82, %83, %cst_32 {dimension_numbers = #tpu.dot_dimension_numbers<[1], [0], [0], [1], [0, 0, 1, 1], [], []>} : vector<8x256xf32>, vector<256x512xf32>, vector<8x512xf32> -> vector<8x512xf32>
    %85 = arith.addf %84, %11 : vector<8x512xf32>
    %86 = vector.extract_strided_slice %85 {offsets = [0, 0], sizes = [8, 384], strides = [1, 1]} : vector<8x512xf32> to vector<8x384xf32>
    %87 = arith.negf %86 : vector<8x384xf32>
    %88 = math.exp %87 : vector<8x384xf32>
    %cst_33 = arith.constant 1.000000e+00 : f32
    %89 = vector.broadcast %cst_33 : f32 to vector<8x384xf32>
    %90 = arith.addf %89, %88 : vector<8x384xf32>
    %91 = arith.divf %89, %90 : vector<8x384xf32>
    %92 = vector.extract_strided_slice %91 {offsets = [0, 0], sizes = [8, 128], strides = [1, 1]} : vector<8x384xf32> to vector<8x128xf32>
    %93 = vector.extract_strided_slice %91 {offsets = [0, 128], sizes = [8, 128], strides = [1, 1]} : vector<8x384xf32> to vector<8x128xf32>
    %94 = vector.extract_strided_slice %91 {offsets = [0, 256], sizes = [8, 128], strides = [1, 1]} : vector<8x384xf32> to vector<8x128xf32>
    %95 = vector.extract_strided_slice %85 {offsets = [0, 384], sizes = [8, 128], strides = [1, 1]} : vector<8x512xf32> to vector<8x128xf32>
    %96 = math.tanh %95 : vector<8x128xf32>
    %97 = arith.mulf %93, %52 : vector<8x128xf32>
    %98 = arith.mulf %92, %96 : vector<8x128xf32>
    %99 = arith.addf %97, %98 : vector<8x128xf32>
    %100 = math.tanh %99 : vector<8x128xf32>
    %101 = arith.mulf %94, %100 : vector<8x128xf32>
    %102 = math.tanh %101 : vector<8x128xf32>
    %103 = arith.index_cast %c1_i32 : i32 to index
    %c0_34 = arith.constant 0 : index
    %c0_35 = arith.constant 0 : index
    %104 = vector.load %arg7[%103, %c0_34, %c0_35] : memref<8x8x128xf32, #tpu.memory_space<vmem>>, vector<1x8x128xf32>
    %105 = vector.shape_cast %104 : vector<1x8x128xf32> to vector<8x128xf32>
    %106 = vector.shape_cast %102 : vector<8x128xf32> to vector<1x8x128xf32>
    tpu.vector_store %arg7[%103, %c0_34, %c0_35], %106 {strides = array<i32>} : memref<8x8x128xf32, #tpu.memory_space<vmem>>, vector<1x8x128xf32>,
    %c2_i32 = arith.constant 2 : i32
    %107 = arith.index_cast %c2_i32 : i32 to index
    %c0_36 = arith.constant 0 : index
    %c0_37 = arith.constant 0 : index
    %108 = vector.load %arg8[%107, %c0_36, %c0_37] : memref<8x8x512xf32, #tpu.memory_space<vmem>>, vector<1x8x512xf32>
    %109 = vector.shape_cast %108 : vector<1x8x512xf32> to vector<8x512xf32>
    %c0_38 = arith.constant 0 : index
    %c0_39 = arith.constant 0 : index
    %110 = vector.load %arg4[%c0_38, %c0_39] : memref<128x512xf32, #tpu.memory_space<vmem>>, vector<128x512xf32>
    %cst_40 = arith.constant dense<0.000000e+00> : vector<8x512xf32>
    %111 = tpu.matmul %81, %110, %cst_40 {dimension_numbers = #tpu.dot_dimension_numbers<[1], [0], [0], [1], [0, 0, 1, 1], [], []>} : vector<8x128xf32>, vector<128x512xf32>, vector<8x512xf32> -> vector<8x512xf32>
    %112 = arith.addf %109, %111 : vector<8x512xf32>
    %113 = vector.extract_strided_slice %112 {offsets = [0, 0], sizes = [8, 384], strides = [1, 1]} : vector<8x512xf32> to vector<8x384xf32>
    %114 = arith.negf %113 : vector<8x384xf32>
    %115 = math.exp %114 : vector<8x384xf32>
    %cst_41 = arith.constant 1.000000e+00 : f32
    %116 = vector.broadcast %cst_41 : f32 to vector<8x384xf32>
    %117 = arith.addf %116, %115 : vector<8x384xf32>
    %118 = arith.divf %116, %117 : vector<8x384xf32>
    %119 = vector.extract_strided_slice %118 {offsets = [0, 0], sizes = [8, 128], strides = [1, 1]} : vector<8x384xf32> to vector<8x128xf32>
    %120 = vector.extract_strided_slice %118 {offsets = [0, 128], sizes = [8, 128], strides = [1, 1]} : vector<8x384xf32> to vector<8x128xf32>
    %121 = vector.extract_strided_slice %118 {offsets = [0, 256], sizes = [8, 128], strides = [1, 1]} : vector<8x384xf32> to vector<8x128xf32>
    %122 = vector.extract_strided_slice %112 {offsets = [0, 384], sizes = [8, 128], strides = [1, 1]} : vector<8x512xf32> to vector<8x128xf32>
    %123 = math.tanh %122 : vector<8x128xf32>
    %124 = arith.mulf %120, %79 : vector<8x128xf32>
    %125 = arith.mulf %119, %123 : vector<8x128xf32>
    %126 = arith.addf %124, %125 : vector<8x128xf32>
    %127 = math.tanh %126 : vector<8x128xf32>
    %128 = arith.mulf %121, %127 : vector<8x128xf32>
    %129 = tpu.concatenate %128, %101 in 1 : vector<8x128xf32>, vector<8x128xf32> -> vector<8x256xf32>
    %c0_42 = arith.constant 0 : index
    %c0_43 = arith.constant 0 : index
    %130 = vector.load %arg9[%c0_42, %c0_43] : memref<256x512xf32, #tpu.memory_space<vmem>>, vector<256x512xf32>
    %cst_44 = arith.constant dense<0.000000e+00> : vector<8x512xf32>
    %131 = tpu.matmul %129, %130, %cst_44 {dimension_numbers = #tpu.dot_dimension_numbers<[1], [0], [0], [1], [0, 0, 1, 1], [], []>} : vector<8x256xf32>, vector<256x512xf32>, vector<8x512xf32> -> vector<8x512xf32>
    %132 = arith.addf %131, %11 : vector<8x512xf32>
    %133 = vector.extract_strided_slice %132 {offsets = [0, 0], sizes = [8, 384], strides = [1, 1]} : vector<8x512xf32> to vector<8x384xf32>
    %134 = arith.negf %133 : vector<8x384xf32>
    %135 = math.exp %134 : vector<8x384xf32>
    %cst_45 = arith.constant 1.000000e+00 : f32
    %136 = vector.broadcast %cst_45 : f32 to vector<8x384xf32>
    %137 = arith.addf %136, %135 : vector<8x384xf32>
    %138 = arith.divf %136, %137 : vector<8x384xf32>
    %139 = vector.extract_strided_slice %138 {offsets = [0, 0], sizes = [8, 128], strides = [1, 1]} : vector<8x384xf32> to vector<8x128xf32>
    %140 = vector.extract_strided_slice %138 {offsets = [0, 128], sizes = [8, 128], strides = [1, 1]} : vector<8x384xf32> to vector<8x128xf32>
    %141 = vector.extract_strided_slice %138 {offsets = [0, 256], sizes = [8, 128], strides = [1, 1]} : vector<8x384xf32> to vector<8x128xf32>
    %142 = vector.extract_strided_slice %132 {offsets = [0, 384], sizes = [8, 128], strides = [1, 1]} : vector<8x512xf32> to vector<8x128xf32>
    %143 = math.tanh %142 : vector<8x128xf32>
    %144 = arith.mulf %140, %99 : vector<8x128xf32>
    %145 = arith.mulf %139, %143 : vector<8x128xf32>
    %146 = arith.addf %144, %145 : vector<8x128xf32>
    %147 = math.tanh %146 : vector<8x128xf32>
    %148 = arith.mulf %141, %147 : vector<8x128xf32>
    %149 = math.tanh %148 : vector<8x128xf32>
    %150 = arith.index_cast %c2_i32 : i32 to index
    %c0_46 = arith.constant 0 : index
    %c0_47 = arith.constant 0 : index
    %151 = vector.load %arg7[%150, %c0_46, %c0_47] : memref<8x8x128xf32, #tpu.memory_space<vmem>>, vector<1x8x128xf32>
    %152 = vector.shape_cast %151 : vector<1x8x128xf32> to vector<8x128xf32>
    %153 = vector.shape_cast %149 : vector<8x128xf32> to vector<1x8x128xf32>
    tpu.vector_store %arg7[%150, %c0_46, %c0_47], %153 {strides = array<i32>} : memref<8x8x128xf32, #tpu.memory_space<vmem>>, vector<1x8x128xf32>,
    %c3_i32 = arith.constant 3 : i32
    %154 = arith.index_cast %c3_i32 : i32 to index
    %c0_48 = arith.constant 0 : index
    %c0_49 = arith.constant 0 : index
    %155 = vector.load %arg8[%154, %c0_48, %c0_49] : memref<8x8x512xf32, #tpu.memory_space<vmem>>, vector<1x8x512xf32>
    %156 = vector.shape_cast %155 : vector<1x8x512xf32> to vector<8x512xf32>
    %c0_50 = arith.constant 0 : index
    %c0_51 = arith.constant 0 : index
    %157 = vector.load %arg4[%c0_50, %c0_51] : memref<128x512xf32, #tpu.memory_space<vmem>>, vector<128x512xf32>
    %cst_52 = arith.constant dense<0.000000e+00> : vector<8x512xf32>
    %158 = tpu.matmul %128, %157, %cst_52 {dimension_numbers = #tpu.dot_dimension_numbers<[1], [0], [0], [1], [0, 0, 1, 1], [], []>} : vector<8x128xf32>, vector<128x512xf32>, vector<8x512xf32> -> vector<8x512xf32>
    %159 = arith.addf %156, %158 : vector<8x512xf32>
    %160 = vector.extract_strided_slice %159 {offsets = [0, 0], sizes = [8, 384], strides = [1, 1]} : vector<8x512xf32> to vector<8x384xf32>
    %161 = arith.negf %160 : vector<8x384xf32>
    %162 = math.exp %161 : vector<8x384xf32>
    %cst_53 = arith.constant 1.000000e+00 : f32
    %163 = vector.broadcast %cst_53 : f32 to vector<8x384xf32>
    %164 = arith.addf %163, %162 : vector<8x384xf32>
    %165 = arith.divf %163, %164 : vector<8x384xf32>
    %166 = vector.extract_strided_slice %165 {offsets = [0, 0], sizes = [8, 128], strides = [1, 1]} : vector<8x384xf32> to vector<8x128xf32>
    %167 = vector.extract_strided_slice %165 {offsets = [0, 128], sizes = [8, 128], strides = [1, 1]} : vector<8x384xf32> to vector<8x128xf32>
    %168 = vector.extract_strided_slice %165 {offsets = [0, 256], sizes = [8, 128], strides = [1, 1]} : vector<8x384xf32> to vector<8x128xf32>
    %169 = vector.extract_strided_slice %159 {offsets = [0, 384], sizes = [8, 128], strides = [1, 1]} : vector<8x512xf32> to vector<8x128xf32>
    %170 = math.tanh %169 : vector<8x128xf32>
    %171 = arith.mulf %167, %126 : vector<8x128xf32>
    %172 = arith.mulf %166, %170 : vector<8x128xf32>
    %173 = arith.addf %171, %172 : vector<8x128xf32>
    %174 = math.tanh %173 : vector<8x128xf32>
    %175 = arith.mulf %168, %174 : vector<8x128xf32>
    %176 = tpu.concatenate %175, %148 in 1 : vector<8x128xf32>, vector<8x128xf32> -> vector<8x256xf32>
    %c0_54 = arith.constant 0 : index
    %c0_55 = arith.constant 0 : index
    %177 = vector.load %arg9[%c0_54, %c0_55] : memref<256x512xf32, #tpu.memory_space<vmem>>, vector<256x512xf32>
    %cst_56 = arith.constant dense<0.000000e+00> : vector<8x512xf32>
    %178 = tpu.matmul %176, %177, %cst_56 {dimension_numbers = #tpu.dot_dimension_numbers<[1], [0], [0], [1], [0, 0, 1, 1], [], []>} : vector<8x256xf32>, vector<256x512xf32>, vector<8x512xf32> -> vector<8x512xf32>
    %179 = arith.addf %178, %11 : vector<8x512xf32>
    %180 = vector.extract_strided_slice %179 {offsets = [0, 0], sizes = [8, 384], strides = [1, 1]} : vector<8x512xf32> to vector<8x384xf32>
    %181 = arith.negf %180 : vector<8x384xf32>
    %182 = math.exp %181 : vector<8x384xf32>
    %cst_57 = arith.constant 1.000000e+00 : f32
    %183 = vector.broadcast %cst_57 : f32 to vector<8x384xf32>
    %184 = arith.addf %183, %182 : vector<8x384xf32>
    %185 = arith.divf %183, %184 : vector<8x384xf32>
    %186 = vector.extract_strided_slice %185 {offsets = [0, 0], sizes = [8, 128], strides = [1, 1]} : vector<8x384xf32> to vector<8x128xf32>
    %187 = vector.extract_strided_slice %185 {offsets = [0, 128], sizes = [8, 128], strides = [1, 1]} : vector<8x384xf32> to vector<8x128xf32>
    %188 = vector.extract_strided_slice %185 {offsets = [0, 256], sizes = [8, 128], strides = [1, 1]} : vector<8x384xf32> to vector<8x128xf32>
    %189 = vector.extract_strided_slice %179 {offsets = [0, 384], sizes = [8, 128], strides = [1, 1]} : vector<8x512xf32> to vector<8x128xf32>
    %190 = math.tanh %189 : vector<8x128xf32>
    %191 = arith.mulf %187, %146 : vector<8x128xf32>
    %192 = arith.mulf %186, %190 : vector<8x128xf32>
    %193 = arith.addf %191, %192 : vector<8x128xf32>
    %194 = math.tanh %193 : vector<8x128xf32>
    %195 = arith.mulf %188, %194 : vector<8x128xf32>
    %196 = math.tanh %195 : vector<8x128xf32>
    %197 = arith.index_cast %c3_i32 : i32 to index
    %c0_58 = arith.constant 0 : index
    %c0_59 = arith.constant 0 : index
    %198 = vector.load %arg7[%197, %c0_58, %c0_59] : memref<8x8x128xf32, #tpu.memory_space<vmem>>, vector<1x8x128xf32>
    %199 = vector.shape_cast %198 : vector<1x8x128xf32> to vector<8x128xf32>
    %200 = vector.shape_cast %196 : vector<8x128xf32> to vector<1x8x128xf32>
    tpu.vector_store %arg7[%197, %c0_58, %c0_59], %200 {strides = array<i32>} : memref<8x8x128xf32, #tpu.memory_space<vmem>>, vector<1x8x128xf32>,
    %c4_i32 = arith.constant 4 : i32
    %201 = arith.index_cast %c4_i32 : i32 to index
    %c0_60 = arith.constant 0 : index
    %c0_61 = arith.constant 0 : index
    %202 = vector.load %arg8[%201, %c0_60, %c0_61] : memref<8x8x512xf32, #tpu.memory_space<vmem>>, vector<1x8x512xf32>
    %203 = vector.shape_cast %202 : vector<1x8x512xf32> to vector<8x512xf32>
    %c0_62 = arith.constant 0 : index
    %c0_63 = arith.constant 0 : index
    %204 = vector.load %arg4[%c0_62, %c0_63] : memref<128x512xf32, #tpu.memory_space<vmem>>, vector<128x512xf32>
    %cst_64 = arith.constant dense<0.000000e+00> : vector<8x512xf32>
    %205 = tpu.matmul %175, %204, %cst_64 {dimension_numbers = #tpu.dot_dimension_numbers<[1], [0], [0], [1], [0, 0, 1, 1], [], []>} : vector<8x128xf32>, vector<128x512xf32>, vector<8x512xf32> -> vector<8x512xf32>
    %206 = arith.addf %203, %205 : vector<8x512xf32>
    %207 = vector.extract_strided_slice %206 {offsets = [0, 0], sizes = [8, 384], strides = [1, 1]} : vector<8x512xf32> to vector<8x384xf32>
    %208 = arith.negf %207 : vector<8x384xf32>
    %209 = math.exp %208 : vector<8x384xf32>
    %cst_65 = arith.constant 1.000000e+00 : f32
    %210 = vector.broadcast %cst_65 : f32 to vector<8x384xf32>
    %211 = arith.addf %210, %209 : vector<8x384xf32>
    %212 = arith.divf %210, %211 : vector<8x384xf32>
    %213 = vector.extract_strided_slice %212 {offsets = [0, 0], sizes = [8, 128], strides = [1, 1]} : vector<8x384xf32> to vector<8x128xf32>
    %214 = vector.extract_strided_slice %212 {offsets = [0, 128], sizes = [8, 128], strides = [1, 1]} : vector<8x384xf32> to vector<8x128xf32>
    %215 = vector.extract_strided_slice %212 {offsets = [0, 256], sizes = [8, 128], strides = [1, 1]} : vector<8x384xf32> to vector<8x128xf32>
    %216 = vector.extract_strided_slice %206 {offsets = [0, 384], sizes = [8, 128], strides = [1, 1]} : vector<8x512xf32> to vector<8x128xf32>
    %217 = math.tanh %216 : vector<8x128xf32>
    %218 = arith.mulf %214, %173 : vector<8x128xf32>
    %219 = arith.mulf %213, %217 : vector<8x128xf32>
    %220 = arith.addf %218, %219 : vector<8x128xf32>
    %221 = math.tanh %220 : vector<8x128xf32>
    %222 = arith.mulf %215, %221 : vector<8x128xf32>
    %223 = tpu.concatenate %222, %195 in 1 : vector<8x128xf32>, vector<8x128xf32> -> vector<8x256xf32>
    %c0_66 = arith.constant 0 : index
    %c0_67 = arith.constant 0 : index
    %224 = vector.load %arg9[%c0_66, %c0_67] : memref<256x512xf32, #tpu.memory_space<vmem>>, vector<256x512xf32>
    %cst_68 = arith.constant dense<0.000000e+00> : vector<8x512xf32>
    %225 = tpu.matmul %223, %224, %cst_68 {dimension_numbers = #tpu.dot_dimension_numbers<[1], [0], [0], [1], [0, 0, 1, 1], [], []>} : vector<8x256xf32>, vector<256x512xf32>, vector<8x512xf32> -> vector<8x512xf32>
    %226 = arith.addf %225, %11 : vector<8x512xf32>
    %227 = vector.extract_strided_slice %226 {offsets = [0, 0], sizes = [8, 384], strides = [1, 1]} : vector<8x512xf32> to vector<8x384xf32>
    %228 = arith.negf %227 : vector<8x384xf32>
    %229 = math.exp %228 : vector<8x384xf32>
    %cst_69 = arith.constant 1.000000e+00 : f32
    %230 = vector.broadcast %cst_69 : f32 to vector<8x384xf32>
    %231 = arith.addf %230, %229 : vector<8x384xf32>
    %232 = arith.divf %230, %231 : vector<8x384xf32>
    %233 = vector.extract_strided_slice %232 {offsets = [0, 0], sizes = [8, 128], strides = [1, 1]} : vector<8x384xf32> to vector<8x128xf32>
    %234 = vector.extract_strided_slice %232 {offsets = [0, 128], sizes = [8, 128], strides = [1, 1]} : vector<8x384xf32> to vector<8x128xf32>
    %235 = vector.extract_strided_slice %232 {offsets = [0, 256], sizes = [8, 128], strides = [1, 1]} : vector<8x384xf32> to vector<8x128xf32>
    %236 = vector.extract_strided_slice %226 {offsets = [0, 384], sizes = [8, 128], strides = [1, 1]} : vector<8x512xf32> to vector<8x128xf32>
    %237 = math.tanh %236 : vector<8x128xf32>
    %238 = arith.mulf %234, %193 : vector<8x128xf32>
    %239 = arith.mulf %233, %237 : vector<8x128xf32>
    %240 = arith.addf %238, %239 : vector<8x128xf32>
    %241 = math.tanh %240 : vector<8x128xf32>
    %242 = arith.mulf %235, %241 : vector<8x128xf32>
    %243 = math.tanh %242 : vector<8x128xf32>
    %244 = arith.index_cast %c4_i32 : i32 to index
    %c0_70 = arith.constant 0 : index
    %c0_71 = arith.constant 0 : index
    %245 = vector.load %arg7[%244, %c0_70, %c0_71] : memref<8x8x128xf32, #tpu.memory_space<vmem>>, vector<1x8x128xf32>
    %246 = vector.shape_cast %245 : vector<1x8x128xf32> to vector<8x128xf32>
    %247 = vector.shape_cast %243 : vector<8x128xf32> to vector<1x8x128xf32>
    tpu.vector_store %arg7[%244, %c0_70, %c0_71], %247 {strides = array<i32>} : memref<8x8x128xf32, #tpu.memory_space<vmem>>, vector<1x8x128xf32>,
    %c5_i32 = arith.constant 5 : i32
    %248 = arith.index_cast %c5_i32 : i32 to index
    %c0_72 = arith.constant 0 : index
    %c0_73 = arith.constant 0 : index
    %249 = vector.load %arg8[%248, %c0_72, %c0_73] : memref<8x8x512xf32, #tpu.memory_space<vmem>>, vector<1x8x512xf32>
    %250 = vector.shape_cast %249 : vector<1x8x512xf32> to vector<8x512xf32>
    %c0_74 = arith.constant 0 : index
    %c0_75 = arith.constant 0 : index
    %251 = vector.load %arg4[%c0_74, %c0_75] : memref<128x512xf32, #tpu.memory_space<vmem>>, vector<128x512xf32>
    %cst_76 = arith.constant dense<0.000000e+00> : vector<8x512xf32>
    %252 = tpu.matmul %222, %251, %cst_76 {dimension_numbers = #tpu.dot_dimension_numbers<[1], [0], [0], [1], [0, 0, 1, 1], [], []>} : vector<8x128xf32>, vector<128x512xf32>, vector<8x512xf32> -> vector<8x512xf32>
    %253 = arith.addf %250, %252 : vector<8x512xf32>
    %254 = vector.extract_strided_slice %253 {offsets = [0, 0], sizes = [8, 384], strides = [1, 1]} : vector<8x512xf32> to vector<8x384xf32>
    %255 = arith.negf %254 : vector<8x384xf32>
    %256 = math.exp %255 : vector<8x384xf32>
    %cst_77 = arith.constant 1.000000e+00 : f32
    %257 = vector.broadcast %cst_77 : f32 to vector<8x384xf32>
    %258 = arith.addf %257, %256 : vector<8x384xf32>
    %259 = arith.divf %257, %258 : vector<8x384xf32>
    %260 = vector.extract_strided_slice %259 {offsets = [0, 0], sizes = [8, 128], strides = [1, 1]} : vector<8x384xf32> to vector<8x128xf32>
    %261 = vector.extract_strided_slice %259 {offsets = [0, 128], sizes = [8, 128], strides = [1, 1]} : vector<8x384xf32> to vector<8x128xf32>
    %262 = vector.extract_strided_slice %259 {offsets = [0, 256], sizes = [8, 128], strides = [1, 1]} : vector<8x384xf32> to vector<8x128xf32>
    %263 = vector.extract_strided_slice %253 {offsets = [0, 384], sizes = [8, 128], strides = [1, 1]} : vector<8x512xf32> to vector<8x128xf32>
    %264 = math.tanh %263 : vector<8x128xf32>
    %265 = arith.mulf %261, %220 : vector<8x128xf32>
    %266 = arith.mulf %260, %264 : vector<8x128xf32>
    %267 = arith.addf %265, %266 : vector<8x128xf32>
    %268 = math.tanh %267 : vector<8x128xf32>
    %269 = arith.mulf %262, %268 : vector<8x128xf32>
    %270 = tpu.concatenate %269, %242 in 1 : vector<8x128xf32>, vector<8x128xf32> -> vector<8x256xf32>
    %c0_78 = arith.constant 0 : index
    %c0_79 = arith.constant 0 : index
    %271 = vector.load %arg9[%c0_78, %c0_79] : memref<256x512xf32, #tpu.memory_space<vmem>>, vector<256x512xf32>
    %cst_80 = arith.constant dense<0.000000e+00> : vector<8x512xf32>
    %272 = tpu.matmul %270, %271, %cst_80 {dimension_numbers = #tpu.dot_dimension_numbers<[1], [0], [0], [1], [0, 0, 1, 1], [], []>} : vector<8x256xf32>, vector<256x512xf32>, vector<8x512xf32> -> vector<8x512xf32>
    %273 = arith.addf %272, %11 : vector<8x512xf32>
    %274 = vector.extract_strided_slice %273 {offsets = [0, 0], sizes = [8, 384], strides = [1, 1]} : vector<8x512xf32> to vector<8x384xf32>
    %275 = arith.negf %274 : vector<8x384xf32>
    %276 = math.exp %275 : vector<8x384xf32>
    %cst_81 = arith.constant 1.000000e+00 : f32
    %277 = vector.broadcast %cst_81 : f32 to vector<8x384xf32>
    %278 = arith.addf %277, %276 : vector<8x384xf32>
    %279 = arith.divf %277, %278 : vector<8x384xf32>
    %280 = vector.extract_strided_slice %279 {offsets = [0, 0], sizes = [8, 128], strides = [1, 1]} : vector<8x384xf32> to vector<8x128xf32>
    %281 = vector.extract_strided_slice %279 {offsets = [0, 128], sizes = [8, 128], strides = [1, 1]} : vector<8x384xf32> to vector<8x128xf32>
    %282 = vector.extract_strided_slice %279 {offsets = [0, 256], sizes = [8, 128], strides = [1, 1]} : vector<8x384xf32> to vector<8x128xf32>
    %283 = vector.extract_strided_slice %273 {offsets = [0, 384], sizes = [8, 128], strides = [1, 1]} : vector<8x512xf32> to vector<8x128xf32>
    %284 = math.tanh %283 : vector<8x128xf32>
    %285 = arith.mulf %281, %240 : vector<8x128xf32>
    %286 = arith.mulf %280, %284 : vector<8x128xf32>
    %287 = arith.addf %285, %286 : vector<8x128xf32>
    %288 = math.tanh %287 : vector<8x128xf32>
    %289 = arith.mulf %282, %288 : vector<8x128xf32>
    %290 = math.tanh %289 : vector<8x128xf32>
    %291 = arith.index_cast %c5_i32 : i32 to index
    %c0_82 = arith.constant 0 : index
    %c0_83 = arith.constant 0 : index
    %292 = vector.load %arg7[%291, %c0_82, %c0_83] : memref<8x8x128xf32, #tpu.memory_space<vmem>>, vector<1x8x128xf32>
    %293 = vector.shape_cast %292 : vector<1x8x128xf32> to vector<8x128xf32>
    %294 = vector.shape_cast %290 : vector<8x128xf32> to vector<1x8x128xf32>
    tpu.vector_store %arg7[%291, %c0_82, %c0_83], %294 {strides = array<i32>} : memref<8x8x128xf32, #tpu.memory_space<vmem>>, vector<1x8x128xf32>,
    %c6_i32 = arith.constant 6 : i32
    %295 = arith.index_cast %c6_i32 : i32 to index
    %c0_84 = arith.constant 0 : index
    %c0_85 = arith.constant 0 : index
    %296 = vector.load %arg8[%295, %c0_84, %c0_85] : memref<8x8x512xf32, #tpu.memory_space<vmem>>, vector<1x8x512xf32>
    %297 = vector.shape_cast %296 : vector<1x8x512xf32> to vector<8x512xf32>
    %c0_86 = arith.constant 0 : index
    %c0_87 = arith.constant 0 : index
    %298 = vector.load %arg4[%c0_86, %c0_87] : memref<128x512xf32, #tpu.memory_space<vmem>>, vector<128x512xf32>
    %cst_88 = arith.constant dense<0.000000e+00> : vector<8x512xf32>
    %299 = tpu.matmul %269, %298, %cst_88 {dimension_numbers = #tpu.dot_dimension_numbers<[1], [0], [0], [1], [0, 0, 1, 1], [], []>} : vector<8x128xf32>, vector<128x512xf32>, vector<8x512xf32> -> vector<8x512xf32>
    %300 = arith.addf %297, %299 : vector<8x512xf32>
    %301 = vector.extract_strided_slice %300 {offsets = [0, 0], sizes = [8, 384], strides = [1, 1]} : vector<8x512xf32> to vector<8x384xf32>
    %302 = arith.negf %301 : vector<8x384xf32>
    %303 = math.exp %302 : vector<8x384xf32>
    %cst_89 = arith.constant 1.000000e+00 : f32
    %304 = vector.broadcast %cst_89 : f32 to vector<8x384xf32>
    %305 = arith.addf %304, %303 : vector<8x384xf32>
    %306 = arith.divf %304, %305 : vector<8x384xf32>
    %307 = vector.extract_strided_slice %306 {offsets = [0, 0], sizes = [8, 128], strides = [1, 1]} : vector<8x384xf32> to vector<8x128xf32>
    %308 = vector.extract_strided_slice %306 {offsets = [0, 128], sizes = [8, 128], strides = [1, 1]} : vector<8x384xf32> to vector<8x128xf32>
    %309 = vector.extract_strided_slice %306 {offsets = [0, 256], sizes = [8, 128], strides = [1, 1]} : vector<8x384xf32> to vector<8x128xf32>
    %310 = vector.extract_strided_slice %300 {offsets = [0, 384], sizes = [8, 128], strides = [1, 1]} : vector<8x512xf32> to vector<8x128xf32>
    %311 = math.tanh %310 : vector<8x128xf32>
    %312 = arith.mulf %308, %267 : vector<8x128xf32>
    %313 = arith.mulf %307, %311 : vector<8x128xf32>
    %314 = arith.addf %312, %313 : vector<8x128xf32>
    %315 = math.tanh %314 : vector<8x128xf32>
    %316 = arith.mulf %309, %315 : vector<8x128xf32>
    %317 = tpu.concatenate %316, %289 in 1 : vector<8x128xf32>, vector<8x128xf32> -> vector<8x256xf32>
    %c0_90 = arith.constant 0 : index
    %c0_91 = arith.constant 0 : index
    %318 = vector.load %arg9[%c0_90, %c0_91] : memref<256x512xf32, #tpu.memory_space<vmem>>, vector<256x512xf32>
    %cst_92 = arith.constant dense<0.000000e+00> : vector<8x512xf32>
    %319 = tpu.matmul %317, %318, %cst_92 {dimension_numbers = #tpu.dot_dimension_numbers<[1], [0], [0], [1], [0, 0, 1, 1], [], []>} : vector<8x256xf32>, vector<256x512xf32>, vector<8x512xf32> -> vector<8x512xf32>
    %320 = arith.addf %319, %11 : vector<8x512xf32>
    %321 = vector.extract_strided_slice %320 {offsets = [0, 0], sizes = [8, 384], strides = [1, 1]} : vector<8x512xf32> to vector<8x384xf32>
    %322 = arith.negf %321 : vector<8x384xf32>
    %323 = math.exp %322 : vector<8x384xf32>
    %cst_93 = arith.constant 1.000000e+00 : f32
    %324 = vector.broadcast %cst_93 : f32 to vector<8x384xf32>
    %325 = arith.addf %324, %323 : vector<8x384xf32>
    %326 = arith.divf %324, %325 : vector<8x384xf32>
    %327 = vector.extract_strided_slice %326 {offsets = [0, 0], sizes = [8, 128], strides = [1, 1]} : vector<8x384xf32> to vector<8x128xf32>
    %328 = vector.extract_strided_slice %326 {offsets = [0, 128], sizes = [8, 128], strides = [1, 1]} : vector<8x384xf32> to vector<8x128xf32>
    %329 = vector.extract_strided_slice %326 {offsets = [0, 256], sizes = [8, 128], strides = [1, 1]} : vector<8x384xf32> to vector<8x128xf32>
    %330 = vector.extract_strided_slice %320 {offsets = [0, 384], sizes = [8, 128], strides = [1, 1]} : vector<8x512xf32> to vector<8x128xf32>
    %331 = math.tanh %330 : vector<8x128xf32>
    %332 = arith.mulf %328, %287 : vector<8x128xf32>
    %333 = arith.mulf %327, %331 : vector<8x128xf32>
    %334 = arith.addf %332, %333 : vector<8x128xf32>
    %335 = math.tanh %334 : vector<8x128xf32>
    %336 = arith.mulf %329, %335 : vector<8x128xf32>
    %337 = math.tanh %336 : vector<8x128xf32>
    %338 = arith.index_cast %c6_i32 : i32 to index
    %c0_94 = arith.constant 0 : index
    %c0_95 = arith.constant 0 : index
    %339 = vector.load %arg7[%338, %c0_94, %c0_95] : memref<8x8x128xf32, #tpu.memory_space<vmem>>, vector<1x8x128xf32>
    %340 = vector.shape_cast %339 : vector<1x8x128xf32> to vector<8x128xf32>
    %341 = vector.shape_cast %337 : vector<8x128xf32> to vector<1x8x128xf32>
    tpu.vector_store %arg7[%338, %c0_94, %c0_95], %341 {strides = array<i32>} : memref<8x8x128xf32, #tpu.memory_space<vmem>>, vector<1x8x128xf32>,
    %c7_i32 = arith.constant 7 : i32
    %342 = arith.index_cast %c7_i32 : i32 to index
    %c0_96 = arith.constant 0 : index
    %c0_97 = arith.constant 0 : index
    %343 = vector.load %arg8[%342, %c0_96, %c0_97] : memref<8x8x512xf32, #tpu.memory_space<vmem>>, vector<1x8x512xf32>
    %344 = vector.shape_cast %343 : vector<1x8x512xf32> to vector<8x512xf32>
    %c0_98 = arith.constant 0 : index
    %c0_99 = arith.constant 0 : index
    %345 = vector.load %arg4[%c0_98, %c0_99] : memref<128x512xf32, #tpu.memory_space<vmem>>, vector<128x512xf32>
    %cst_100 = arith.constant dense<0.000000e+00> : vector<8x512xf32>
    %346 = tpu.matmul %316, %345, %cst_100 {dimension_numbers = #tpu.dot_dimension_numbers<[1], [0], [0], [1], [0, 0, 1, 1], [], []>} : vector<8x128xf32>, vector<128x512xf32>, vector<8x512xf32> -> vector<8x512xf32>
    %347 = arith.addf %344, %346 : vector<8x512xf32>
    %348 = vector.extract_strided_slice %347 {offsets = [0, 0], sizes = [8, 384], strides = [1, 1]} : vector<8x512xf32> to vector<8x384xf32>
    %349 = arith.negf %348 : vector<8x384xf32>
    %350 = math.exp %349 : vector<8x384xf32>
    %cst_101 = arith.constant 1.000000e+00 : f32
    %351 = vector.broadcast %cst_101 : f32 to vector<8x384xf32>
    %352 = arith.addf %351, %350 : vector<8x384xf32>
    %353 = arith.divf %351, %352 : vector<8x384xf32>
    %354 = vector.extract_strided_slice %353 {offsets = [0, 0], sizes = [8, 128], strides = [1, 1]} : vector<8x384xf32> to vector<8x128xf32>
    %355 = vector.extract_strided_slice %353 {offsets = [0, 128], sizes = [8, 128], strides = [1, 1]} : vector<8x384xf32> to vector<8x128xf32>
    %356 = vector.extract_strided_slice %353 {offsets = [0, 256], sizes = [8, 128], strides = [1, 1]} : vector<8x384xf32> to vector<8x128xf32>
    %357 = vector.extract_strided_slice %347 {offsets = [0, 384], sizes = [8, 128], strides = [1, 1]} : vector<8x512xf32> to vector<8x128xf32>
    %358 = math.tanh %357 : vector<8x128xf32>
    %359 = arith.mulf %355, %314 : vector<8x128xf32>
    %360 = arith.mulf %354, %358 : vector<8x128xf32>
    %361 = arith.addf %359, %360 : vector<8x128xf32>
    %362 = math.tanh %361 : vector<8x128xf32>
    %363 = arith.mulf %356, %362 : vector<8x128xf32>
    %364 = tpu.concatenate %363, %336 in 1 : vector<8x128xf32>, vector<8x128xf32> -> vector<8x256xf32>
    %c0_102 = arith.constant 0 : index
    %c0_103 = arith.constant 0 : index
    %365 = vector.load %arg9[%c0_102, %c0_103] : memref<256x512xf32, #tpu.memory_space<vmem>>, vector<256x512xf32>
    %cst_104 = arith.constant dense<0.000000e+00> : vector<8x512xf32>
    %366 = tpu.matmul %364, %365, %cst_104 {dimension_numbers = #tpu.dot_dimension_numbers<[1], [0], [0], [1], [0, 0, 1, 1], [], []>} : vector<8x256xf32>, vector<256x512xf32>, vector<8x512xf32> -> vector<8x512xf32>
    %367 = arith.addf %366, %11 : vector<8x512xf32>
    %368 = vector.extract_strided_slice %367 {offsets = [0, 0], sizes = [8, 384], strides = [1, 1]} : vector<8x512xf32> to vector<8x384xf32>
    %369 = arith.negf %368 : vector<8x384xf32>
    %370 = math.exp %369 : vector<8x384xf32>
    %cst_105 = arith.constant 1.000000e+00 : f32
    %371 = vector.broadcast %cst_105 : f32 to vector<8x384xf32>
    %372 = arith.addf %371, %370 : vector<8x384xf32>
    %373 = arith.divf %371, %372 : vector<8x384xf32>
    %374 = vector.extract_strided_slice %373 {offsets = [0, 0], sizes = [8, 128], strides = [1, 1]} : vector<8x384xf32> to vector<8x128xf32>
    %375 = vector.extract_strided_slice %373 {offsets = [0, 128], sizes = [8, 128], strides = [1, 1]} : vector<8x384xf32> to vector<8x128xf32>
    %376 = vector.extract_strided_slice %373 {offsets = [0, 256], sizes = [8, 128], strides = [1, 1]} : vector<8x384xf32> to vector<8x128xf32>
    %377 = vector.extract_strided_slice %367 {offsets = [0, 384], sizes = [8, 128], strides = [1, 1]} : vector<8x512xf32> to vector<8x128xf32>
    %378 = math.tanh %377 : vector<8x128xf32>
    %379 = arith.mulf %375, %334 : vector<8x128xf32>
    %380 = arith.mulf %374, %378 : vector<8x128xf32>
    %381 = arith.addf %379, %380 : vector<8x128xf32>
    %382 = math.tanh %381 : vector<8x128xf32>
    %383 = arith.mulf %376, %382 : vector<8x128xf32>
    %384 = math.tanh %383 : vector<8x128xf32>
    %385 = arith.index_cast %c7_i32 : i32 to index
    %c0_106 = arith.constant 0 : index
    %c0_107 = arith.constant 0 : index
    %386 = vector.load %arg7[%385, %c0_106, %c0_107] : memref<8x8x128xf32, #tpu.memory_space<vmem>>, vector<1x8x128xf32>
    %387 = vector.shape_cast %386 : vector<1x8x128xf32> to vector<8x128xf32>
    %388 = vector.shape_cast %384 : vector<8x128xf32> to vector<1x8x128xf32>
    tpu.vector_store %arg7[%385, %c0_106, %c0_107], %388 {strides = array<i32>} : memref<8x8x128xf32, #tpu.memory_space<vmem>>, vector<1x8x128xf32>,
    %c8_i32 = arith.constant 8 : i32
    return
  }
  func.func @transform_0(%arg0: i32) -> (i32, i32, i32) {
    %c0_i32 = arith.constant 0 : i32
    %c0_i32_0 = arith.constant 0 : i32
    %c0_i32_1 = arith.constant 0 : i32
    %c0_i32_2 = arith.constant 0 : i32
    return %c0_i32, %c0_i32_0, %c0_i32_1 : i32, i32, i32
  }
  func.func @transform_1(%arg0: i32) -> (i32, i32) {
    %c0_i32 = arith.constant 0 : i32
    %c0_i32_0 = arith.constant 0 : i32
    %c0_i32_1 = arith.constant 0 : i32
    return %c0_i32, %c0_i32_0 : i32, i32
  }
  func.func @transform_2(%arg0: i32) -> (i32, i32) {
    %c0_i32 = arith.constant 0 : i32
    %c0_i32_0 = arith.constant 0 : i32
    %c0_i32_1 = arith.constant 0 : i32
    return %c0_i32, %c0_i32_0 : i32, i32
  }
  func.func @transform_3(%arg0: i32) -> (i32, i32) {
    %c0_i32 = arith.constant 0 : i32
    %c0_i32_0 = arith.constant 0 : i32
    %c0_i32_1 = arith.constant 0 : i32
    return %c0_i32, %c0_i32_0 : i32, i32
  }
  func.func @transform_4(%arg0: i32) -> (i32, i32) {
    %c0_i32 = arith.constant 0 : i32
    %c0_i32_0 = arith.constant 0 : i32
    %c0_i32_1 = arith.constant 0 : i32
    return %c0_i32, %c0_i32_0 : i32, i32
  }
  func.func @transform_6(%arg0: i32) -> (i32, i32, i32) {
    %c0_i32 = arith.constant 0 : i32
    %c0_i32_0 = arith.constant 0 : i32
    %c0_i32_1 = arith.constant 0 : i32
    %c0_i32_2 = arith.constant 0 : i32
    return %c0_i32, %c0_i32_0, %c0_i32_1 : i32, i32, i32
  }
}

</mosaic_0001>

<bundles_post_ra>
// kernel: timing_meta_forward.1
= control target key start
LH: loop header
LB: loop body
LE: loop exit
PB: predicated region body
PF: predicated region fallthrough
CT: control target
= control target key end

     0   :  { %11 = vsyncpa [#allocation6], 0  ;;  %s8685_s0 = inlined_call_operand.vmem [shape: f32[8,8,128], index: 0, kind: input, shape index: {}]   ;;  %s8686_s1 = inlined_call_operand.hbm [shape: f32[128,512], index: 1, kind: input, shape index: {}]   ;;  %s8687_s2 = inlined_call_operand.vmem [shape: f32[1,512], index: 2, kind: input, shape index: {}]   ;;  %s8688_s3 = inlined_call_operand.hbm [shape: f32[128,512], index: 3, kind: input, shape index: {}]   ;;  %s8689_s4 = inlined_call_operand.vmem [shape: f32[1,512], index: 4, kind: input, shape index: {}]   ;;  %s8690_s5 = inlined_call_operand.hbm [shape: f32[256,512], index: 5, kind: input, shape index: {}]   ;;  %s8691_s6 = inlined_call_operand.vmem [shape: f32[8,8,128], index: 6, kind: output, shape index: {}]  }
   0x1   :  { %12 = vsyncpa [#allocation8], 0  ;;  %s6806_s21 = smov [#allocation5]   ;;  %s6734_s25 = scalar_lea.hbm %s8686_s1, 8192 }
   0x2   :  { %s20_s22 = sshll.u32 %s6806_s21, 4  ;;  %p6735_p0 = scmp.ne.s32.totalorder %s8686_s1, %s6734_s25  ;;  %s21_s22 = int_to_ptr.vmem [resolvable:$true] %s20_s22 }
   0x3   :  { %p6738_p1 = scmp.lt.u32.totalorder %s6734_s25, %s8686_s1 }
   0x5   :  { %p6740_p2 = pnand %p6738_p1, %p6735_p0 }
   0x7   :  { %6743 = shalt.err (!%p6740_p2)
}
   0x8   :  { %s6744_s30 = scalar_lea.vmem %s21_s22, 8192  ;;  %p6749_p4 = scmp.lt.s32.totalorder %s21_s22, %s21_s22 }
   0x9   :  { %p6745_p3 = scmp.ne.s32.totalorder %s21_s22, %s6744_s30  ;;  %p6750_p5 = scmp.lt.s32.totalorder %s6744_s30, %s6744_s30 }
   0xb   :  { %p6751_p6 = por %p6750_p5, %p6749_p4 }
   0xd   :  { %p6752_p7 = pnand %p6751_p6, %p6745_p3 }
   0xf   :  { %6755 = shalt.err (!%p6752_p7)
}
  0x10   :  { %s6807_s7 = smov 512   ;;  %s6808_s8 = smov 32  }
  0x11   :  { %26 = dma.hbm_to_vmem [thread:$0]  %s8686_s1, 8192, %s21_s22, [#allocation6], %s6807_s7, %s6807_s7, %s6808_s8  }
  0x12   :  { %s6809_s11 = smov [#allocation7]   ;;  %s6756_s15 = scalar_lea.hbm %s8688_s3, 8192 }
  0x13   :  { %s34_s12 = sshll.u32 %s6809_s11, 4  ;;  %p6757_p8 = scmp.ne.s32.totalorder %s8688_s3, %s6756_s15  ;;  %s35_s12 = int_to_ptr.vmem [resolvable:$true] %s34_s12 }
  0x14   :  { %p6760_p9 = scmp.lt.u32.totalorder %s6756_s15, %s8688_s3 }
  0x16   :  { %p6762_p10 = pnand %p6760_p9, %p6757_p8 }
  0x18   :  { %6765 = shalt.err (!%p6762_p10)
}
  0x19   :  { %s6766_s20 = scalar_lea.vmem %s35_s12, 8192  ;;  %p6771_p12 = scmp.lt.s32.totalorder %s35_s12, %s35_s12 }
  0x1a   :  { %p6767_p11 = scmp.ne.s32.totalorder %s35_s12, %s6766_s20  ;;  %p6772_p13 = scmp.lt.s32.totalorder %s6766_s20, %s6766_s20 }
  0x1c   :  { %p6773_p0 = por %p6772_p13, %p6771_p12 }
  0x1e   :  { %p6774_p1 = pnand %p6773_p0, %p6767_p11 }
  0x20   :  { %6777 = shalt.err (!%p6774_p1)
}
  0x21   :  { %40 = dma.hbm_to_vmem [thread:$0]  %s8688_s3, 8192, %s35_s12, [#allocation8], %s6807_s7, %s6807_s7, %s6808_s8  }
  0x22   :  { %6800 = dma.done.wait [#allocation6], 8192  }
  0x23   :  { %6801 = vsyncadd [#allocation6], 4294959104 }
  0x24   :  { %6802 = dma.done.wait [#allocation8], 8192  }
  0x25   :  { %6803 = vsyncadd [#allocation8], 4294959104  ;;  %v134_v0 = vlaneseq  ;;  %v8696_v1 = vmov 0.0   ;;  %s6811_s22 = smov [#allocation3]   ;;  %s6778_s26 = scalar_lea.hbm %s8690_s5, 16384 }
  0x26   :  { %218 = vmatprep.mubr.f32.mxu0 %v8696_v1  ;;  %331 = vmatprep.mubr.f32.mxu1 %v8696_v1  ;;  %s56_s23 = sshll.u32 %s6811_s22, 4  ;;  %p6779_p2 = scmp.ne.s32.totalorder %s8690_s5, %s6778_s26  ;;  %s57_s23 = int_to_ptr.vmem [resolvable:$true] %s56_s23 }
  0x27   :  { %v6873_v2 = vshrl.u32 %v134_v0, 7  ;;  %p6782_p3 = scmp.lt.u32.totalorder %s6778_s26, %s8690_s5 }
  0x29   :  { %8928 = vst [vmem:[#allocation16_spill] sm:$0xff] %v6873_v2  ;;  %p6784_p4 = pnand %p6782_p3, %p6779_p2 }
  0x2b   :  { %6787 = shalt.err (!%p6784_p4)  }
  0x2c   :  { %s6788_s30 = scalar_lea.vmem %s57_s23, 16384  ;;  %p6793_p6 = scmp.lt.s32.totalorder %s57_s23, %s57_s23 }
  0x2d   :  { %p6789_p5 = scmp.ne.s32.totalorder %s57_s23, %s6788_s30  ;;  %p6794_p7 = scmp.lt.s32.totalorder %s6788_s30, %s6788_s30 }
  0x2f   :  { %p6795_p8 = por %p6794_p7, %p6793_p6 }
  0x31   :  { %p6796_p9 = pnand %p6795_p8, %p6789_p5 }
  0x33   :  { %6799 = shalt.err (!%p6796_p9)  }
  0x34   :  { %59 = dma.hbm_to_vmem [thread:$0]  %s8690_s5, 16384, %s57_s23, [#allocation4]  ;;  %v8695_v3 = vsub.s32 0, %v6873_v2  ;;  %v8694_v4 = vsub.s32 1, %v6873_v2  ;;  %v8693_v5 = vsub.s32 2, %v6873_v2  ;;  %v8692_v6 = vsub.s32 3, %v6873_v2 }
  0x35   :  { %v132_v7 = vld [vmem:[%s8687_s2] sm:$0xf]  ;;  %v69_v8 = vld [vmem:[#allocation5 + $0x8] sm:$0xff]  ;;  %v71_v14 = vld [vmem:[#allocation5 + $0x18] sm:$0xff] }
  0x36   :  { %v73_v9 = vld [vmem:[#allocation5 + $0x28] sm:$0xff]  ;;  %v6896_v10 = vrot.slane %v132_v7, %v8695_v3  ;;  %v6900_v11 = vrot.slane %v132_v7, %v8694_v4  ;;  %v6904_v12 = vrot.slane %v132_v7, %v8693_v5  ;;  %v6908_v13 = vrot.slane %v132_v7, %v8692_v6  ;;  %v75_v15 = vld [vmem:[#allocation5 + $0x38] sm:$0xff]  ;;  %v68_v16 = vld [vmem:[#allocation5] sm:$0xff] }
  0x37   :  { %v4792_v17 = vpack.c.bf16 %v73_v9, %v69_v8  ;;  %v4824_v18 = vpack.c.bf16 %v75_v15, %v71_v14  ;;  %v72_v19 = vld [vmem:[#allocation5 + $0x20] sm:$0xff]  ;;  %v70_v20 = vld [vmem:[#allocation5 + $0x10] sm:$0xff]  ;;  %v77_v24 = vld [vmem:[#allocation5 + $0x48] sm:$0xff] }
  0x38   :  { %8929 = vst [vmem:[#allocation17_spill] sm:$0xff] %v6896_v10  ;;  %8930 = vst [vmem:[#allocation18_spill] sm:$0xff] %v6900_v11  ;;  %v74_v21 = vld [vmem:[#allocation5 + $0x30] sm:$0xff]  ;;  %v4794_v22 = vpack.c.bf16 %v72_v19, %v68_v16  ;;  %v81_v25 = vld [vmem:[#allocation5 + $0x68] sm:$0xff] }
  0x39   :  { %v4826_v23 = vpack.c.bf16 %v74_v21, %v70_v20  ;;  %v79_v26 = vld [vmem:[#allocation5 + $0x58] sm:$0xff]  ;;  %4793 = vmatprep.subr.bf16.mxu0 %v4792_v17  ;;  %4825 = vmatprep.subr.bf16.mxu1 %v4824_v18  ;;  %v4796_v27 = vpack.c.bf16 %v81_v25, %v77_v24  ;;  %v76_v29 = vld [vmem:[#allocation5 + $0x40] sm:$0xff]  ;;  %v78_v33 = vld [vmem:[#allocation5 + $0x50] sm:$0xff] }
  0x3a   :  { %v83_v28 = vld [vmem:[#allocation5 + $0x78] sm:$0xff]  ;;  %v80_v30 = vld [vmem:[#allocation5 + $0x60] sm:$0xff]  ;;  %4795 = vmatpush1.bf16.msra.mxu0 %v4794_v22  ;;  %v82_v34 = vld [vmem:[#allocation5 + $0x70] sm:$0xff] }
  0x3b   :  { %4827 = vmatpush1.bf16.msra.mxu1 %v4826_v23  ;;  %v4828_v31 = vpack.c.bf16 %v83_v28, %v79_v26  ;;  %v4798_v32 = vpack.c.bf16 %v80_v30, %v76_v29  ;;  %v85_v35 = vld [vmem:[#allocation5 + $0x88] sm:$0xff]  ;;  %4797 = vmatprep.subr.bf16.mxu0 %v4796_v27  ;;  %v4830_v36 = vpack.c.bf16 %v82_v34, %v78_v33  ;;  %v87_v38 = vld [vmem:[#allocation5 + $0x98] sm:$0xff]  ;;  %v84_v42 = vld [vmem:[#allocation5 + $0x80] sm:$0xff] }
  0x3c   :  { %v89_v37 = vld [vmem:[#allocation5 + $0xa8] sm:$0xff]  ;;  %v91_v39 = vld [vmem:[#allocation5 + $0xb8] sm:$0xff]  ;;  %v88_v43 = vld [vmem:[#allocation5 + $0xa0] sm:$0xff] }
  0x3d   :  { %4829 = vmatprep.subr.bf16.mxu1 %v4828_v31  ;;  %v4800_v40 = vpack.c.bf16 %v89_v37, %v85_v35  ;;  %v4832_v41 = vpack.c.bf16 %v91_v39, %v87_v38  ;;  %v86_v44 = vld [vmem:[#allocation5 + $0x90] sm:$0xff]  ;;  %v93_v46 = vld [vmem:[#allocation5 + $0xc8] sm:$0xff]  ;;  %v4802_v48 = vpack.c.bf16 %v88_v43, %v84_v42  ;;  %v95_v50 = vld [vmem:[#allocation5 + $0xd8] sm:$0xff] }
  0x3e   :  { %v90_v45 = vld [vmem:[#allocation5 + $0xb0] sm:$0xff]  ;;  %v97_v47 = vld [vmem:[#allocation5 + $0xe8] sm:$0xff]  ;;  %4799 = vmatpush1.bf16.msra.mxu0 %v4798_v32  ;;  %v99_v51 = vld [vmem:[#allocation5 + $0xf8] sm:$0xff] }
  0x3f   :  { %4831 = vmatpush1.bf16.msra.mxu1 %v4830_v36  ;;  %v4834_v49 = vpack.c.bf16 %v90_v45, %v86_v44  ;;  %v92_v52 = vld [vmem:[#allocation5 + $0xc0] sm:$0xff]  ;;  %4801 = vmatprep.subr.bf16.mxu0 %v4800_v40  ;;  %v4804_v53 = vpack.c.bf16 %v97_v47, %v93_v46  ;;  %v4836_v54 = vpack.c.bf16 %v99_v51, %v95_v50  ;;  %v94_v56 = vld [vmem:[#allocation5 + $0xd0] sm:$0xff]  ;;  %v101_v58 = vld [vmem:[#allocation5 + $0x108] sm:$0xff] }
  0x40   :  { %4833 = vmatprep.subr.bf16.mxu1 %v4832_v41  ;;  %v96_v55 = vld [vmem:[#allocation5 + $0xe0] sm:$0xff]  ;;  %v98_v57 = vld [vmem:[#allocation5 + $0xf0] sm:$0xff]  ;;  %v105_v59 = vld [vmem:[#allocation5 + $0x128] sm:$0xff] }
  0x41   :  { %v103_v60 = vld [vmem:[#allocation5 + $0x118] sm:$0xff]  ;;  %v4806_v62 = vpack.c.bf16 %v96_v55, %v92_v52  ;;  %v4838_v63 = vpack.c.bf16 %v98_v57, %v94_v56  ;;  %v100_v0 = vld [vmem:[#allocation5 + $0x100] sm:$0xff]  ;;  %v4808_v8 = vpack.c.bf16 %v105_v59, %v101_v58  ;;  %v102_v14 = vld [vmem:[#allocation5 + $0x110] sm:$0xff] }
  0x42   :  { %v107_v61 = vld [vmem:[#allocation5 + $0x138] sm:$0xff]  ;;  %4803 = vmatpush1.bf16.msra.mxu0 %v4802_v48  ;;  %v104_v7 = vld [vmem:[#allocation5 + $0x120] sm:$0xff]  ;;  %v106_v15 = vld [vmem:[#allocation5 + $0x130] sm:$0xff] }
  0x43   :  { %4835 = vmatpush1.bf16.msra.mxu1 %v4834_v49  ;;  %4805 = vmatprep.subr.bf16.mxu0 %v4804_v53  ;;  %v4840_v9 = vpack.c.bf16 %v107_v61, %v103_v60  ;;  %v109_v16 = vld [vmem:[#allocation5 + $0x148] sm:$0xff]  ;;  %v111_v18 = vld [vmem:[#allocation5 + $0x158] sm:$0xff]  ;;  %v4810_v20 = vpack.c.bf16 %v104_v7, %v100_v0  ;;  %v4842_v21 = vpack.c.bf16 %v106_v15, %v102_v14  ;;  %v108_v22 = vld [vmem:[#allocation5 + $0x140] sm:$0xff] }
  0x44   :  { %4837 = vmatprep.subr.bf16.mxu1 %v4836_v54  ;;  %v113_v17 = vld [vmem:[#allocation5 + $0x168] sm:$0xff]  ;;  %v115_v19 = vld [vmem:[#allocation5 + $0x178] sm:$0xff]  ;;  %v112_v23 = vld [vmem:[#allocation5 + $0x160] sm:$0xff] }
  0x45   :  { %v4812_v24 = vpack.c.bf16 %v113_v17, %v109_v16  ;;  %v4844_v25 = vpack.c.bf16 %v115_v19, %v111_v18  ;;  %v110_v26 = vld [vmem:[#allocation5 + $0x150] sm:$0xff]  ;;  %v117_v28 = vld [vmem:[#allocation5 + $0x188] sm:$0xff]  ;;  %v119_v30 = vld [vmem:[#allocation5 + $0x198] sm:$0xff]  ;;  %v4814_v32 = vpack.c.bf16 %v112_v23, %v108_v22 }
  0x46   :  { %4807 = vmatpush1.bf16.msra.mxu0 %v4806_v62  ;;  %v114_v27 = vld [vmem:[#allocation5 + $0x170] sm:$0xff]  ;;  %v121_v29 = vld [vmem:[#allocation5 + $0x1a8] sm:$0xff]  ;;  %v123_v31 = vld [vmem:[#allocation5 + $0x1b8] sm:$0xff] }
  0x47   :  { %4839 = vmatpush1.bf16.msra.mxu1 %v4838_v63  ;;  %4809 = vmatprep.subr.bf16.mxu0 %v4808_v8  ;;  %v4846_v33 = vpack.c.bf16 %v114_v27, %v110_v26  ;;  %v116_v34 = vld [vmem:[#allocation5 + $0x180] sm:$0xff]  ;;  %v4816_v36 = vpack.c.bf16 %v121_v29, %v117_v28  ;;  %v4848_v37 = vpack.c.bf16 %v123_v31, %v119_v30  ;;  %v118_v38 = vld [vmem:[#allocation5 + $0x190] sm:$0xff]  ;;  %v125_v40 = vld [vmem:[#allocation5 + $0x1c8] sm:$0xff] }
  0x48   :  { %4841 = vmatprep.subr.bf16.mxu1 %v4840_v9  ;;  %v120_v35 = vld [vmem:[#allocation5 + $0x1a0] sm:$0xff]  ;;  %v122_v39 = vld [vmem:[#allocation5 + $0x1b0] sm:$0xff]  ;;  %v129_v41 = vld [vmem:[#allocation5 + $0x1e8] sm:$0xff] }
  0x49   :  { %v127_v42 = vld [vmem:[#allocation5 + $0x1d8] sm:$0xff]  ;;  %v4818_v44 = vpack.c.bf16 %v120_v35, %v116_v34  ;;  %v4850_v45 = vpack.c.bf16 %v122_v39, %v118_v38  ;;  %v124_v46 = vld [vmem:[#allocation5 + $0x1c0] sm:$0xff]  ;;  %v4820_v47 = vpack.c.bf16 %v129_v41, %v125_v40  ;;  %v126_v50 = vld [vmem:[#allocation5 + $0x1d0] sm:$0xff] }
  0x4a   :  { %4811 = vmatpush1.bf16.msra.mxu0 %v4810_v20  ;;  %v131_v43 = vld [vmem:[#allocation5 + $0x1f8] sm:$0xff]  ;;  %v128_v49 = vld [vmem:[#allocation5 + $0x1e0] sm:$0xff]  ;;  %v130_v51 = vld [vmem:[#allocation5 + $0x1f0] sm:$0xff] }
  0x4b   :  { %4843 = vmatpush1.bf16.msra.mxu1 %v4842_v21  ;;  %4813 = vmatprep.subr.bf16.mxu0 %v4812_v24  ;;  %v4852_v48 = vpack.c.bf16 %v131_v43, %v127_v42  ;;  %v4822_v52 = vpack.c.bf16 %v128_v49, %v124_v46  ;;  %v4854_v53 = vpack.c.bf16 %v130_v51, %v126_v50  ;;  %v60_v54 = vld [vmem:[%s8685_s0] sm:$0xff]  ;;  %v61_v55 = vld [vmem:[%s8685_s0 + $0x8] sm:$0xff]  ;;  %v62_v56 = vld [vmem:[%s8685_s0 + $0x10] sm:$0xff] }
  0x4c   :  { %4845 = vmatprep.subr.bf16.mxu1 %v4844_v25  ;;  %v63_v57 = vld [vmem:[%s8685_s0 + $0x18] sm:$0xff]  ;;  %v64_v58 = vld [vmem:[%s8685_s0 + $0x20] sm:$0xff]  ;;  %v65_v59 = vld [vmem:[%s8685_s0 + $0x28] sm:$0xff] }
  0x4d   :  { %v66_v60 = vld [vmem:[%s8685_s0 + $0x30] sm:$0xff]  ;;  %v67_v61 = vld [vmem:[%s8685_s0 + $0x38] sm:$0xff] }
  0x4e   :  { %4815 = vmatpush1.bf16.msra.mxu0 %v4814_v32 }
  0x4f   :  { %4847 = vmatpush1.bf16.msra.mxu1 %v4846_v33  ;;  %4817 = vmatprep.subr.bf16.mxu0 %v4816_v36 }
  0x50   :  { %4849 = vmatprep.subr.bf16.mxu1 %v4848_v37 }
  0x52   :  { %4819 = vmatpush1.bf16.msra.mxu0 %v4818_v44 }
  0x53   :  { %4851 = vmatpush1.bf16.msra.mxu1 %v4850_v45  ;;  %4821 = vmatprep.subr.bf16.mxu0 %v4820_v47 }
  0x54   :  { %4853 = vmatprep.subr.bf16.mxu1 %v4852_v48 }
  0x56   :  { %4823 = vmatpush1.bf16.msra.mxu0 %v4822_v52 }
  0x57   :  { %4855 = vmatpush1.bf16.msra.mxu1 %v4854_v53 }
  0x59   :  { %219 = vmatmul.mubr.f32.vlgmr.msra.gmra.mrb[0].mxu0 %v60_v54 }
  0x5a   :  { %332 = vmatmul.mubr.f32.vlgmr.msra.gmra.mrb[0].mxu1 %v60_v54  ;;  %224 = vmatprep.mubr.f32.mxu0 %v8696_v1 }
  0x5b   :  { %337 = vmatprep.mubr.f32.mxu1 %v8696_v1 }
  0x5d   :  { %225 = vmatmul.mubr.f32.gmra.mrb[2].mxu0 %v61_v55 }
  0x5e   :  { %338 = vmatmul.mubr.f32.gmra.mrb[2].mxu1 %v61_v55  ;;  %230 = vmatprep.mubr.f32.mxu0 %v8696_v1 }
  0x5f   :  { %343 = vmatprep.mubr.f32.mxu1 %v8696_v1 }
  0x61   :  { %231 = vmatmul.mubr.f32.gmra.mrb[4].mxu0 %v62_v56 }
  0x62   :  { %344 = vmatmul.mubr.f32.gmra.mrb[4].mxu1 %v62_v56  ;;  %236 = vmatprep.mubr.f32.mxu0 %v8696_v1 }
  0x63   :  { %349 = vmatprep.mubr.f32.mxu1 %v8696_v1 }
  0x65   :  { %237 = vmatmul.mubr.f32.gmra.mrb[6].mxu0 %v63_v57 }
  0x66   :  { %350 = vmatmul.mubr.f32.gmra.mrb[6].mxu1 %v63_v57  ;;  %242 = vmatprep.mubr.f32.mxu0 %v8696_v1 }
  0x67   :  { %355 = vmatprep.mubr.f32.mxu1 %v8696_v1 }
  0x69   :  { %243 = vmatmul.mubr.f32.gmra.mrb[8].mxu0 %v64_v58 }
  0x6a   :  { %356 = vmatmul.mubr.f32.gmra.mrb[8].mxu1 %v64_v58  ;;  %248 = vmatprep.mubr.f32.mxu0 %v8696_v1 }
  0x6b   :  { %361 = vmatprep.mubr.f32.mxu1 %v8696_v1 }
  0x6d   :  { %249 = vmatmul.mubr.f32.gmra.mrb[10].mxu0 %v65_v59 }
  0x6e   :  { %362 = vmatmul.mubr.f32.gmra.mrb[10].mxu1 %v65_v59  ;;  %254 = vmatprep.mubr.f32.mxu0 %v8696_v1 }
  0x6f   :  { %367 = vmatprep.mubr.f32.mxu1 %v8696_v1 }
  0x71   :  { %255 = vmatmul.mubr.f32.gmra.mrb[12].mxu0 %v66_v60 }
  0x72   :  { %368 = vmatmul.mubr.f32.gmra.mrb[12].mxu1 %v66_v60  ;;  %260 = vmatprep.mubr.f32.mxu0 %v8696_v1 }
  0x73   :  { %373 = vmatprep.mubr.f32.mxu1 %v8696_v1 }
  0x75   :  { %261 = vmatmul.mubr.f32.gmra.mrb[14].mxu0 %v67_v61 }
  0x76   :  { %374 = vmatmul.mubr.f32.gmra.mrb[14].mxu1 %v67_v61 }
  0x77   :  { %6804 = dma.done.wait [#allocation4], 16384 }
  0x78   :  { %6805 = vsyncadd [#allocation4], 4294950912  ;;  %570 = vmatprep.mubr.f32.mxu0 %v8696_v1  ;;  %641 = vmatprep.mubr.f32.mxu1 %v8696_v1  ;;  %v443_v62 = vld [vmem:[#allocation7 + $0x8] sm:$0xff]  ;;  %v442_v0 = vld [vmem:[#allocation7] sm:$0xff] }
  0x79   :  { %v447_v63 = vld [vmem:[#allocation7 + $0x28] sm:$0xff]  ;;  %v446_v8 = vld [vmem:[#allocation7 + $0x20] sm:$0xff]  ;;  %v445_v26 = vld [vmem:[#allocation7 + $0x18] sm:$0xff] }
  0x7a   :  { %v6950_v7 = vpack.c.bf16 %v447_v63, %v443_v62  ;;  %v451_v9 = vld [vmem:[#allocation7 + $0x48] sm:$0xff]  ;;  %v6952_v15 = vpack.c.bf16 %v446_v8, %v442_v0  ;;  %v450_v17 = vld [vmem:[#allocation7 + $0x40] sm:$0xff]  ;;  %v449_v27 = vld [vmem:[#allocation7 + $0x38] sm:$0xff] }
  0x7b   :  { %v455_v14 = vld [vmem:[#allocation7 + $0x68] sm:$0xff]  ;;  %v454_v18 = vld [vmem:[#allocation7 + $0x60] sm:$0xff]  ;;  %v6963_v29 = vpack.c.bf16 %v449_v27, %v445_v26  ;;  %v444_v30 = vld [vmem:[#allocation7 + $0x10] sm:$0xff] }
  0x7c   :  { %v6954_v16 = vpack.c.bf16 %v455_v14, %v451_v9  ;;  %v459_v19 = vld [vmem:[#allocation7 + $0x88] sm:$0xff]  ;;  %4857 = vmatprep.subr.bf16.mxu0 %v6950_v7  ;;  %v6958_v21 = vpack.c.bf16 %v454_v18, %v450_v17  ;;  %v458_v22 = vld [vmem:[#allocation7 + $0x80] sm:$0xff]  ;;  %v448_v31 = vld [vmem:[#allocation7 + $0x30] sm:$0xff] }
  0x7d   :  { %v463_v20 = vld [vmem:[#allocation7 + $0xa8] sm:$0xff]  ;;  %4859 = vmatpush1.bf16.msra.mxu0 %v6952_v15  ;;  %v462_v23 = vld [vmem:[#allocation7 + $0xa0] sm:$0xff]  ;;  %v6965_v32 = vpack.c.bf16 %v448_v31, %v444_v30  ;;  %4889 = vmatprep.subr.bf16.mxu1 %v6963_v29  ;;  %v453_v34 = vld [vmem:[#allocation7 + $0x58] sm:$0xff] }
  0x7e   :  { %4861 = vmatprep.subr.bf16.mxu0 %v6954_v16  ;;  %v6961_v24 = vpack.c.bf16 %v463_v20, %v459_v19  ;;  %v467_v25 = vld [vmem:[#allocation7 + $0xc8] sm:$0xff]  ;;  %v6968_v33 = vpack.c.bf16 %v462_v23, %v458_v22  ;;  %v457_v35 = vld [vmem:[#allocation7 + $0x78] sm:$0xff]  ;;  %v452_v36 = vld [vmem:[#allocation7 + $0x50] sm:$0xff] }
  0x7f   :  { %v471_v28 = vld [vmem:[#allocation7 + $0xe8] sm:$0xff]  ;;  %v466_v38 = vld [vmem:[#allocation7 + $0xc0] sm:$0xff]  ;;  %4891 = vmatpush1.bf16.msra.mxu1 %v6965_v32  ;;  %v6975_v40 = vpack.c.bf16 %v457_v35, %v453_v34  ;;  %v456_v41 = vld [vmem:[#allocation7 + $0x70] sm:$0xff] }
  0x80   :  { %v6972_v37 = vpack.c.bf16 %v471_v28, %v467_v25  ;;  %v470_v39 = vld [vmem:[#allocation7 + $0xe0] sm:$0xff]  ;;  %v475_v42 = vld [vmem:[#allocation7 + $0x108] sm:$0xff]  ;;  %v6977_v44 = vpack.c.bf16 %v456_v41, %v452_v36  ;;  %v461_v45 = vld [vmem:[#allocation7 + $0x98] sm:$0xff] }
  0x81   :  { %4863 = vmatpush1.bf16.msra.mxu0 %v6958_v21  ;;  %v479_v43 = vld [vmem:[#allocation7 + $0x128] sm:$0xff]  ;;  %4893 = vmatprep.subr.bf16.mxu1 %v6975_v40  ;;  %v465_v46 = vld [vmem:[#allocation7 + $0xb8] sm:$0xff]  ;;  %v460_v47 = vld [vmem:[#allocation7 + $0x90] sm:$0xff]  ;;  %v6981_v49 = vpack.c.bf16 %v470_v39, %v466_v38 }
  0x82   :  { %4865 = vmatprep.subr.bf16.mxu0 %v6961_v24  ;;  %v464_v48 = vld [vmem:[#allocation7 + $0xb0] sm:$0xff]  ;;  %v474_v50 = vld [vmem:[#allocation7 + $0x100] sm:$0xff]  ;;  %v6983_v52 = vpack.c.bf16 %v465_v46, %v461_v45  ;;  %v6986_v53 = vpack.c.bf16 %v479_v43, %v475_v42  ;;  %v483_v54 = vld [vmem:[#allocation7 + $0x148] sm:$0xff] }
  0x83   :  { %v478_v51 = vld [vmem:[#allocation7 + $0x120] sm:$0xff]  ;;  %4895 = vmatpush1.bf16.msra.mxu1 %v6977_v44  ;;  %v6989_v55 = vpack.c.bf16 %v464_v48, %v460_v47  ;;  %v469_v56 = vld [vmem:[#allocation7 + $0xd8] sm:$0xff]  ;;  %v487_v58 = vld [vmem:[#allocation7 + $0x168] sm:$0xff] }
  0x84   :  { %v473_v57 = vld [vmem:[#allocation7 + $0xf8] sm:$0xff]  ;;  %4897 = vmatprep.subr.bf16.mxu1 %v6983_v52  ;;  %v468_v60 = vld [vmem:[#allocation7 + $0xd0] sm:$0xff]  ;;  %v6995_v62 = vpack.c.bf16 %v478_v51, %v474_v50  ;;  %v6998_v8 = vpack.c.bf16 %v487_v58, %v483_v54  ;;  %v482_v9 = vld [vmem:[#allocation7 + $0x140] sm:$0xff] }
  0x85   :  { %4867 = vmatpush1.bf16.msra.mxu0 %v6968_v33  ;;  %v6992_v59 = vpack.c.bf16 %v473_v57, %v469_v56  ;;  %v472_v61 = vld [vmem:[#allocation7 + $0xf0] sm:$0xff]  ;;  %v477_v63 = vld [vmem:[#allocation7 + $0x118] sm:$0xff]  ;;  %v486_v14 = vld [vmem:[#allocation7 + $0x160] sm:$0xff] }
  0x86   :  { %4869 = vmatprep.subr.bf16.mxu0 %v6972_v37  ;;  %v481_v0 = vld [vmem:[#allocation7 + $0x138] sm:$0xff]  ;;  %v491_v17 = vld [vmem:[#allocation7 + $0x188] sm:$0xff]  ;;  %v7001_v18 = vpack.c.bf16 %v472_v61, %v468_v60  ;;  %v476_v22 = vld [vmem:[#allocation7 + $0x110] sm:$0xff]  ;;  %v7007_v27 = vpack.c.bf16 %v486_v14, %v482_v9 }
  0x87   :  { %4899 = vmatpush1.bf16.msra.mxu1 %v6989_v55  ;;  %v495_v19 = vld [vmem:[#allocation7 + $0x1a8] sm:$0xff]  ;;  %v7004_v20 = vpack.c.bf16 %v481_v0, %v477_v63  ;;  %v480_v23 = vld [vmem:[#allocation7 + $0x130] sm:$0xff]  ;;  %v485_v25 = vld [vmem:[#allocation7 + $0x158] sm:$0xff] }
  0x88   :  { %4901 = vmatprep.subr.bf16.mxu1 %v6992_v59  ;;  %v489_v26 = vld [vmem:[#allocation7 + $0x178] sm:$0xff]  ;;  %v7010_v28 = vpack.c.bf16 %v495_v19, %v491_v17  ;;  %v490_v30 = vld [vmem:[#allocation7 + $0x180] sm:$0xff]  ;;  %v499_v34 = vld [vmem:[#allocation7 + $0x1c8] sm:$0xff]  ;;  %v7013_v35 = vpack.c.bf16 %v480_v23, %v476_v22 }
  0x89   :  { %4871 = vmatpush1.bf16.msra.mxu0 %v6981_v49  ;;  %v494_v31 = vld [vmem:[#allocation7 + $0x1a0] sm:$0xff]  ;;  %v503_v36 = vld [vmem:[#allocation7 + $0x1e8] sm:$0xff]  ;;  %v7016_v38 = vpack.c.bf16 %v489_v26, %v485_v25  ;;  %v484_v39 = vld [vmem:[#allocation7 + $0x150] sm:$0xff] }
  0x8a   :  { %4873 = vmatprep.subr.bf16.mxu0 %v6986_v53  ;;  %v488_v41 = vld [vmem:[#allocation7 + $0x170] sm:$0xff]  ;;  %v493_v42 = vld [vmem:[#allocation7 + $0x198] sm:$0xff]  ;;  %v7019_v45 = vpack.c.bf16 %v494_v31, %v490_v30  ;;  %v7022_v46 = vpack.c.bf16 %v503_v36, %v499_v34  ;;  %v498_v47 = vld [vmem:[#allocation7 + $0x1c0] sm:$0xff] }
  0x8b   :  { %4903 = vmatpush1.bf16.msra.mxu1 %v7001_v18  ;;  %v497_v43 = vld [vmem:[#allocation7 + $0x1b8] sm:$0xff]  ;;  %v502_v48 = vld [vmem:[#allocation7 + $0x1e0] sm:$0xff]  ;;  %v7025_v50 = vpack.c.bf16 %v488_v41, %v484_v39  ;;  %v492_v51 = vld [vmem:[#allocation7 + $0x190] sm:$0xff] }
  0x8c   :  { %4905 = vmatprep.subr.bf16.mxu1 %v7004_v20  ;;  %v7028_v54 = vpack.c.bf16 %v497_v43, %v493_v42  ;;  %v496_v56 = vld [vmem:[#allocation7 + $0x1b0] sm:$0xff]  ;;  %v677_v57 = vld [vmem:[#allocation3 + $0x8] sm:$0xff]  ;;  %v501_v60 = vld [vmem:[#allocation7 + $0x1d8] sm:$0xff]  ;;  %v7031_v63 = vpack.c.bf16 %v502_v48, %v498_v47 }
  0x8d   :  { %4875 = vmatpush1.bf16.msra.mxu0 %v6995_v62  ;;  %v681_v58 = vld [vmem:[#allocation3 + $0x28] sm:$0xff]  ;;  %v505_v61 = vld [vmem:[#allocation7 + $0x1f8] sm:$0xff]  ;;  %v7035_v0 = vpack.c.bf16 %v496_v56, %v492_v51  ;;  %v500_v9 = vld [vmem:[#allocation7 + $0x1d0] sm:$0xff] }
  0x8e   :  { %4877 = vmatprep.subr.bf16.mxu0 %v6998_v8  ;;  %v7037_v14 = vpack.c.bf16 %v681_v58, %v677_v57  ;;  %v676_v17 = vld [vmem:[#allocation3] sm:$0xff]  ;;  %v7040_v22 = vpack.c.bf16 %v505_v61, %v501_v60  ;;  %v504_v23 = vld [vmem:[#allocation7 + $0x1f0] sm:$0xff]  ;;  %v685_v25 = vld [vmem:[#allocation3 + $0x48] sm:$0xff] }
  0x8f   :  { %4907 = vmatpush1.bf16.msra.mxu1 %v7013_v35  ;;  %v680_v19 = vld [vmem:[#allocation3 + $0x20] sm:$0xff]  ;;  %v689_v26 = vld [vmem:[#allocation3 + $0x68] sm:$0xff]  ;;  %v679_v30 = vld [vmem:[#allocation3 + $0x18] sm:$0xff]  ;;  %v7046_v36 = vpack.c.bf16 %v504_v23, %v500_v9 }
  0x90   :  { %4909 = vmatprep.subr.bf16.mxu1 %v7016_v38  ;;  %v683_v31 = vld [vmem:[#allocation3 + $0x38] sm:$0xff]  ;;  %v7043_v34 = vpack.c.bf16 %v680_v19, %v676_v17  ;;  %v678_v39 = vld [vmem:[#allocation3 + $0x10] sm:$0xff]  ;;  %v7049_v41 = vpack.c.bf16 %v689_v26, %v685_v25  ;;  %v684_v42 = vld [vmem:[#allocation3 + $0x40] sm:$0xff] }
  0x91   :  { %4879 = vmatpush1.bf16.msra.mxu0 %v7007_v27  ;;  %v688_v43 = vld [vmem:[#allocation3 + $0x60] sm:$0xff]  ;;  %v7052_v47 = vpack.c.bf16 %v683_v31, %v679_v30  ;;  %v682_v48 = vld [vmem:[#allocation3 + $0x30] sm:$0xff]  ;;  %v693_v51 = vld [vmem:[#allocation3 + $0x88] sm:$0xff] }
  0x92   :  { %4881 = vmatprep.subr.bf16.mxu0 %v7010_v28  ;;  %v697_v56 = vld [vmem:[#allocation3 + $0xa8] sm:$0xff]  ;;  %v687_v57 = vld [vmem:[#allocation3 + $0x58] sm:$0xff]  ;;  %v7056_v60 = vpack.c.bf16 %v688_v43, %v684_v42  ;;  %v7060_v61 = vpack.c.bf16 %v682_v48, %v678_v39  ;;  %v686_v9 = vld [vmem:[#allocation3 + $0x50] sm:$0xff] }
  0x93   :  { %4911 = vmatpush1.bf16.msra.mxu1 %v7025_v50  ;;  %v691_v58 = vld [vmem:[#allocation3 + $0x78] sm:$0xff]  ;;  %v7063_v17 = vpack.c.bf16 %v697_v56, %v693_v51  ;;  %v692_v19 = vld [vmem:[#allocation3 + $0x80] sm:$0xff]  ;;  %v690_v26 = vld [vmem:[#allocation3 + $0x70] sm:$0xff] }
  0x94   :  { %4913 = vmatprep.subr.bf16.mxu1 %v7028_v54  ;;  %v696_v23 = vld [vmem:[#allocation3 + $0xa0] sm:$0xff]  ;;  %v7066_v25 = vpack.c.bf16 %v691_v58, %v687_v57  ;;  %v701_v30 = vld [vmem:[#allocation3 + $0xc8] sm:$0xff]  ;;  %v695_v42 = vld [vmem:[#allocation3 + $0x98] sm:$0xff]  ;;  %v7073_v48 = vpack.c.bf16 %v690_v26, %v686_v9 }
  0x95   :  { %4883 = vmatpush1.bf16.msra.mxu0 %v7019_v45  ;;  %8931 = vst [vmem:[#allocation19_spill] sm:$0xff] %v7063_v17  ;;  %v705_v31 = vld [vmem:[#allocation3 + $0xe8] sm:$0xff]  ;;  %v699_v43 = vld [vmem:[#allocation3 + $0xb8] sm:$0xff]  ;;  %v7070_v39 = vpack.c.bf16 %v696_v23, %v692_v19  ;;  %v694_v51 = vld [vmem:[#allocation3 + $0x90] sm:$0xff] }
  0x96   :  { %4885 = vmatprep.subr.bf16.mxu0 %v7022_v46  ;;  %v7076_v56 = vpack.c.bf16 %v705_v31, %v701_v30  ;;  %v700_v57 = vld [vmem:[#allocation3 + $0xc0] sm:$0xff]  ;;  %v7079_v6 = vpack.c.bf16 %v699_v43, %v695_v42  ;;  %v698_v5 = vld [vmem:[#allocation3 + $0xb0] sm:$0xff]  ;;  %v709_v4 = vld [vmem:[#allocation3 + $0x108] sm:$0xff] }
  0x97   :  { %4915 = vmatpush1.bf16.msra.mxu1 %v7035_v0  ;;  %8932 = vst [vmem:[#allocation20_spill] sm:$0xff] %v7070_v39  ;;  %v704_v58 = vld [vmem:[#allocation3 + $0xe0] sm:$0xff]  ;;  %v713_v3 = vld [vmem:[#allocation3 + $0x128] sm:$0xff]  ;;  %v703_v19 = vld [vmem:[#allocation3 + $0xd8] sm:$0xff]  ;;  %v7086_v26 = vpack.c.bf16 %v698_v5, %v694_v51 }
  0x98   :  { %4917 = vmatprep.subr.bf16.mxu1 %v7040_v22  ;;  %v707_v23 = vld [vmem:[#allocation3 + $0xf8] sm:$0xff]  ;;  %v7083_v9 = vpack.c.bf16 %v704_v58, %v700_v57  ;;  %v7089_v30 = vpack.c.bf16 %v713_v3, %v709_v4  ;;  %v708_v31 = vld [vmem:[#allocation3 + $0x100] sm:$0xff]  ;;  %v706_v2 = vld [vmem:[#allocation3 + $0xf0] sm:$0xff] }
  0x99   :  { %4887 = vmatpush1.bf16.msra.mxu0 %v7031_v63  ;;  %v712_v42 = vld [vmem:[#allocation3 + $0x120] sm:$0xff]  ;;  %v7092_v43 = vpack.c.bf16 %v707_v23, %v703_v19  ;;  %v710_v4 = vld [vmem:[#allocation3 + $0x110] sm:$0xff]  ;;  %v719_v19 = vld [vmem:[#allocation3 + $0x158] sm:$0xff] }
  0x9a   :  { %4921 = vmatprep.subr.bf16.mxu0 %v7037_v14  ;;  %8933 = vst [vmem:[#allocation21_spill] sm:$0xff] %v7083_v9  ;;  %8934 = vst [vmem:[#allocation22_spill] sm:$0xff] %v7089_v30  ;;  %v7095_v57 = vpack.c.bf16 %v712_v42, %v708_v31  ;;  %v714_v51 = vld [vmem:[#allocation3 + $0x130] sm:$0xff]  ;;  %v723_v31 = vld [vmem:[#allocation3 + $0x178] sm:$0xff] }
  0x9b   :  { %4919 = vmatpush1.bf16.msra.mxu1 %v7046_v36  ;;  %8935 = vst [vmem:[#allocation23_spill] sm:$0xff] %v7092_v43  ;;  %v7106_v58 = vpack.c.bf16 %v714_v51, %v710_v4  ;;  %v7112_v42 = vpack.c.bf16 %v723_v31, %v719_v19  ;;  %v725_v51 = vld [vmem:[#allocation3 + $0x188] sm:$0xff]  ;;  %v731_v19 = vld [vmem:[#allocation3 + $0x1b8] sm:$0xff]  ;;  %v724_v31 = vld [vmem:[#allocation3 + $0x180] sm:$0xff] }
  0x9c   :  { %571 = vmatmul.mubr.f32.vlgmr.msra.gmra.mrb[0].mxu0 %v8696_v1  ;;  %4985 = vmatprep.subr.bf16.mxu1 %v7052_v47  ;;  %8936 = vst [vmem:[#allocation24_spill] sm:$0xff] %v7095_v57 }
  0x9d   :  { %4923 = vmatpush1.bf16.msra.mxu0 %v7043_v34  ;;  %868 = vmatprep.mubr.f32.mxu0 %v8696_v1  ;;  %8939 = vst [vmem:[#allocation27_spill] sm:$0xff] %v7106_v58  ;;  %8941 = vst [vmem:[#allocation29_spill] sm:$0xff] %v7112_v42 }
  0x9e   :  { %4925 = vmatprep.subr.bf16.mxu0 %v7049_v41  ;;  %642 = vmatmul.mubr.f32.vlgmr.msra.gmra.mrb[0].mxu1 %v8696_v1 }
  0x9f   :  { %4987 = vmatpush1.bf16.msra.mxu1 %v7060_v61  ;;  %939 = vmatprep.mubr.f32.mxu1 %v8696_v1  ;;  %v702_v1 = vld [vmem:[#allocation3 + $0xd0] sm:$0xff] }
  0xa0   :  { %4989 = vmatprep.subr.bf16.mxu1 %v7066_v25  ;;  %v7098_v5 = vpack.c.bf16 %v706_v2, %v702_v1  ;;  %v717_v1 = vld [vmem:[#allocation3 + $0x148] sm:$0xff] }
  0xa1   :  { %4927 = vmatpush1.bf16.msra.mxu0 %v7056_v60  ;;  %v721_v2 = vld [vmem:[#allocation3 + $0x168] sm:$0xff] }
  0xa2   :  { %4929 = vmatprep.subr.bf16.mxu0 %v7063_v17  ;;  %v711_v17 = vld [vmem:[#allocation3 + $0x118] sm:$0xff]  ;;  %8937 = vst [vmem:[#allocation25_spill] sm:$0xff] %v7098_v5  ;;  %v7110_v23 = vpack.c.bf16 %v721_v2, %v717_v1  ;;  %v729_v1 = vld [vmem:[#allocation3 + $0x1a8] sm:$0xff] }
  0xa3   :  { %4991 = vmatpush1.bf16.msra.mxu1 %v7073_v48  ;;  %v727_v2 = vld [vmem:[#allocation3 + $0x198] sm:$0xff] }
  0xa4   :  { %4993 = vmatprep.subr.bf16.mxu1 %v7079_v6  ;;  %8940 = vst [vmem:[#allocation28_spill] sm:$0xff] %v7110_v23 }
  0xa5   :  { %4931 = vmatpush1.bf16.msra.mxu0 %v7070_v39  ;;  %v715_v39 = vld [vmem:[#allocation3 + $0x138] sm:$0xff] }
  0xa6   :  { %4933 = vmatprep.subr.bf16.mxu0 %v7076_v56  ;;  %v7102_v3 = vpack.c.bf16 %v715_v39, %v711_v17  ;;  %v716_v17 = vld [vmem:[#allocation3 + $0x140] sm:$0xff] }
  0xa7   :  { %4995 = vmatpush1.bf16.msra.mxu1 %v7086_v26  ;;  %v720_v39 = vld [vmem:[#allocation3 + $0x160] sm:$0xff] }
  0xa8   :  { %4997 = vmatprep.subr.bf16.mxu1 %v7092_v43  ;;  %8938 = vst [vmem:[#allocation26_spill] sm:$0xff] %v7102_v3 }
  0xa9   :  { %4935 = vmatpush1.bf16.msra.mxu0 %v7083_v9  ;;  %v791_v9 = vld [vmem:[#allocation3 + $0x398] sm:$0xff] }
  0xaa   :  { %4937 = vmatprep.subr.bf16.mxu0 %v7089_v30  ;;  %v7114_v30 = vpack.c.bf16 %v720_v39, %v716_v17  ;;  %v728_v17 = vld [vmem:[#allocation3 + $0x1a0] sm:$0xff]  ;;  %v7124_v39 = vpack.c.bf16 %v731_v19, %v727_v2  ;;  %v739_v2 = vld [vmem:[#allocation3 + $0x1f8] sm:$0xff] }
  0xab   :  { %4999 = vmatpush1.bf16.msra.mxu1 %v7098_v5  ;;  %v722_v5 = vld [vmem:[#allocation3 + $0x170] sm:$0xff]  ;;  %v732_v19 = vld [vmem:[#allocation3 + $0x1c0] sm:$0xff] }
  0xac   :  { %5001 = vmatprep.subr.bf16.mxu1 %v7102_v3  ;;  %8942 = vst [vmem:[#allocation30_spill] sm:$0xff] %v7114_v30  ;;  %8945 = vst [vmem:[#allocation33_spill] sm:$0xff] %v7124_v39  ;;  %v7126_v3 = vpack.c.bf16 %v728_v17, %v724_v31  ;;  %v736_v31 = vld [vmem:[#allocation3 + $0x1e0] sm:$0xff] }
  0xad   :  { %4939 = vmatpush1.bf16.msra.mxu0 %v7095_v57  ;;  %v718_v57 = vld [vmem:[#allocation3 + $0x150] sm:$0xff] }
  0xae   :  { %4941 = vmatprep.subr.bf16.mxu0 %v7110_v23  ;;  %v7117_v4 = vpack.c.bf16 %v722_v5, %v718_v57  ;;  %8946 = vst [vmem:[#allocation34_spill] sm:$0xff] %v7126_v3  ;;  %v726_v57 = vld [vmem:[#allocation3 + $0x190] sm:$0xff]  ;;  %v7138_v23 = vpack.c.bf16 %v736_v31, %v732_v19  ;;  %v744_v19 = vld [vmem:[#allocation3 + $0x220] sm:$0xff] }
  0xaf   :  { %5003 = vmatpush1.bf16.msra.mxu1 %v7106_v58  ;;  %v7122_v58 = vpack.c.bf16 %v729_v1, %v725_v51  ;;  %v730_v5 = vld [vmem:[#allocation3 + $0x1b0] sm:$0xff]  ;;  %v737_v51 = vld [vmem:[#allocation3 + $0x1e8] sm:$0xff]  ;;  %v735_v1 = vld [vmem:[#allocation3 + $0x1d8] sm:$0xff] }
  0xb0   :  { %8943 = vst [vmem:[#allocation31_spill] sm:$0xff] %v7117_v4  ;;  %5005 = vmatprep.subr.bf16.mxu1 %v7112_v42  ;;  %v7129_v42 = vpack.c.bf16 %v730_v5, %v726_v57  ;;  %v7136_v17 = vpack.c.bf16 %v739_v2, %v735_v1  ;;  %8950 = vst [vmem:[#allocation38_spill] sm:$0xff] %v7138_v23  ;;  %v734_v57 = vld [vmem:[#allocation3 + $0x1d0] sm:$0xff]  ;;  %v747_v1 = vld [vmem:[#allocation3 + $0x238] sm:$0xff] }
  0xb1   :  { %4943 = vmatpush1.bf16.msra.mxu0 %v7114_v30  ;;  %8944 = vst [vmem:[#allocation32_spill] sm:$0xff] %v7122_v58  ;;  %v738_v5 = vld [vmem:[#allocation3 + $0x1f0] sm:$0xff]  ;;  %v740_v2 = vld [vmem:[#allocation3 + $0x200] sm:$0xff] }
  0xb2   :  { %4945 = vmatprep.subr.bf16.mxu0 %v7122_v58  ;;  %8947 = vst [vmem:[#allocation35_spill] sm:$0xff] %v7129_v42  ;;  %8949 = vst [vmem:[#allocation37_spill] sm:$0xff] %v7136_v17  ;;  %v7150_v58 = vpack.c.bf16 %v744_v19, %v740_v2  ;;  %v752_v2 = vld [vmem:[#allocation3 + $0x260] sm:$0xff] }
  0xb3   :  { %5007 = vmatpush1.bf16.msra.mxu1 %v7117_v4  ;;  %v733_v4 = vld [vmem:[#allocation3 + $0x1c8] sm:$0xff] }
  0xb4   :  { %5009 = vmatprep.subr.bf16.mxu1 %v7124_v39  ;;  %v7134_v30 = vpack.c.bf16 %v737_v51, %v733_v4  ;;  %v7141_v39 = vpack.c.bf16 %v738_v5, %v734_v57  ;;  %v745_v4 = vld [vmem:[#allocation3 + $0x228] sm:$0xff]  ;;  %v743_v51 = vld [vmem:[#allocation3 + $0x218] sm:$0xff]  ;;  %8954 = vst [vmem:[#allocation42_spill] sm:$0xff] %v7150_v58  ;;  %v742_v57 = vld [vmem:[#allocation3 + $0x210] sm:$0xff] }
  0xb5   :  { %4947 = vmatpush1.bf16.msra.mxu0 %v7126_v3  ;;  %v7148_v31 = vpack.c.bf16 %v747_v1, %v743_v51  ;;  %v746_v5 = vld [vmem:[#allocation3 + $0x230] sm:$0xff]  ;;  %v755_v51 = vld [vmem:[#allocation3 + $0x278] sm:$0xff]  ;;  %v748_v1 = vld [vmem:[#allocation3 + $0x240] sm:$0xff] }
  0xb6   :  { %8948 = vst [vmem:[#allocation36_spill] sm:$0xff] %v7134_v30  ;;  %4949 = vmatprep.subr.bf16.mxu0 %v7134_v30  ;;  %8951 = vst [vmem:[#allocation39_spill] sm:$0xff] %v7141_v39  ;;  %v7162_v30 = vpack.c.bf16 %v752_v2, %v748_v1  ;;  %v760_v1 = vld [vmem:[#allocation3 + $0x2a0] sm:$0xff] }
  0xb7   :  { %5011 = vmatpush1.bf16.msra.mxu1 %v7129_v42  ;;  %v741_v42 = vld [vmem:[#allocation3 + $0x208] sm:$0xff]  ;;  %8953 = vst [vmem:[#allocation41_spill] sm:$0xff] %v7148_v31 }
  0xb8   :  { %5013 = vmatprep.subr.bf16.mxu1 %v7136_v17  ;;  %v7146_v3 = vpack.c.bf16 %v745_v4, %v741_v42  ;;  %v7153_v17 = vpack.c.bf16 %v746_v5, %v742_v57  ;;  %v753_v42 = vld [vmem:[#allocation3 + $0x268] sm:$0xff]  ;;  %v751_v4 = vld [vmem:[#allocation3 + $0x258] sm:$0xff]  ;;  %8958 = vst [vmem:[#allocation46_spill] sm:$0xff] %v7162_v30  ;;  %v750_v57 = vld [vmem:[#allocation3 + $0x250] sm:$0xff] }
  0xb9   :  { %4951 = vmatpush1.bf16.msra.mxu0 %v7138_v23  ;;  %v7160_v19 = vpack.c.bf16 %v755_v51, %v751_v4  ;;  %v754_v5 = vld [vmem:[#allocation3 + $0x270] sm:$0xff]  ;;  %v763_v4 = vld [vmem:[#allocation3 + $0x2b8] sm:$0xff]  ;;  %v756_v51 = vld [vmem:[#allocation3 + $0x280] sm:$0xff] }
  0xba   :  { %8952 = vst [vmem:[#allocation40_spill] sm:$0xff] %v7146_v3  ;;  %4953 = vmatprep.subr.bf16.mxu0 %v7146_v3  ;;  %8955 = vst [vmem:[#allocation43_spill] sm:$0xff] %v7153_v17  ;;  %v7174_v3 = vpack.c.bf16 %v760_v1, %v756_v51  ;;  %v768_v51 = vld [vmem:[#allocation3 + $0x2e0] sm:$0xff] }
  0xbb   :  { %5015 = vmatpush1.bf16.msra.mxu1 %v7141_v39  ;;  %v749_v39 = vld [vmem:[#allocation3 + $0x248] sm:$0xff]  ;;  %8957 = vst [vmem:[#allocation45_spill] sm:$0xff] %v7160_v19 }
  0xbc   :  { %5017 = vmatprep.subr.bf16.mxu1 %v7148_v31  ;;  %v7158_v23 = vpack.c.bf16 %v753_v42, %v749_v39  ;;  %v7165_v31 = vpack.c.bf16 %v754_v5, %v750_v57  ;;  %v761_v39 = vld [vmem:[#allocation3 + $0x2a8] sm:$0xff]  ;;  %v759_v42 = vld [vmem:[#allocation3 + $0x298] sm:$0xff]  ;;  %8962 = vst [vmem:[#allocation50_spill] sm:$0xff] %v7174_v3  ;;  %v758_v57 = vld [vmem:[#allocation3 + $0x290] sm:$0xff] }
  0xbd   :  { %4955 = vmatpush1.bf16.msra.mxu0 %v7150_v58  ;;  %v7172_v2 = vpack.c.bf16 %v763_v4, %v759_v42  ;;  %v762_v5 = vld [vmem:[#allocation3 + $0x2b0] sm:$0xff]  ;;  %v771_v42 = vld [vmem:[#allocation3 + $0x2f8] sm:$0xff]  ;;  %v764_v4 = vld [vmem:[#allocation3 + $0x2c0] sm:$0xff] }
  0xbe   :  { %8956 = vst [vmem:[#allocation44_spill] sm:$0xff] %v7158_v23  ;;  %4957 = vmatprep.subr.bf16.mxu0 %v7158_v23  ;;  %8959 = vst [vmem:[#allocation47_spill] sm:$0xff] %v7165_v31  ;;  %v7186_v23 = vpack.c.bf16 %v768_v51, %v764_v4  ;;  %v776_v4 = vld [vmem:[#allocation3 + $0x320] sm:$0xff] }
  0xbf   :  { %5019 = vmatpush1.bf16.msra.mxu1 %v7153_v17  ;;  %v757_v17 = vld [vmem:[#allocation3 + $0x288] sm:$0xff]  ;;  %8961 = vst [vmem:[#allocation49_spill] sm:$0xff] %v7172_v2 }
  0xc0   :  { %5021 = vmatprep.subr.bf16.mxu1 %v7160_v19  ;;  %v7170_v58 = vpack.c.bf16 %v761_v39, %v757_v17  ;;  %v7177_v19 = vpack.c.bf16 %v762_v5, %v758_v57  ;;  %v769_v17 = vld [vmem:[#allocation3 + $0x2e8] sm:$0xff]  ;;  %v767_v39 = vld [vmem:[#allocation3 + $0x2d8] sm:$0xff]  ;;  %8966 = vst [vmem:[#allocation54_spill] sm:$0xff] %v7186_v23  ;;  %v766_v57 = vld [vmem:[#allocation3 + $0x2d0] sm:$0xff] }
  0xc1   :  { %4959 = vmatpush1.bf16.msra.mxu0 %v7162_v30  ;;  %v7184_v1 = vpack.c.bf16 %v771_v42, %v767_v39  ;;  %v770_v5 = vld [vmem:[#allocation3 + $0x2f0] sm:$0xff]  ;;  %v779_v39 = vld [vmem:[#allocation3 + $0x338] sm:$0xff]  ;;  %v772_v42 = vld [vmem:[#allocation3 + $0x300] sm:$0xff] }
  0xc2   :  { %8960 = vst [vmem:[#allocation48_spill] sm:$0xff] %v7170_v58  ;;  %4961 = vmatprep.subr.bf16.mxu0 %v7170_v58  ;;  %8963 = vst [vmem:[#allocation51_spill] sm:$0xff] %v7177_v19  ;;  %v7198_v58 = vpack.c.bf16 %v776_v4, %v772_v42  ;;  %v784_v42 = vld [vmem:[#allocation3 + $0x360] sm:$0xff] }
  0xc3   :  { %5023 = vmatpush1.bf16.msra.mxu1 %v7165_v31  ;;  %v765_v31 = vld [vmem:[#allocation3 + $0x2c8] sm:$0xff]  ;;  %8965 = vst [vmem:[#allocation53_spill] sm:$0xff] %v7184_v1 }
  0xc4   :  { %5025 = vmatprep.subr.bf16.mxu1 %v7172_v2  ;;  %v7182_v30 = vpack.c.bf16 %v769_v17, %v765_v31  ;;  %v7189_v2 = vpack.c.bf16 %v770_v5, %v766_v57  ;;  %v777_v31 = vld [vmem:[#allocation3 + $0x328] sm:$0xff]  ;;  %v775_v17 = vld [vmem:[#allocation3 + $0x318] sm:$0xff]  ;;  %8970 = vst [vmem:[#allocation58_spill] sm:$0xff] %v7198_v58  ;;  %v774_v57 = vld [vmem:[#allocation3 + $0x310] sm:$0xff] }
  0xc5   :  { %4963 = vmatpush1.bf16.msra.mxu0 %v7174_v3  ;;  %v7196_v51 = vpack.c.bf16 %v779_v39, %v775_v17  ;;  %v778_v5 = vld [vmem:[#allocation3 + $0x330] sm:$0xff]  ;;  %v787_v17 = vld [vmem:[#allocation3 + $0x378] sm:$0xff]  ;;  %v780_v39 = vld [vmem:[#allocation3 + $0x340] sm:$0xff] }
  0xc6   :  { %8964 = vst [vmem:[#allocation52_spill] sm:$0xff] %v7182_v30  ;;  %4965 = vmatprep.subr.bf16.mxu0 %v7182_v30  ;;  %8967 = vst [vmem:[#allocation55_spill] sm:$0xff] %v7189_v2  ;;  %v7210_v30 = vpack.c.bf16 %v784_v42, %v780_v39 }
  0xc7   :  { %5027 = vmatpush1.bf16.msra.mxu1 %v7177_v19  ;;  %v773_v19 = vld [vmem:[#allocation3 + $0x308] sm:$0xff]  ;;  %8969 = vst [vmem:[#allocation57_spill] sm:$0xff] %v7196_v51 }
  0xc8   :  { %5029 = vmatprep.subr.bf16.mxu1 %v7184_v1  ;;  %v7194_v3 = vpack.c.bf16 %v777_v31, %v773_v19  ;;  %v7201_v1 = vpack.c.bf16 %v778_v5, %v774_v57  ;;  %v785_v19 = vld [vmem:[#allocation3 + $0x368] sm:$0xff]  ;;  %v783_v31 = vld [vmem:[#allocation3 + $0x358] sm:$0xff]  ;;  %8974 = vst [vmem:[#allocation62_spill] sm:$0xff] %v7210_v30  ;;  %v782_v57 = vld [vmem:[#allocation3 + $0x350] sm:$0xff] }
  0xc9   :  { %4967 = vmatpush1.bf16.msra.mxu0 %v7186_v23  ;;  %v7208_v4 = vpack.c.bf16 %v787_v17, %v783_v31  ;;  %v786_v5 = vld [vmem:[#allocation3 + $0x370] sm:$0xff]  ;;  %v788_v31 = vld [vmem:[#allocation3 + $0x380] sm:$0xff] }
  0xca   :  { %8968 = vst [vmem:[#allocation56_spill] sm:$0xff] %v7194_v3  ;;  %4969 = vmatprep.subr.bf16.mxu0 %v7194_v3  ;;  %8971 = vst [vmem:[#allocation59_spill] sm:$0xff] %v7201_v1  ;;  %v793_v3 = vld [vmem:[#allocation3 + $0x3a8] sm:$0xff]  ;;  %v792_v17 = vld [vmem:[#allocation3 + $0x3a0] sm:$0xff] }
  0xcb   :  { %5031 = vmatpush1.bf16.msra.mxu1 %v7189_v2  ;;  %v781_v2 = vld [vmem:[#allocation3 + $0x348] sm:$0xff]  ;;  %8973 = vst [vmem:[#allocation61_spill] sm:$0xff] %v7208_v4  ;;  %v7222_v42 = vpack.c.bf16 %v792_v17, %v788_v31  ;;  %v798_v31 = vld [vmem:[#allocation3 + $0x3d0] sm:$0xff] }
  0xcc   :  { %5033 = vmatprep.subr.bf16.mxu1 %v7196_v51  ;;  %v7206_v23 = vpack.c.bf16 %v785_v19, %v781_v2  ;;  %v7213_v51 = vpack.c.bf16 %v786_v5, %v782_v57  ;;  %v795_v19 = vld [vmem:[#allocation3 + $0x3b8] sm:$0xff]  ;;  %v790_v57 = vld [vmem:[#allocation3 + $0x390] sm:$0xff] }
  0xcd   :  { %4971 = vmatpush1.bf16.msra.mxu0 %v7198_v58  ;;  %v789_v58 = vld [vmem:[#allocation3 + $0x388] sm:$0xff]  ;;  %v7220_v39 = vpack.c.bf16 %v795_v19, %v791_v9  ;;  %v794_v5 = vld [vmem:[#allocation3 + $0x3b0] sm:$0xff]  ;;  %v796_v9 = vld [vmem:[#allocation3 + $0x3c0] sm:$0xff] }
  0xce   :  { %8972 = vst [vmem:[#allocation60_spill] sm:$0xff] %v7206_v23  ;;  %4973 = vmatprep.subr.bf16.mxu0 %v7206_v23  ;;  %8975 = vst [vmem:[#allocation63_spill] sm:$0xff] %v7213_v51  ;;  %v7217_v2 = vpack.c.bf16 %v793_v3, %v789_v58  ;;  %v797_v23 = vld [vmem:[#allocation3 + $0x3c8] sm:$0xff]  ;;  %v803_v3 = vld [vmem:[#allocation3 + $0x3f8] sm:$0xff] }
  0xcf   :  { %5035 = vmatpush1.bf16.msra.mxu1 %v7201_v1  ;;  %v7225_v1 = vpack.c.bf16 %v794_v5, %v790_v57  ;;  %v800_v19 = vld [vmem:[#allocation3 + $0x3e0] sm:$0xff] }
  0xd0   :  { %5037 = vmatprep.subr.bf16.mxu1 %v7208_v4  ;;  %v801_v4 = vld [vmem:[#allocation3 + $0x3e8] sm:$0xff]  ;;  %v7233_v17 = vpack.c.bf16 %v800_v19, %v796_v9 }
  0xd1   :  { %4975 = vmatpush1.bf16.msra.mxu0 %v7210_v30  ;;  %v799_v30 = vld [vmem:[#allocation3 + $0x3d8] sm:$0xff]  ;;  %v7228_v58 = vpack.c.bf16 %v801_v4, %v797_v23 }
  0xd2   :  { %4977 = vmatprep.subr.bf16.mxu0 %v7217_v2  ;;  %v7230_v43 = vpack.c.bf16 %v803_v3, %v799_v30  ;;  %8977 = vst [vmem:[#allocation65_spill] sm:$0xff] %v7233_v17 }
  0xd3   :  { %5039 = vmatpush1.bf16.msra.mxu1 %v7213_v51  ;;  %v802_v51 = vld [vmem:[#allocation3 + $0x3f0] sm:$0xff] }
  0xd4   :  { %5041 = vmatprep.subr.bf16.mxu1 %v7220_v39  ;;  %8976 = vst [vmem:[#allocation64_spill] sm:$0xff] %v7230_v43  ;;  %v7237_v57 = vpack.c.bf16 %v802_v51, %v798_v31 }
  0xd5   :  { %4979 = vmatpush1.bf16.msra.mxu0 %v7222_v42 }
  0xd6   :  { %4981 = vmatprep.subr.bf16.mxu0 %v7228_v58  ;;  %8978 = vst [vmem:[#allocation66_spill] sm:$0xff] %v7237_v57 }
  0xd7   :  { %5043 = vmatpush1.bf16.msra.mxu1 %v7225_v1 }
  0xd8   :  { %5045 = vmatprep.subr.bf16.mxu1 %v7230_v43 }
  0xd9   :  { %4983 = vmatpush1.bf16.msra.mxu0 %v7233_v17 }
  0xda   :  { %5049 = vmatprep.subr.bf16.mxu0 %v6950_v7 }
  0xdb   :  { %5047 = vmatpush1.bf16.msra.mxu1 %v7237_v57 }
  0xdc   :  { %5081 = vmatprep.subr.bf16.mxu1 %v6963_v29 }
 0x16f   :  { %v572_v30 = vpop.f32.mrb[0].mxu0 }
 0x170   :  { %v6392_v23 = vadd.f32 %v572_v30, %v6896_v10  ;;  %v574_v4 = vpop.f32.mrb[1].mxu0 }
 0x171   :  { %v6393_v5 = vadd.f32 %v574_v4, %v6900_v11  ;;  %v643_v51 = vpop.f32.mrb[0].mxu1 }
 0x172   :  { %v4736_v3 = vmul.f32 -1.442695, %v6392_v23  ;;  %v645_v19 = vpop.f32.mrb[1].mxu1  ;;  %v6408_v31 = vadd.f32 %v643_v51, %v6904_v12 }
 0x173   :  { %v4737_v9 = vmul.f32 -1.442695, %v6393_v5  ;;  %v6409_v57 = vadd.f32 %v645_v19, %v6908_v13 }
 0x174   :  { %6462 = vpow2.f32 %v4736_v3  ;;  %v4738_v17 = vmul.f32 -1.442695, %v6408_v31 }
 0x175   :  { %6464 = vpow2.f32 %v4737_v9 }
 0x176   :  { %6466 = vpow2.f32 %v4738_v17 }
 0x177   :  { %6468 = vtanh.f32 %v6409_v57  ;;  %v9023_v57 = vld [vmem:[#allocation62_spill] sm:$0xff] }
 0x17e   :  { %v6463_v7 = vpop.eup %6462 }
 0x17f   :  { %v6465_v29 = vpop.eup %6464  ;;  %v661_v43 = vadd.f32 1.0, %v6463_v7  ;;  %v9024_v7 = vld [vmem:[#allocation63_spill] sm:$0xff] }
 0x180   :  { %v662_v30 = vadd.f32 1.0, %v6465_v29  ;;  %v6467_v4 = vpop.eup %6466  ;;  %v9025_v29 = vld [vmem:[#allocation64_spill] sm:$0xff] }
 0x181   :  { %6470 = vrcp.f32 %v661_v43  ;;  %v6469_v23 = vpop.eup %6468  ;;  %v663_v3 = vadd.f32 1.0, %v6467_v4  ;;  %v8979_v43 = vmov 0.0   ;;  %v9027_v4 = vld [vmem:[#allocation66_spill] sm:$0xff] }
 0x182   :  { %6472 = vrcp.f32 %v662_v30  ;;  %v9026_v30 = vld [vmem:[#allocation65_spill] sm:$0xff] }
 0x183   :  { %6474 = vrcp.f32 %v663_v3  ;;  %v1516_v3 = vld [vmem:[#allocation7 + $0x18] sm:$0xff] }
 0x18b   :  { %v6471_v5 = vpop.eup %6470 }
 0x18c   :  { %v6473_v11 = vpop.eup %6472  ;;  %v672_v9 = vmul.f32 %v6471_v5, %v6469_v23  ;;  %v1514_v23 = vld [vmem:[#allocation7 + $0x8] sm:$0xff] }
 0x18d   :  { %v671_v10 = vmul.f32 0.0, %v6473_v11  ;;  %v6475_v19 = vpop.eup %6474  ;;  %v8981_v11 = vld [vmem:[#allocation20_spill] sm:$0xff]  ;;  %v1518_v5 = vld [vmem:[#allocation7 + $0x28] sm:$0xff] }
 0x18f   :  { %v7248_v51 = vadd.f32 %v672_v9, %v671_v10  ;;  %v8980_v10 = vld [vmem:[#allocation19_spill] sm:$0xff]  ;;  %v7347_v9 = vpack.c.bf16 %v1518_v5, %v1514_v23 }
 0x191   :  { %6476 = vtanh.f32 %v7248_v51 }
 0x19b   :  { %v6477_v17 = vpop.eup %6476 }
 0x19c   :  { %v675_v31 = vmul.f32 %v6477_v17, %v6475_v19 }
 0x19e   :  { %869 = vmatmul.mubr.f32.vlgmr.msra.gmra.mrb[16].mxu0 %v675_v31  ;;  %940 = vmatmul.mubr.f32.vlgmr.msra.gmra.mrb[16].mxu1 %v675_v31 }
 0x19f   :  { %5051 = vmatpush1.bf16.msra.mxu0 %v6952_v15  ;;  %5083 = vmatpush1.bf16.msra.mxu1 %v6965_v32  ;;  %v8982_v15 = vld [vmem:[#allocation23_spill] sm:$0xff]  ;;  %v8986_v32 = vld [vmem:[#allocation26_spill] sm:$0xff] }
 0x1a0   :  { %5053 = vmatprep.subr.bf16.mxu0 %v6954_v16  ;;  %5085 = vmatprep.subr.bf16.mxu1 %v6975_v40  ;;  %v8983_v16 = vld [vmem:[#allocation21_spill] sm:$0xff] }
 0x1a1   :  { %1105 = vmatprep.mubr.f32.mxu0 %v8979_v43  ;;  %1176 = vmatprep.mubr.f32.mxu1 %v8979_v43  ;;  %v8990_v40 = vld [vmem:[#allocation29_spill] sm:$0xff] }
 0x1a3   :  { %5055 = vmatpush1.bf16.msra.mxu0 %v6958_v21  ;;  %5087 = vmatpush1.bf16.msra.mxu1 %v6977_v44  ;;  %v8984_v21 = vld [vmem:[#allocation25_spill] sm:$0xff]  ;;  %v8991_v44 = vld [vmem:[#allocation30_spill] sm:$0xff] }
 0x1a4   :  { %5057 = vmatprep.subr.bf16.mxu0 %v6961_v24  ;;  %5089 = vmatprep.subr.bf16.mxu1 %v6983_v52  ;;  %v8985_v24 = vld [vmem:[#allocation22_spill] sm:$0xff]  ;;  %v8993_v52 = vld [vmem:[#allocation32_spill] sm:$0xff] }
 0x1a7   :  { %5059 = vmatpush1.bf16.msra.mxu0 %v6968_v33  ;;  %5091 = vmatpush1.bf16.msra.mxu1 %v6989_v55  ;;  %v8987_v33 = vld [vmem:[#allocation24_spill] sm:$0xff]  ;;  %v8995_v55 = vld [vmem:[#allocation34_spill] sm:$0xff] }
 0x1a8   :  { %5061 = vmatprep.subr.bf16.mxu0 %v6972_v37  ;;  %5093 = vmatprep.subr.bf16.mxu1 %v6992_v59  ;;  %v8988_v37 = vld [vmem:[#allocation27_spill] sm:$0xff] }
 0x1a9   :  { %v8996_v59 = vld [vmem:[#allocation35_spill] sm:$0xff] }
 0x1ab   :  { %5063 = vmatpush1.bf16.msra.mxu0 %v6981_v49  ;;  %5095 = vmatpush1.bf16.msra.mxu1 %v7001_v18  ;;  %v8992_v49 = vld [vmem:[#allocation31_spill] sm:$0xff]  ;;  %v8999_v18 = vld [vmem:[#allocation38_spill] sm:$0xff] }
 0x1ac   :  { %5065 = vmatprep.subr.bf16.mxu0 %v6986_v53  ;;  %5097 = vmatprep.subr.bf16.mxu1 %v7004_v20  ;;  %v8994_v53 = vld [vmem:[#allocation33_spill] sm:$0xff]  ;;  %v9000_v20 = vld [vmem:[#allocation39_spill] sm:$0xff] }
 0x1af   :  { %5067 = vmatpush1.bf16.msra.mxu0 %v6995_v62  ;;  %5099 = vmatpush1.bf16.msra.mxu1 %v7013_v35  ;;  %v8997_v62 = vld [vmem:[#allocation36_spill] sm:$0xff]  ;;  %v9003_v35 = vld [vmem:[#allocation42_spill] sm:$0xff] }
 0x1b0   :  { %5069 = vmatprep.subr.bf16.mxu0 %v6998_v8  ;;  %5101 = vmatprep.subr.bf16.mxu1 %v7016_v38  ;;  %v8998_v8 = vld [vmem:[#allocation37_spill] sm:$0xff]  ;;  %v9004_v38 = vld [vmem:[#allocation43_spill] sm:$0xff] }
 0x1b3   :  { %5071 = vmatpush1.bf16.msra.mxu0 %v7007_v27  ;;  %5103 = vmatpush1.bf16.msra.mxu1 %v7025_v50  ;;  %v9001_v27 = vld [vmem:[#allocation40_spill] sm:$0xff]  ;;  %v9007_v50 = vld [vmem:[#allocation46_spill] sm:$0xff] }
 0x1b4   :  { %5073 = vmatprep.subr.bf16.mxu0 %v7010_v28  ;;  %5105 = vmatprep.subr.bf16.mxu1 %v7028_v54  ;;  %v9002_v28 = vld [vmem:[#allocation41_spill] sm:$0xff]  ;;  %v9008_v54 = vld [vmem:[#allocation47_spill] sm:$0xff] }
 0x1b7   :  { %5075 = vmatpush1.bf16.msra.mxu0 %v7019_v45  ;;  %5107 = vmatpush1.bf16.msra.mxu1 %v7035_v0  ;;  %v9005_v45 = vld [vmem:[#allocation44_spill] sm:$0xff]  ;;  %v9010_v0 = vld [vmem:[#allocation49_spill] sm:$0xff] }
 0x1b8   :  { %5077 = vmatprep.subr.bf16.mxu0 %v7022_v46  ;;  %5109 = vmatprep.subr.bf16.mxu1 %v7040_v22  ;;  %v9006_v46 = vld [vmem:[#allocation45_spill] sm:$0xff]  ;;  %v9012_v22 = vld [vmem:[#allocation51_spill] sm:$0xff] }
 0x1bb   :  { %5079 = vmatpush1.bf16.msra.mxu0 %v7031_v63  ;;  %5111 = vmatpush1.bf16.msra.mxu1 %v7046_v36  ;;  %v9009_v63 = vld [vmem:[#allocation48_spill] sm:$0xff]  ;;  %v9014_v36 = vld [vmem:[#allocation53_spill] sm:$0xff] }
 0x1bc   :  { %5113 = vmatprep.subr.bf16.mxu0 %v7037_v14  ;;  %5177 = vmatprep.subr.bf16.mxu1 %v7052_v47  ;;  %v9011_v14 = vld [vmem:[#allocation50_spill] sm:$0xff]  ;;  %v9016_v47 = vld [vmem:[#allocation55_spill] sm:$0xff] }
 0x1be   :  { %1106 = vmatmul.mubr.f32.vlgmr.msra.gmra.mrb[2].mxu0 %v675_v31  ;;  %1177 = vmatmul.mubr.f32.vlgmr.msra.gmra.mrb[2].mxu1 %v675_v31 }
 0x1bf   :  { %5115 = vmatpush1.bf16.msra.mxu0 %v7043_v34  ;;  %5179 = vmatpush1.bf16.msra.mxu1 %v7060_v61  ;;  %v9013_v34 = vld [vmem:[#allocation52_spill] sm:$0xff]  ;;  %v9018_v61 = vld [vmem:[#allocation57_spill] sm:$0xff] }
 0x1c0   :  { %5117 = vmatprep.subr.bf16.mxu0 %v7049_v41  ;;  %5181 = vmatprep.subr.bf16.mxu1 %v7066_v25  ;;  %v9015_v41 = vld [vmem:[#allocation54_spill] sm:$0xff] }
 0x1c1   :  { %v9019_v25 = vld [vmem:[#allocation58_spill] sm:$0xff] }
 0x1c3   :  { %5119 = vmatpush1.bf16.msra.mxu0 %v7056_v60  ;;  %5183 = vmatpush1.bf16.msra.mxu1 %v7073_v48  ;;  %v9017_v60 = vld [vmem:[#allocation56_spill] sm:$0xff]  ;;  %v9020_v48 = vld [vmem:[#allocation59_spill] sm:$0xff] }
 0x1c4   :  { %5121 = vmatprep.subr.bf16.mxu0 %v8980_v10  ;;  %5185 = vmatprep.subr.bf16.mxu1 %v7079_v6  ;;  %v8989_v6 = vld [vmem:[#allocation28_spill] sm:$0xff] }
 0x1c7   :  { %5123 = vmatpush1.bf16.msra.mxu0 %v8981_v11  ;;  %5187 = vmatpush1.bf16.msra.mxu1 %v7086_v26  ;;  %v9022_v26 = vld [vmem:[#allocation61_spill] sm:$0xff] }
 0x1c8   :  { %5125 = vmatprep.subr.bf16.mxu0 %v7076_v56  ;;  %5189 = vmatprep.subr.bf16.mxu1 %v8982_v15  ;;  %v9021_v56 = vld [vmem:[#allocation60_spill] sm:$0xff] }
 0x1cb   :  { %5127 = vmatpush1.bf16.msra.mxu0 %v8983_v16  ;;  %5191 = vmatpush1.bf16.msra.mxu1 %v8984_v21 }
 0x1cc   :  { %5129 = vmatprep.subr.bf16.mxu0 %v8985_v24  ;;  %5193 = vmatprep.subr.bf16.mxu1 %v8986_v32 }
 0x1cf   :  { %5131 = vmatpush1.bf16.msra.mxu0 %v8987_v33  ;;  %5195 = vmatpush1.bf16.msra.mxu1 %v8988_v37 }
 0x1d0   :  { %5133 = vmatprep.subr.bf16.mxu0 %v8989_v6  ;;  %5197 = vmatprep.subr.bf16.mxu1 %v8990_v40 }
 0x1d3   :  { %5135 = vmatpush1.bf16.msra.mxu0 %v8991_v44  ;;  %5199 = vmatpush1.bf16.msra.mxu1 %v8992_v49 }
 0x1d4   :  { %5137 = vmatprep.subr.bf16.mxu0 %v8993_v52  ;;  %5201 = vmatprep.subr.bf16.mxu1 %v8994_v53 }
 0x1d7   :  { %5139 = vmatpush1.bf16.msra.mxu0 %v8995_v55  ;;  %5203 = vmatpush1.bf16.msra.mxu1 %v8996_v59 }
 0x1d8   :  { %5141 = vmatprep.subr.bf16.mxu0 %v8997_v62  ;;  %5205 = vmatprep.subr.bf16.mxu1 %v8998_v8 }
 0x1db   :  { %5143 = vmatpush1.bf16.msra.mxu0 %v8999_v18  ;;  %5207 = vmatpush1.bf16.msra.mxu1 %v9000_v20 }
 0x1dc   :  { %5145 = vmatprep.subr.bf16.mxu0 %v9001_v27  ;;  %5209 = vmatprep.subr.bf16.mxu1 %v9002_v28 }
 0x1df   :  { %5147 = vmatpush1.bf16.msra.mxu0 %v9003_v35  ;;  %5211 = vmatpush1.bf16.msra.mxu1 %v9004_v38 }
 0x1e0   :  { %5149 = vmatprep.subr.bf16.mxu0 %v9005_v45  ;;  %5213 = vmatprep.subr.bf16.mxu1 %v9006_v46 }
 0x1e3   :  { %5151 = vmatpush1.bf16.msra.mxu0 %v9007_v50  ;;  %5215 = vmatpush1.bf16.msra.mxu1 %v9008_v54 }
 0x1e4   :  { %5153 = vmatprep.subr.bf16.mxu0 %v9009_v63  ;;  %5217 = vmatprep.subr.bf16.mxu1 %v9010_v0  ;;  %v9035_v63 = vld [vmem:[#allocation17_spill] sm:$0xff] }
 0x1e7   :  { %5155 = vmatpush1.bf16.msra.mxu0 %v9011_v14  ;;  %5219 = vmatpush1.bf16.msra.mxu1 %v9012_v22 }
 0x1e8   :  { %5157 = vmatprep.subr.bf16.mxu0 %v9013_v34  ;;  %5221 = vmatprep.subr.bf16.mxu1 %v9014_v36  ;;  %v9036_v34 = vld [vmem:[#allocation18_spill] sm:$0xff] }
 0x1eb   :  { %5159 = vmatpush1.bf16.msra.mxu0 %v9015_v41  ;;  %5223 = vmatpush1.bf16.msra.mxu1 %v9016_v47 }
 0x1ec   :  { %5161 = vmatprep.subr.bf16.mxu0 %v9017_v60  ;;  %5225 = vmatprep.subr.bf16.mxu1 %v9018_v61 }
 0x1ef   :  { %5163 = vmatpush1.bf16.msra.mxu0 %v9019_v25  ;;  %5227 = vmatpush1.bf16.msra.mxu1 %v9020_v48 }
 0x1f0   :  { %5165 = vmatprep.subr.bf16.mxu0 %v9021_v56  ;;  %5229 = vmatprep.subr.bf16.mxu1 %v9022_v26 }
 0x1f3   :  { %5167 = vmatpush1.bf16.msra.mxu0 %v9023_v57  ;;  %5231 = vmatpush1.bf16.msra.mxu1 %v9024_v7 }
 0x1f4   :  { %5169 = vmatprep.subr.bf16.mxu0 %v7217_v2  ;;  %5233 = vmatprep.subr.bf16.mxu1 %v7220_v39  ;;  %v1520_v2 = vld [vmem:[#allocation7 + $0x38] sm:$0xff]  ;;  %v9028_v39 = vld [vmem:[#allocation16_spill] sm:$0xff] }
 0x1f5   :  { %v7349_v19 = vpack.c.bf16 %v1520_v2, %v1516_v3  ;;  %v9031_v17 = vsub.s32 1, %v9028_v39  ;;  %v9032_v37 = vsub.s32 2, %v9028_v39  ;;  %v9034_v40 = vsub.s32 3, %v9028_v39 }
 0x1f7   :  { %5171 = vmatpush1.bf16.msra.mxu0 %v7222_v42  ;;  %5235 = vmatpush1.bf16.msra.mxu1 %v7225_v1  ;;  %v416_v1 = vld [vmem:[%s8689_s4] sm:$0xf]  ;;  %v9029_v42 = vsub.s32 0, %v9028_v39 }
 0x1f8   :  { %5173 = vmatprep.subr.bf16.mxu0 %v7228_v58  ;;  %5237 = vmatprep.subr.bf16.mxu1 %v9025_v29  ;;  %v7362_v31 = vrot.slane %v416_v1, %v9031_v17  ;;  %v7368_v6 = vrot.slane %v416_v1, %v9032_v37  ;;  %v7372_v44 = vrot.slane %v416_v1, %v9034_v40 }
 0x1f9   :  { %v7358_v58 = vrot.slane %v416_v1, %v9029_v42 }
 0x1fa   :  { %9033 = vst [vmem:[#allocation20_spill] sm:$0xff] %v7368_v6 }
 0x1fb   :  { %5175 = vmatpush1.bf16.msra.mxu0 %v9026_v30  ;;  %5239 = vmatpush1.bf16.msra.mxu1 %v9027_v4  ;;  %9030 = vst [vmem:[#allocation19_spill] sm:$0xff] %v7358_v58 }
 0x1fc   :  { %5241 = vmatprep.subr.bf16.mxu0 %v7347_v9  ;;  %5273 = vmatprep.subr.bf16.mxu1 %v7349_v19 }
 0x271   :  { %v870_v10 = vpop.f32.mrb[16].mxu0  ;;  %v941_v11 = vpop.f32.mrb[16].mxu1 }
 0x272   :  { %v871_v15 = vadd.f32 %v870_v10, %v7358_v58  ;;  %v872_v16 = vpop.f32.mrb[17].mxu0  ;;  %v943_v21 = vpop.f32.mrb[17].mxu1  ;;  %v942_v49 = vadd.f32 %v941_v11, %v7368_v6  ;;  %v1513_v10 = vld [vmem:[#allocation7] sm:$0xff] }
 0x273   :  { %v873_v24 = vadd.f32 %v872_v16, %v7362_v31  ;;  %v944_v52 = vadd.f32 %v943_v21, %v7372_v44  ;;  %v1517_v11 = vld [vmem:[#allocation7 + $0x20] sm:$0xff]  ;;  %v1519_v16 = vld [vmem:[#allocation7 + $0x30] sm:$0xff]  ;;  %v1522_v21 = vld [vmem:[#allocation7 + $0x48] sm:$0xff] }
 0x274   :  { %v4739_v32 = vmul.f32 -1.442695, %v871_v15  ;;  %v4741_v53 = vmul.f32 -1.442695, %v942_v49  ;;  %v1515_v15 = vld [vmem:[#allocation7 + $0x10] sm:$0xff]  ;;  %v7390_v49 = vpack.c.bf16 %v1517_v11, %v1513_v10 }
 0x275   :  { %v4740_v33 = vmul.f32 -1.442695, %v873_v24  ;;  %v1526_v24 = vld [vmem:[#allocation7 + $0x68] sm:$0xff] }
 0x276   :  { %6478 = vpow2.f32 %v4739_v32  ;;  %v1524_v32 = vld [vmem:[#allocation7 + $0x58] sm:$0xff] }
 0x277   :  { %6480 = vpow2.f32 %v4740_v33  ;;  %v1528_v33 = vld [vmem:[#allocation7 + $0x78] sm:$0xff] }
 0x278   :  { %6482 = vtanh.f32 %v944_v52  ;;  %v7392_v52 = vpack.c.bf16 %v1519_v16, %v1515_v15  ;;  %v1547_v15 = vld [vmem:[#allocation7 + $0x110] sm:$0xff] }
 0x279   :  { %6484 = vpow2.f32 %v4741_v53  ;;  %v1525_v53 = vld [vmem:[#allocation7 + $0x60] sm:$0xff]  ;;  %v1551_v16 = vld [vmem:[#allocation7 + $0x130] sm:$0xff] }
 0x280   :  { %v6479_v55 = vpop.eup %6478 }
 0x281   :  { %v955_v59 = vadd.f32 1.0, %v6479_v55  ;;  %v6481_v62 = vpop.eup %6480 }
 0x282   :  { %v956_v8 = vadd.f32 1.0, %v6481_v62  ;;  %v6483_v18 = vpop.eup %6482  ;;  %v7398_v62 = vpack.c.bf16 %v1528_v33, %v1524_v32  ;;  %v1556_v32 = vld [vmem:[#allocation7 + $0x158] sm:$0xff] }
 0x283   :  { %6486 = vrcp.f32 %v955_v59  ;;  %v6485_v20 = vpop.eup %6484  ;;  %v7396_v59 = vpack.c.bf16 %v1526_v24, %v1522_v21  ;;  %v1554_v21 = vld [vmem:[#allocation7 + $0x148] sm:$0xff]  ;;  %v1560_v33 = vld [vmem:[#allocation7 + $0x178] sm:$0xff] }
 0x284   :  { %6488 = vrcp.f32 %v956_v8  ;;  %v957_v38 = vadd.f32 1.0, %v6485_v20  ;;  %v1523_v8 = vld [vmem:[#allocation7 + $0x50] sm:$0xff]  ;;  %v1530_v20 = vld [vmem:[#allocation7 + $0x88] sm:$0xff] }
 0x285   :  { %v1558_v24 = vld [vmem:[#allocation7 + $0x168] sm:$0xff] }
 0x286   :  { %6490 = vrcp.f32 %v957_v38 }
 0x28d   :  { %v6487_v27 = vpop.eup %6486 }
 0x28e   :  { %v966_v28 = vmul.f32 %v6487_v27, %v6483_v18  ;;  %v6489_v35 = vpop.eup %6488  ;;  %v1527_v18 = vld [vmem:[#allocation7 + $0x70] sm:$0xff]  ;;  %v1534_v27 = vld [vmem:[#allocation7 + $0xa8] sm:$0xff] }
 0x28f   :  { %v965_v45 = vmul.f32 0.0, %v6489_v35  ;;  %v1536_v35 = vld [vmem:[#allocation7 + $0xb8] sm:$0xff] }
 0x290   :  { %v6491_v25 = vpop.eup %6490 }
 0x291   :  { %v1107_v46 = vpop.f32.mrb[2].mxu0  ;;  %v1178_v50 = vpop.f32.mrb[2].mxu1  ;;  %v7376_v54 = vadd.f32 %v966_v28, %v965_v45  ;;  %v1532_v28 = vld [vmem:[#allocation7 + $0x98] sm:$0xff]  ;;  %v7406_v45 = vpack.c.bf16 %v1527_v18, %v1523_v8  ;;  %v7448_v8 = vpack.c.bf16 %v1558_v24, %v1554_v21  ;;  %v7450_v18 = vpack.c.bf16 %v1560_v33, %v1556_v32  ;;  %v1571_v21 = vld [vmem:[#allocation7 + $0x1d0] sm:$0xff] }
 0x292   :  { %v6394_v0 = vadd.f32 %v1107_v46, %v9035_v63  ;;  %v1109_v14 = vpop.f32.mrb[3].mxu0  ;;  %v1180_v22 = vpop.f32.mrb[3].mxu1  ;;  %v6410_v60 = vadd.f32 %v1178_v50, %v6904_v12  ;;  %v1529_v46 = vld [vmem:[#allocation7 + $0x80] sm:$0xff]  ;;  %v1575_v24 = vld [vmem:[#allocation7 + $0x1f0] sm:$0xff] }
 0x293   :  { %v6395_v36 = vadd.f32 %v1109_v14, %v9036_v34  ;;  %6492 = vtanh.f32 %v7376_v54  ;;  %v6411_v61 = vadd.f32 %v1180_v22, %v6908_v13  ;;  %v1533_v50 = vld [vmem:[#allocation7 + $0xa0] sm:$0xff]  ;;  %v7412_v14 = vpack.c.bf16 %v1536_v35, %v1532_v28  ;;  %v1531_v22 = vld [vmem:[#allocation7 + $0x90] sm:$0xff]  ;;  %v1562_v28 = vld [vmem:[#allocation7 + $0x188] sm:$0xff] }
 0x294   :  { %v4742_v41 = vmul.f32 -1.442695, %v6394_v0  ;;  %v4744_v56 = vmul.f32 -1.442695, %v6410_v60  ;;  %v7410_v0 = vpack.c.bf16 %v1534_v27, %v1530_v20  ;;  %v1540_v60 = vld [vmem:[#allocation7 + $0xd8] sm:$0xff]  ;;  %v1555_v20 = vld [vmem:[#allocation7 + $0x150] sm:$0xff]  ;;  %v7480_v33 = vpack.c.bf16 %v1575_v24, %v1571_v21 }
 0x295   :  { %v4743_v47 = vmul.f32 -1.442695, %v6395_v36  ;;  %v1535_v36 = vld [vmem:[#allocation7 + $0xb0] sm:$0xff]  ;;  %v1566_v35 = vld [vmem:[#allocation7 + $0x1a8] sm:$0xff] }
 0x296   :  { %6494 = vpow2.f32 %v4742_v41  ;;  %v1538_v41 = vld [vmem:[#allocation7 + $0xc8] sm:$0xff]  ;;  %v1559_v27 = vld [vmem:[#allocation7 + $0x170] sm:$0xff] }
 0x297   :  { %6496 = vpow2.f32 %v4743_v47  ;;  %v1542_v47 = vld [vmem:[#allocation7 + $0xe8] sm:$0xff] }
 0x298   :  { %6498 = vtanh.f32 %v6411_v61  ;;  %v1544_v61 = vld [vmem:[#allocation7 + $0xf8] sm:$0xff] }
 0x29d   :  { %v6493_v48 = vpop.eup %6492 }
 0x29e   :  { %v969_v26 = vmul.f32 %v6493_v48, %v6491_v25  ;;  %v7418_v25 = vpack.c.bf16 %v1533_v50, %v1529_v46  ;;  %v7420_v48 = vpack.c.bf16 %v1535_v36, %v1531_v22  ;;  %v1564_v46 = vld [vmem:[#allocation7 + $0x198] sm:$0xff]  ;;  %v7456_v36 = vpack.c.bf16 %v1559_v27, %v1555_v20 }
 0x29f   :  { %v1568_v50 = vld [vmem:[#allocation7 + $0x1b8] sm:$0xff] }
 0x2a0   :  { %v6495_v57 = vpop.eup %6494  ;;  %6500 = vtanh.f32 %v969_v26  ;;  %1403 = vmatprep.mubr.f32.mxu0 %v969_v26  ;;  %1474 = vmatprep.mubr.f32.mxu1 %v969_v26  ;;  %v1541_v26 = vld [vmem:[#allocation7 + $0xe0] sm:$0xff]  ;;  %v1750_v20 = vld [vmem:[#allocation3 + $0x18] sm:$0xff] }
 0x2a1   :  { %v1196_v7 = vadd.f32 1.0, %v6495_v57  ;;  %v6497_v29 = vpop.eup %6496  ;;  %6502 = vpow2.f32 %v4744_v56  ;;  %v1537_v56 = vld [vmem:[#allocation7 + $0xc0] sm:$0xff]  ;;  %v7424_v57 = vpack.c.bf16 %v1542_v47, %v1538_v41 }
 0x2a2   :  { %v1197_v30 = vadd.f32 1.0, %v6497_v29  ;;  %v6499_v4 = vpop.eup %6498  ;;  %v1539_v29 = vld [vmem:[#allocation7 + $0xd0] sm:$0xff]  ;;  %v1561_v41 = vld [vmem:[#allocation7 + $0x180] sm:$0xff] }
 0x2a3   :  { %6504 = vrcp.f32 %v1196_v7  ;;  %v7426_v7 = vpack.c.bf16 %v1544_v61, %v1540_v60  ;;  %v1565_v47 = vld [vmem:[#allocation7 + $0x1a0] sm:$0xff]  ;;  %v7460_v60 = vpack.c.bf16 %v1566_v35, %v1562_v28  ;;  %v7462_v61 = vpack.c.bf16 %v1568_v50, %v1564_v46  ;;  %v1754_v28 = vld [vmem:[#allocation3 + $0x38] sm:$0xff] }
 0x2a4   :  { %6506 = vrcp.f32 %v1197_v30  ;;  %v1543_v30 = vld [vmem:[#allocation7 + $0xf0] sm:$0xff]  ;;  %v1747_v35 = vld [vmem:[#allocation3] sm:$0xff]  ;;  %v7490_v50 = vpack.c.bf16 %v1754_v28, %v1750_v20  ;;  %v1764_v28 = vld [vmem:[#allocation3 + $0x88] sm:$0xff] }
 0x2a5   :  { %v1751_v46 = vld [vmem:[#allocation3 + $0x20] sm:$0xff] }
 0x2aa   :  { %v6501_v23 = vpop.eup %6500 }
 0x2ab   :  { %v6503_v5 = vpop.eup %6502  ;;  %971 = vst [vmem:[%s8691_s6] sm:$0xff] %v6501_v23  ;;  %v1550_v23 = vld [vmem:[#allocation7 + $0x128] sm:$0xff] }
 0x2ac   :  { %v1198_v39 = vadd.f32 1.0, %v6503_v5  ;;  %v1548_v5 = vld [vmem:[#allocation7 + $0x118] sm:$0xff] }
 0x2ad   :  { %v6505_v3 = vpop.eup %6504 }
 0x2ae   :  { %v1207_v2 = vmul.f32 %v6505_v3, %v6499_v4  ;;  %v6507_v1 = vpop.eup %6506  ;;  %6508 = vrcp.f32 %v1198_v39  ;;  %v1546_v4 = vld [vmem:[#allocation7 + $0x108] sm:$0xff]  ;;  %v1552_v3 = vld [vmem:[#allocation7 + $0x138] sm:$0xff]  ;;  %v1545_v39 = vld [vmem:[#allocation7 + $0x100] sm:$0xff] }
 0x2af   :  { %v1206_v42 = vmul.f32 %v6507_v1, %v7248_v51  ;;  %v1521_v51 = vld [vmem:[#allocation7 + $0x40] sm:$0xff]  ;;  %v7432_v1 = vpack.c.bf16 %v1543_v30, %v1539_v29  ;;  %v7436_v10 = vpack.c.bf16 %v1550_v23, %v1546_v4  ;;  %v7438_v11 = vpack.c.bf16 %v1552_v3, %v1548_v5  ;;  %v1570_v29 = vld [vmem:[#allocation7 + $0x1c8] sm:$0xff]  ;;  %v1572_v4 = vld [vmem:[#allocation7 + $0x1d8] sm:$0xff] }
 0x2b0   :  { %v7404_v38 = vpack.c.bf16 %v1525_v53, %v1521_v51  ;;  %v1553_v51 = vld [vmem:[#allocation7 + $0x140] sm:$0xff]  ;;  %v1574_v30 = vld [vmem:[#allocation7 + $0x1e8] sm:$0xff]  ;;  %v1576_v23 = vld [vmem:[#allocation7 + $0x1f8] sm:$0xff]  ;;  %v7466_v5 = vpack.c.bf16 %v1565_v47, %v1561_v41  ;;  %v7492_v41 = vpack.c.bf16 %v1751_v46, %v1747_v35 }
 0x2b1   :  { %v7387_v17 = vadd.f32 %v1207_v2, %v1206_v42  ;;  %v7430_v2 = vpack.c.bf16 %v1541_v26, %v1537_v56  ;;  %v1549_v42 = vld [vmem:[#allocation7 + $0x120] sm:$0xff]  ;;  %v1563_v56 = vld [vmem:[#allocation7 + $0x190] sm:$0xff]  ;;  %v1768_v35 = vld [vmem:[#allocation3 + $0xa8] sm:$0xff] }
 0x2b2   :  { %v1557_v53 = vld [vmem:[#allocation7 + $0x160] sm:$0xff]  ;;  %v1567_v26 = vld [vmem:[#allocation7 + $0x1b0] sm:$0xff]  ;;  %v1766_v46 = vld [vmem:[#allocation3 + $0x98] sm:$0xff] }
 0x2b3   :  { %6510 = vtanh.f32 %v7387_v17  ;;  %v7454_v22 = vpack.c.bf16 %v1557_v53, %v1553_v51  ;;  %v7468_v3 = vpack.c.bf16 %v1567_v26, %v1563_v56  ;;  %v1748_v51 = vld [vmem:[#allocation3 + $0x8] sm:$0xff]  ;;  %v1749_v47 = vld [vmem:[#allocation3 + $0x10] sm:$0xff] }
 0x2b4   :  { %v1752_v53 = vld [vmem:[#allocation3 + $0x28] sm:$0xff]  ;;  %v1753_v56 = vld [vmem:[#allocation3 + $0x30] sm:$0xff] }
 0x2b5   :  { %v7488_v27 = vpack.c.bf16 %v1752_v53, %v1748_v51  ;;  %v7495_v26 = vpack.c.bf16 %v1753_v56, %v1749_v47  ;;  %v1757_v51 = vld [vmem:[#allocation3 + $0x50] sm:$0xff]  ;;  %v7512_v47 = vpack.c.bf16 %v1768_v35, %v1764_v28  ;;  %v1770_v56 = vld [vmem:[#allocation3 + $0xb8] sm:$0xff]  ;;  %v1776_v28 = vld [vmem:[#allocation3 + $0xe8] sm:$0xff] }
 0x2b6   :  { %v1761_v53 = vld [vmem:[#allocation3 + $0x70] sm:$0xff]  ;;  %v1774_v35 = vld [vmem:[#allocation3 + $0xd8] sm:$0xff] }
 0x2b7   :  { %v7507_v20 = vpack.c.bf16 %v1761_v53, %v1757_v51  ;;  %9041 = vst [vmem:[#allocation26_spill] sm:$0xff] %v7512_v47  ;;  %v1772_v53 = vld [vmem:[#allocation3 + $0xc8] sm:$0xff] }
 0x2b8   :  { %v6509_v37 = vpop.eup %6508 }
 0x2b9   :  { %9040 = vst [vmem:[#allocation22_spill] sm:$0xff] %v7507_v20 }
 0x2bd   :  { %v6511_v40 = vpop.eup %6510 }
 0x2be   :  { %v7394_v55 = vmul.f32 %v6511_v40, %v6509_v37  ;;  %v7442_v37 = vpack.c.bf16 %v1549_v42, %v1545_v39  ;;  %v7444_v40 = vpack.c.bf16 %v1551_v16, %v1547_v15  ;;  %v1569_v39 = vld [vmem:[#allocation7 + $0x1c0] sm:$0xff]  ;;  %v7472_v42 = vpack.c.bf16 %v1574_v30, %v1570_v29  ;;  %v1760_v29 = vld [vmem:[#allocation3 + $0x68] sm:$0xff]  ;;  %v1758_v30 = vld [vmem:[#allocation3 + $0x58] sm:$0xff] }
 0x2bf   :  { %v7474_v15 = vpack.c.bf16 %v1576_v23, %v1572_v4  ;;  %v1573_v16 = vld [vmem:[#allocation7 + $0x1e0] sm:$0xff]  ;;  %v1762_v23 = vld [vmem:[#allocation3 + $0x78] sm:$0xff] }
 0x2c0   :  { %1404 = vmatmul.mubr.f32.vlgmr.msra.gmra.mrb[18].mxu0 %v7394_v55  ;;  %1475 = vmatmul.mubr.f32.vlgmr.msra.gmra.mrb[18].mxu1 %v7394_v55  ;;  %v7478_v32 = vpack.c.bf16 %v1573_v16, %v1569_v39  ;;  %v1755_v39 = vld [vmem:[#allocation3 + $0x40] sm:$0xff]  ;;  %v7502_v21 = vpack.c.bf16 %v1762_v23, %v1758_v30  ;;  %v7514_v30 = vpack.c.bf16 %v1770_v56, %v1766_v46  ;;  %v1778_v46 = vld [vmem:[#allocation3 + $0xf8] sm:$0xff] }
 0x2c1   :  { %5243 = vmatpush1.bf16.msra.mxu0 %v7390_v49  ;;  %5275 = vmatpush1.bf16.msra.mxu1 %v7392_v52  ;;  %v1759_v16 = vld [vmem:[#allocation3 + $0x60] sm:$0xff] }
 0x2c2   :  { %5245 = vmatprep.subr.bf16.mxu0 %v7396_v59  ;;  %5277 = vmatprep.subr.bf16.mxu1 %v7398_v62  ;;  %9038 = vst [vmem:[#allocation21_spill] sm:$0xff] %v7502_v21  ;;  %v7504_v24 = vpack.c.bf16 %v1759_v16, %v1755_v39  ;;  %9042 = vst [vmem:[#allocation24_spill] sm:$0xff] %v7514_v30  ;;  %v1765_v39 = vld [vmem:[#allocation3 + $0x90] sm:$0xff]  ;;  %v1771_v56 = vld [vmem:[#allocation3 + $0xc0] sm:$0xff] }
 0x2c3   :  { %1641 = vmatprep.mubr.f32.mxu0 %v8979_v43  ;;  %1712 = vmatprep.mubr.f32.mxu1 %v8979_v43  ;;  %v1769_v16 = vld [vmem:[#allocation3 + $0xb0] sm:$0xff] }
 0x2c4   :  { %9039 = vst [vmem:[#allocation25_spill] sm:$0xff] %v7504_v24  ;;  %v7519_v51 = vpack.c.bf16 %v1769_v16, %v1765_v39  ;;  %v1773_v39 = vld [vmem:[#allocation3 + $0xd0] sm:$0xff] }
 0x2c5   :  { %5247 = vmatpush1.bf16.msra.mxu0 %v7404_v38  ;;  %5279 = vmatpush1.bf16.msra.mxu1 %v7406_v45  ;;  %v1777_v16 = vld [vmem:[#allocation3 + $0xf0] sm:$0xff] }
 0x2c6   :  { %5249 = vmatprep.subr.bf16.mxu0 %v7410_v0  ;;  %5281 = vmatprep.subr.bf16.mxu1 %v7412_v14  ;;  %9044 = vst [vmem:[#allocation28_spill] sm:$0xff] %v7519_v51 }
 0x2c9   :  { %5251 = vmatpush1.bf16.msra.mxu0 %v7418_v25  ;;  %5283 = vmatpush1.bf16.msra.mxu1 %v7420_v48 }
 0x2ca   :  { %5253 = vmatprep.subr.bf16.mxu0 %v7424_v57  ;;  %5285 = vmatprep.subr.bf16.mxu1 %v7426_v7 }
 0x2cd   :  { %5255 = vmatpush1.bf16.msra.mxu0 %v7430_v2  ;;  %5287 = vmatpush1.bf16.msra.mxu1 %v7432_v1 }
 0x2ce   :  { %5257 = vmatprep.subr.bf16.mxu0 %v7436_v10  ;;  %5289 = vmatprep.subr.bf16.mxu1 %v7438_v11 }
 0x2d1   :  { %5259 = vmatpush1.bf16.msra.mxu0 %v7442_v37  ;;  %5291 = vmatpush1.bf16.msra.mxu1 %v7444_v40 }
 0x2d2   :  { %5261 = vmatprep.subr.bf16.mxu0 %v7448_v8  ;;  %5293 = vmatprep.subr.bf16.mxu1 %v7450_v18 }
 0x2d5   :  { %5263 = vmatpush1.bf16.msra.mxu0 %v7454_v22  ;;  %5295 = vmatpush1.bf16.msra.mxu1 %v7456_v36 }
 0x2d6   :  { %5265 = vmatprep.subr.bf16.mxu0 %v7460_v60  ;;  %5297 = vmatprep.subr.bf16.mxu1 %v7462_v61 }
 0x2d9   :  { %5267 = vmatpush1.bf16.msra.mxu0 %v7466_v5  ;;  %5299 = vmatpush1.bf16.msra.mxu1 %v7468_v3 }
 0x2da   :  { %5269 = vmatprep.subr.bf16.mxu0 %v7472_v42  ;;  %5301 = vmatprep.subr.bf16.mxu1 %v7474_v15 }
 0x2dd   :  { %5271 = vmatpush1.bf16.msra.mxu0 %v7478_v32  ;;  %5303 = vmatpush1.bf16.msra.mxu1 %v7480_v33 }
 0x2de   :  { %5305 = vmatprep.subr.bf16.mxu0 %v7488_v27  ;;  %5369 = vmatprep.subr.bf16.mxu1 %v7490_v50 }
 0x2e0   :  { %1642 = vmatmul.mubr.f32.vlgmr.msra.gmra.mrb[4].mxu0 %v7394_v55  ;;  %1713 = vmatmul.mubr.f32.vlgmr.msra.gmra.mrb[4].mxu1 %v7394_v55  ;;  %v1756_v55 = vld [vmem:[#allocation3 + $0x48] sm:$0xff] }
 0x2e1   :  { %5307 = vmatpush1.bf16.msra.mxu0 %v7492_v41  ;;  %5371 = vmatpush1.bf16.msra.mxu1 %v7495_v26  ;;  %v7500_v4 = vpack.c.bf16 %v1760_v29, %v1756_v55  ;;  %v1763_v55 = vld [vmem:[#allocation3 + $0x80] sm:$0xff] }
 0x2e2   :  { %5373 = vmatprep.subr.bf16.mxu1 %v7502_v21  ;;  %v1767_v29 = vld [vmem:[#allocation3 + $0xa0] sm:$0xff]  ;;  %v1862_v21 = vld [vmem:[#allocation3 + $0x398] sm:$0xff] }
 0x2e3   :  { %9037 = vst [vmem:[#allocation23_spill] sm:$0xff] %v7500_v4  ;;  %5309 = vmatprep.subr.bf16.mxu0 %v7500_v4  ;;  %v7516_v23 = vpack.c.bf16 %v1767_v29, %v1763_v55  ;;  %v1775_v55 = vld [vmem:[#allocation3 + $0xe0] sm:$0xff]  ;;  %v7526_v29 = vpack.c.bf16 %v1778_v46, %v1774_v35  ;;  %v1786_v35 = vld [vmem:[#allocation3 + $0x138] sm:$0xff] }
 0x2e4   :  { %v1779_v46 = vld [vmem:[#allocation3 + $0x100] sm:$0xff] }
 0x2e5   :  { %5311 = vmatpush1.bf16.msra.mxu0 %v7504_v24  ;;  %5375 = vmatpush1.bf16.msra.mxu1 %v7507_v20  ;;  %9043 = vst [vmem:[#allocation27_spill] sm:$0xff] %v7516_v23  ;;  %v7524_v20 = vpack.c.bf16 %v1776_v28, %v1772_v53  ;;  %9046 = vst [vmem:[#allocation30_spill] sm:$0xff] %v7526_v29  ;;  %v7528_v24 = vpack.c.bf16 %v1775_v55, %v1771_v56  ;;  %v1784_v53 = vld [vmem:[#allocation3 + $0x128] sm:$0xff]  ;;  %v1782_v28 = vld [vmem:[#allocation3 + $0x118] sm:$0xff] }
 0x2e6   :  { %5313 = vmatprep.subr.bf16.mxu0 %v7512_v47  ;;  %5377 = vmatprep.subr.bf16.mxu1 %v7514_v30  ;;  %v7531_v30 = vpack.c.bf16 %v1777_v16, %v1773_v39  ;;  %v1783_v56 = vld [vmem:[#allocation3 + $0x120] sm:$0xff]  ;;  %v7538_v55 = vpack.c.bf16 %v1786_v35, %v1782_v28  ;;  %v1781_v39 = vld [vmem:[#allocation3 + $0x110] sm:$0xff]  ;;  %v1794_v28 = vld [vmem:[#allocation3 + $0x178] sm:$0xff] }
 0x2e7   :  { %9045 = vst [vmem:[#allocation29_spill] sm:$0xff] %v7524_v20  ;;  %9047 = vst [vmem:[#allocation31_spill] sm:$0xff] %v7528_v24  ;;  %v7540_v47 = vpack.c.bf16 %v1783_v56, %v1779_v46  ;;  %v1785_v16 = vld [vmem:[#allocation3 + $0x130] sm:$0xff]  ;;  %v1787_v35 = vld [vmem:[#allocation3 + $0x140] sm:$0xff] }
 0x2e8   :  { %9048 = vst [vmem:[#allocation32_spill] sm:$0xff] %v7531_v30  ;;  %9050 = vst [vmem:[#allocation34_spill] sm:$0xff] %v7538_v55  ;;  %v1791_v46 = vld [vmem:[#allocation3 + $0x160] sm:$0xff] }
 0x2e9   :  { %5315 = vmatpush1.bf16.msra.mxu0 %v7516_v23  ;;  %5379 = vmatpush1.bf16.msra.mxu1 %v7519_v51  ;;  %v1780_v51 = vld [vmem:[#allocation3 + $0x108] sm:$0xff]  ;;  %9051 = vst [vmem:[#allocation35_spill] sm:$0xff] %v7540_v47 }
 0x2ea   :  { %5317 = vmatprep.subr.bf16.mxu0 %v7524_v20  ;;  %5381 = vmatprep.subr.bf16.mxu1 %v7526_v29  ;;  %v7536_v23 = vpack.c.bf16 %v1784_v53, %v1780_v51  ;;  %v7543_v29 = vpack.c.bf16 %v1785_v16, %v1781_v39  ;;  %v1788_v51 = vld [vmem:[#allocation3 + $0x148] sm:$0xff]  ;;  %v7552_v20 = vpack.c.bf16 %v1791_v46, %v1787_v35  ;;  %v1789_v39 = vld [vmem:[#allocation3 + $0x150] sm:$0xff]  ;;  %v1799_v35 = vld [vmem:[#allocation3 + $0x1a0] sm:$0xff] }
 0x2eb   :  { %v1792_v53 = vld [vmem:[#allocation3 + $0x168] sm:$0xff]  ;;  %v1793_v16 = vld [vmem:[#allocation3 + $0x170] sm:$0xff] }
 0x2ec   :  { %9049 = vst [vmem:[#allocation33_spill] sm:$0xff] %v7536_v23  ;;  %9052 = vst [vmem:[#allocation36_spill] sm:$0xff] %v7543_v29 }
 0x2ed   :  { %5319 = vmatpush1.bf16.msra.mxu0 %v7528_v24  ;;  %5383 = vmatpush1.bf16.msra.mxu1 %v7531_v30  ;;  %v1790_v30 = vld [vmem:[#allocation3 + $0x158] sm:$0xff]  ;;  %v7548_v24 = vpack.c.bf16 %v1792_v53, %v1788_v51  ;;  %9055 = vst [vmem:[#allocation39_spill] sm:$0xff] %v7552_v20  ;;  %v1800_v51 = vld [vmem:[#allocation3 + $0x1a8] sm:$0xff] }
 0x2ee   :  { %5321 = vmatprep.subr.bf16.mxu0 %v7536_v23  ;;  %5385 = vmatprep.subr.bf16.mxu1 %v7538_v55  ;;  %v7550_v56 = vpack.c.bf16 %v1794_v28, %v1790_v30  ;;  %v7555_v55 = vpack.c.bf16 %v1793_v16, %v1789_v39  ;;  %v1798_v53 = vld [vmem:[#allocation3 + $0x198] sm:$0xff]  ;;  %v1795_v28 = vld [vmem:[#allocation3 + $0x180] sm:$0xff]  ;;  %v1797_v39 = vld [vmem:[#allocation3 + $0x190] sm:$0xff] }
 0x2ef   :  { %9053 = vst [vmem:[#allocation37_spill] sm:$0xff] %v7548_v24  ;;  %v1802_v30 = vld [vmem:[#allocation3 + $0x1b8] sm:$0xff]  ;;  %v7564_v23 = vpack.c.bf16 %v1799_v35, %v1795_v28  ;;  %v1801_v16 = vld [vmem:[#allocation3 + $0x1b0] sm:$0xff]  ;;  %v1807_v28 = vld [vmem:[#allocation3 + $0x1e0] sm:$0xff] }
 0x2f0   :  { %9054 = vst [vmem:[#allocation38_spill] sm:$0xff] %v7550_v56  ;;  %9056 = vst [vmem:[#allocation40_spill] sm:$0xff] %v7555_v55  ;;  %v7562_v46 = vpack.c.bf16 %v1802_v30, %v1798_v53  ;;  %v1810_v53 = vld [vmem:[#allocation3 + $0x1f8] sm:$0xff]  ;;  %v1803_v30 = vld [vmem:[#allocation3 + $0x1c0] sm:$0xff] }
 0x2f1   :  { %5323 = vmatpush1.bf16.msra.mxu0 %v7540_v47  ;;  %5387 = vmatpush1.bf16.msra.mxu1 %v7543_v29  ;;  %v1796_v29 = vld [vmem:[#allocation3 + $0x188] sm:$0xff]  ;;  %9059 = vst [vmem:[#allocation43_spill] sm:$0xff] %v7564_v23 }
 0x2f2   :  { %5325 = vmatprep.subr.bf16.mxu0 %v7548_v24  ;;  %5389 = vmatprep.subr.bf16.mxu1 %v7550_v56  ;;  %v7560_v47 = vpack.c.bf16 %v1800_v51, %v1796_v29  ;;  %9058 = vst [vmem:[#allocation42_spill] sm:$0xff] %v7562_v46  ;;  %v7567_v56 = vpack.c.bf16 %v1801_v16, %v1797_v39  ;;  %v1808_v29 = vld [vmem:[#allocation3 + $0x1e8] sm:$0xff]  ;;  %v1806_v51 = vld [vmem:[#allocation3 + $0x1d8] sm:$0xff]  ;;  %v1805_v39 = vld [vmem:[#allocation3 + $0x1d0] sm:$0xff] }
 0x2f3   :  { %v7574_v35 = vpack.c.bf16 %v1810_v53, %v1806_v51  ;;  %v7576_v24 = vpack.c.bf16 %v1807_v28, %v1803_v30  ;;  %v1809_v16 = vld [vmem:[#allocation3 + $0x1f0] sm:$0xff]  ;;  %v1818_v51 = vld [vmem:[#allocation3 + $0x238] sm:$0xff]  ;;  %v1811_v53 = vld [vmem:[#allocation3 + $0x200] sm:$0xff] }
 0x2f4   :  { %9057 = vst [vmem:[#allocation41_spill] sm:$0xff] %v7560_v47  ;;  %9060 = vst [vmem:[#allocation44_spill] sm:$0xff] %v7567_v56  ;;  %v1815_v30 = vld [vmem:[#allocation3 + $0x220] sm:$0xff] }
 0x2f5   :  { %5327 = vmatpush1.bf16.msra.mxu0 %v7552_v20  ;;  %5391 = vmatpush1.bf16.msra.mxu1 %v7555_v55  ;;  %v1804_v55 = vld [vmem:[#allocation3 + $0x1c8] sm:$0xff]  ;;  %9062 = vst [vmem:[#allocation46_spill] sm:$0xff] %v7574_v35  ;;  %9063 = vst [vmem:[#allocation47_spill] sm:$0xff] %v7576_v24 }
 0x2f6   :  { %5329 = vmatprep.subr.bf16.mxu0 %v7560_v47  ;;  %5393 = vmatprep.subr.bf16.mxu1 %v7562_v46  ;;  %v7572_v20 = vpack.c.bf16 %v1808_v29, %v1804_v55  ;;  %v7579_v46 = vpack.c.bf16 %v1809_v16, %v1805_v39  ;;  %v1816_v55 = vld [vmem:[#allocation3 + $0x228] sm:$0xff]  ;;  %v1814_v29 = vld [vmem:[#allocation3 + $0x218] sm:$0xff]  ;;  %v7588_v47 = vpack.c.bf16 %v1815_v30, %v1811_v53  ;;  %v1813_v39 = vld [vmem:[#allocation3 + $0x210] sm:$0xff] }
 0x2f7   :  { %v7586_v28 = vpack.c.bf16 %v1818_v51, %v1814_v29  ;;  %v1817_v16 = vld [vmem:[#allocation3 + $0x230] sm:$0xff]  ;;  %v1826_v29 = vld [vmem:[#allocation3 + $0x278] sm:$0xff]  ;;  %v1819_v51 = vld [vmem:[#allocation3 + $0x240] sm:$0xff] }
 0x2f8   :  { %9061 = vst [vmem:[#allocation45_spill] sm:$0xff] %v7572_v20  ;;  %9064 = vst [vmem:[#allocation48_spill] sm:$0xff] %v7579_v46  ;;  %v1823_v53 = vld [vmem:[#allocation3 + $0x260] sm:$0xff] }
 0x2f9   :  { %5331 = vmatpush1.bf16.msra.mxu0 %v7564_v23  ;;  %5395 = vmatpush1.bf16.msra.mxu1 %v7567_v56  ;;  %v1812_v56 = vld [vmem:[#allocation3 + $0x208] sm:$0xff]  ;;  %9066 = vst [vmem:[#allocation50_spill] sm:$0xff] %v7586_v28  ;;  %9067 = vst [vmem:[#allocation51_spill] sm:$0xff] %v7588_v47 }
 0x2fa   :  { %5333 = vmatprep.subr.bf16.mxu0 %v7572_v20  ;;  %5397 = vmatprep.subr.bf16.mxu1 %v7574_v35  ;;  %v7584_v23 = vpack.c.bf16 %v1816_v55, %v1812_v56  ;;  %v7591_v35 = vpack.c.bf16 %v1817_v16, %v1813_v39  ;;  %v1824_v56 = vld [vmem:[#allocation3 + $0x268] sm:$0xff]  ;;  %v1822_v55 = vld [vmem:[#allocation3 + $0x258] sm:$0xff]  ;;  %v7600_v20 = vpack.c.bf16 %v1823_v53, %v1819_v51  ;;  %v1821_v39 = vld [vmem:[#allocation3 + $0x250] sm:$0xff] }
 0x2fb   :  { %v7598_v30 = vpack.c.bf16 %v1826_v29, %v1822_v55  ;;  %v1825_v16 = vld [vmem:[#allocation3 + $0x270] sm:$0xff]  ;;  %v1834_v55 = vld [vmem:[#allocation3 + $0x2b8] sm:$0xff]  ;;  %v1827_v29 = vld [vmem:[#allocation3 + $0x280] sm:$0xff] }
 0x2fc   :  { %9065 = vst [vmem:[#allocation49_spill] sm:$0xff] %v7584_v23  ;;  %9068 = vst [vmem:[#allocation52_spill] sm:$0xff] %v7591_v35  ;;  %v1831_v51 = vld [vmem:[#allocation3 + $0x2a0] sm:$0xff] }
 0x2fd   :  { %5335 = vmatpush1.bf16.msra.mxu0 %v7576_v24  ;;  %5399 = vmatpush1.bf16.msra.mxu1 %v7579_v46  ;;  %v1820_v46 = vld [vmem:[#allocation3 + $0x248] sm:$0xff]  ;;  %9070 = vst [vmem:[#allocation54_spill] sm:$0xff] %v7598_v30  ;;  %9071 = vst [vmem:[#allocation55_spill] sm:$0xff] %v7600_v20 }
 0x2fe   :  { %5337 = vmatprep.subr.bf16.mxu0 %v7584_v23  ;;  %5401 = vmatprep.subr.bf16.mxu1 %v7586_v28  ;;  %v7596_v24 = vpack.c.bf16 %v1824_v56, %v1820_v46  ;;  %v7603_v28 = vpack.c.bf16 %v1825_v16, %v1821_v39  ;;  %v1832_v46 = vld [vmem:[#allocation3 + $0x2a8] sm:$0xff]  ;;  %v1830_v56 = vld [vmem:[#allocation3 + $0x298] sm:$0xff]  ;;  %v7612_v23 = vpack.c.bf16 %v1831_v51, %v1827_v29  ;;  %v1829_v39 = vld [vmem:[#allocation3 + $0x290] sm:$0xff] }
 0x2ff   :  { %v7610_v53 = vpack.c.bf16 %v1834_v55, %v1830_v56  ;;  %v1833_v16 = vld [vmem:[#allocation3 + $0x2b0] sm:$0xff]  ;;  %v1842_v56 = vld [vmem:[#allocation3 + $0x2f8] sm:$0xff]  ;;  %v1835_v55 = vld [vmem:[#allocation3 + $0x2c0] sm:$0xff] }
 0x300   :  { %9069 = vst [vmem:[#allocation53_spill] sm:$0xff] %v7596_v24  ;;  %9072 = vst [vmem:[#allocation56_spill] sm:$0xff] %v7603_v28  ;;  %v1839_v29 = vld [vmem:[#allocation3 + $0x2e0] sm:$0xff] }
 0x301   :  { %5339 = vmatpush1.bf16.msra.mxu0 %v7588_v47  ;;  %5403 = vmatpush1.bf16.msra.mxu1 %v7591_v35  ;;  %v1828_v35 = vld [vmem:[#allocation3 + $0x288] sm:$0xff]  ;;  %9074 = vst [vmem:[#allocation58_spill] sm:$0xff] %v7610_v53  ;;  %9075 = vst [vmem:[#allocation59_spill] sm:$0xff] %v7612_v23 }
 0x302   :  { %5341 = vmatprep.subr.bf16.mxu0 %v7596_v24  ;;  %5405 = vmatprep.subr.bf16.mxu1 %v7598_v30  ;;  %v7608_v47 = vpack.c.bf16 %v1832_v46, %v1828_v35  ;;  %v7615_v30 = vpack.c.bf16 %v1833_v16, %v1829_v39  ;;  %v1840_v35 = vld [vmem:[#allocation3 + $0x2e8] sm:$0xff]  ;;  %v1838_v46 = vld [vmem:[#allocation3 + $0x2d8] sm:$0xff]  ;;  %v7624_v24 = vpack.c.bf16 %v1839_v29, %v1835_v55  ;;  %v1837_v39 = vld [vmem:[#allocation3 + $0x2d0] sm:$0xff] }
 0x303   :  { %v7622_v51 = vpack.c.bf16 %v1842_v56, %v1838_v46  ;;  %v1841_v16 = vld [vmem:[#allocation3 + $0x2f0] sm:$0xff]  ;;  %v1850_v46 = vld [vmem:[#allocation3 + $0x338] sm:$0xff]  ;;  %v1843_v56 = vld [vmem:[#allocation3 + $0x300] sm:$0xff] }
 0x304   :  { %9073 = vst [vmem:[#allocation57_spill] sm:$0xff] %v7608_v47  ;;  %9076 = vst [vmem:[#allocation60_spill] sm:$0xff] %v7615_v30  ;;  %v1847_v55 = vld [vmem:[#allocation3 + $0x320] sm:$0xff] }
 0x305   :  { %5343 = vmatpush1.bf16.msra.mxu0 %v7600_v20  ;;  %5407 = vmatpush1.bf16.msra.mxu1 %v7603_v28  ;;  %v1836_v28 = vld [vmem:[#allocation3 + $0x2c8] sm:$0xff]  ;;  %9078 = vst [vmem:[#allocation62_spill] sm:$0xff] %v7622_v51  ;;  %9079 = vst [vmem:[#allocation63_spill] sm:$0xff] %v7624_v24 }
 0x306   :  { %5345 = vmatprep.subr.bf16.mxu0 %v7608_v47  ;;  %5409 = vmatprep.subr.bf16.mxu1 %v7610_v53  ;;  %v7620_v20 = vpack.c.bf16 %v1840_v35, %v1836_v28  ;;  %v7627_v53 = vpack.c.bf16 %v1841_v16, %v1837_v39  ;;  %v1848_v28 = vld [vmem:[#allocation3 + $0x328] sm:$0xff]  ;;  %v1846_v35 = vld [vmem:[#allocation3 + $0x318] sm:$0xff]  ;;  %v7636_v47 = vpack.c.bf16 %v1847_v55, %v1843_v56  ;;  %v1845_v39 = vld [vmem:[#allocation3 + $0x310] sm:$0xff] }
 0x307   :  { %v7634_v29 = vpack.c.bf16 %v1850_v46, %v1846_v35  ;;  %v1849_v16 = vld [vmem:[#allocation3 + $0x330] sm:$0xff]  ;;  %v1858_v35 = vld [vmem:[#allocation3 + $0x378] sm:$0xff]  ;;  %v1851_v46 = vld [vmem:[#allocation3 + $0x340] sm:$0xff] }
 0x308   :  { %9077 = vst [vmem:[#allocation61_spill] sm:$0xff] %v7620_v20  ;;  %9080 = vst [vmem:[#allocation64_spill] sm:$0xff] %v7627_v53  ;;  %v1855_v56 = vld [vmem:[#allocation3 + $0x360] sm:$0xff] }
 0x309   :  { %5347 = vmatpush1.bf16.msra.mxu0 %v7612_v23  ;;  %5411 = vmatpush1.bf16.msra.mxu1 %v7615_v30  ;;  %v1844_v30 = vld [vmem:[#allocation3 + $0x308] sm:$0xff]  ;;  %9082 = vst [vmem:[#allocation66_spill] sm:$0xff] %v7634_v29  ;;  %9083 = vst [vmem:[#allocation16_spill] sm:$0xff] %v7636_v47 }
 0x30a   :  { %5349 = vmatprep.subr.bf16.mxu0 %v7620_v20  ;;  %5413 = vmatprep.subr.bf16.mxu1 %v7622_v51  ;;  %v7632_v23 = vpack.c.bf16 %v1848_v28, %v1844_v30  ;;  %v7639_v51 = vpack.c.bf16 %v1849_v16, %v1845_v39  ;;  %v1856_v30 = vld [vmem:[#allocation3 + $0x368] sm:$0xff]  ;;  %v1854_v28 = vld [vmem:[#allocation3 + $0x358] sm:$0xff]  ;;  %v7648_v20 = vpack.c.bf16 %v1855_v56, %v1851_v46  ;;  %v1853_v39 = vld [vmem:[#allocation3 + $0x350] sm:$0xff] }
 0x30b   :  { %v7646_v55 = vpack.c.bf16 %v1858_v35, %v1854_v28  ;;  %v1857_v16 = vld [vmem:[#allocation3 + $0x370] sm:$0xff]  ;;  %v1859_v28 = vld [vmem:[#allocation3 + $0x380] sm:$0xff] }
 0x30c   :  { %9081 = vst [vmem:[#allocation65_spill] sm:$0xff] %v7632_v23  ;;  %9084 = vst [vmem:[#allocation17_spill] sm:$0xff] %v7639_v51  ;;  %v1863_v35 = vld [vmem:[#allocation3 + $0x3a0] sm:$0xff] }
 0x30d   :  { %5351 = vmatpush1.bf16.msra.mxu0 %v7624_v24  ;;  %5415 = vmatpush1.bf16.msra.mxu1 %v7627_v53  ;;  %v1852_v53 = vld [vmem:[#allocation3 + $0x348] sm:$0xff]  ;;  %9086 = vst [vmem:[#allocation67_spill] sm:$0xff] %v7646_v55  ;;  %9087 = vst [vmem:[#allocation68_spill] sm:$0xff] %v7648_v20  ;;  %v7660_v56 = vpack.c.bf16 %v1863_v35, %v1859_v28  ;;  %v1869_v28 = vld [vmem:[#allocation3 + $0x3d0] sm:$0xff] }
 0x30e   :  { %5353 = vmatprep.subr.bf16.mxu0 %v7632_v23  ;;  %5417 = vmatprep.subr.bf16.mxu1 %v7634_v29  ;;  %v7644_v24 = vpack.c.bf16 %v1856_v30, %v1852_v53  ;;  %v7651_v29 = vpack.c.bf16 %v1857_v16, %v1853_v39  ;;  %v1864_v23 = vld [vmem:[#allocation3 + $0x3a8] sm:$0xff]  ;;  %v1866_v30 = vld [vmem:[#allocation3 + $0x3b8] sm:$0xff]  ;;  %v1861_v39 = vld [vmem:[#allocation3 + $0x390] sm:$0xff] }
 0x30f   :  { %v7658_v46 = vpack.c.bf16 %v1866_v30, %v1862_v21  ;;  %v1865_v16 = vld [vmem:[#allocation3 + $0x3b0] sm:$0xff]  ;;  %v1867_v21 = vld [vmem:[#allocation3 + $0x3c0] sm:$0xff] }
 0x310   :  { %9085 = vst [vmem:[#allocation18_spill] sm:$0xff] %v7644_v24  ;;  %9088 = vst [vmem:[#allocation69_spill] sm:$0xff] %v7651_v29  ;;  %v1871_v30 = vld [vmem:[#allocation3 + $0x3e0] sm:$0xff] }
 0x311   :  { %5355 = vmatpush1.bf16.msra.mxu0 %v7636_v47  ;;  %5419 = vmatpush1.bf16.msra.mxu1 %v7639_v51  ;;  %v1860_v47 = vld [vmem:[#allocation3 + $0x388] sm:$0xff]  ;;  %v7663_v51 = vpack.c.bf16 %v1865_v16, %v1861_v39  ;;  %v7671_v35 = vpack.c.bf16 %v1871_v30, %v1867_v21 }
 0x312   :  { %5357 = vmatprep.subr.bf16.mxu0 %v7644_v24  ;;  %5421 = vmatprep.subr.bf16.mxu1 %v7646_v55  ;;  %v7655_v53 = vpack.c.bf16 %v1864_v23, %v1860_v47  ;;  %v1868_v24 = vld [vmem:[#allocation3 + $0x3c8] sm:$0xff]  ;;  %v1874_v47 = vld [vmem:[#allocation3 + $0x3f8] sm:$0xff] }
 0x313   :  { %v1872_v55 = vld [vmem:[#allocation3 + $0x3e8] sm:$0xff]  ;;  %9091 = vst [vmem:[#allocation72_spill] sm:$0xff] %v7671_v35 }
 0x314   :  { %v7666_v23 = vpack.c.bf16 %v1872_v55, %v1868_v24 }
 0x315   :  { %5359 = vmatpush1.bf16.msra.mxu0 %v7648_v20  ;;  %5423 = vmatpush1.bf16.msra.mxu1 %v7651_v29  ;;  %v1870_v20 = vld [vmem:[#allocation3 + $0x3d8] sm:$0xff]  ;;  %v1873_v29 = vld [vmem:[#allocation3 + $0x3f0] sm:$0xff] }
 0x316   :  { %5361 = vmatprep.subr.bf16.mxu0 %v7655_v53  ;;  %5425 = vmatprep.subr.bf16.mxu1 %v7658_v46  ;;  %9089 = vst [vmem:[#allocation70_spill] sm:$0xff] %v7666_v23  ;;  %v7668_v4 = vpack.c.bf16 %v1874_v47, %v1870_v20  ;;  %v7675_v39 = vpack.c.bf16 %v1873_v29, %v1869_v28 }
 0x318   :  { %9090 = vst [vmem:[#allocation71_spill] sm:$0xff] %v7668_v4  ;;  %9092 = vst [vmem:[#allocation73_spill] sm:$0xff] %v7675_v39 }
 0x319   :  { %5363 = vmatpush1.bf16.msra.mxu0 %v7660_v56  ;;  %5427 = vmatpush1.bf16.msra.mxu1 %v7663_v51 }
 0x31a   :  { %5365 = vmatprep.subr.bf16.mxu0 %v7666_v23  ;;  %5429 = vmatprep.subr.bf16.mxu1 %v7668_v4 }
 0x31d   :  { %5367 = vmatpush1.bf16.msra.mxu0 %v7671_v35  ;;  %5431 = vmatpush1.bf16.msra.mxu1 %v7675_v39 }
 0x31e   :  { %5433 = vmatprep.subr.bf16.mxu0 %v7347_v9  ;;  %5465 = vmatprep.subr.bf16.mxu1 %v7349_v19 }
 0x393   :  { %v1405_v24 = vpop.f32.mrb[18].mxu0  ;;  %v1476_v20 = vpop.f32.mrb[18].mxu1 }
 0x394   :  { %v1406_v55 = vadd.f32 %v1405_v24, %v7358_v58  ;;  %v1407_v16 = vpop.f32.mrb[19].mxu0  ;;  %v1478_v47 = vpop.f32.mrb[19].mxu1  ;;  %v1477_v28 = vadd.f32 %v1476_v20, %v7368_v6 }
 0x395   :  { %v1408_v21 = vadd.f32 %v1407_v16, %v7362_v31  ;;  %v1479_v39 = vadd.f32 %v1478_v47, %v7372_v44 }
 0x396   :  { %v4745_v29 = vmul.f32 -1.442695, %v1406_v55  ;;  %v4747_v35 = vmul.f32 -1.442695, %v1477_v28 }
 0x397   :  { %v4746_v30 = vmul.f32 -1.442695, %v1408_v21 }
 0x398   :  { %6512 = vpow2.f32 %v4745_v29 }
 0x399   :  { %6514 = vpow2.f32 %v4746_v30 }
 0x39a   :  { %6516 = vtanh.f32 %v1479_v39 }
 0x39b   :  { %6518 = vpow2.f32 %v4747_v35 }
 0x3a2   :  { %v6513_v9 = vpop.eup %6512 }
 0x3a3   :  { %v1490_v4 = vadd.f32 1.0, %v6513_v9  ;;  %v6515_v19 = vpop.eup %6514 }
 0x3a4   :  { %v1491_v24 = vadd.f32 1.0, %v6515_v19  ;;  %v6517_v58 = vpop.eup %6516 }
 0x3a5   :  { %6520 = vrcp.f32 %v1490_v4  ;;  %v6519_v23 = vpop.eup %6518 }
 0x3a6   :  { %6522 = vrcp.f32 %v1491_v24  ;;  %v1492_v29 = vadd.f32 1.0, %v6519_v23 }
 0x3a8   :  { %6524 = vrcp.f32 %v1492_v29 }
 0x3af   :  { %v6521_v16 = vpop.eup %6520 }
 0x3b0   :  { %v1501_v55 = vmul.f32 %v6521_v16, %v6517_v58  ;;  %v6523_v21 = vpop.eup %6522 }
 0x3b1   :  { %v1500_v30 = vmul.f32 %v6523_v21, %v7376_v54 }
 0x3b2   :  { %v6525_v23 = vpop.eup %6524 }
 0x3b3   :  { %v1643_v20 = vpop.f32.mrb[4].mxu0  ;;  %v1714_v6 = vpop.f32.mrb[4].mxu1  ;;  %v7687_v47 = vadd.f32 %v1501_v55, %v1500_v30 }
 0x3b4   :  { %v6396_v28 = vadd.f32 %v1643_v20, %v9035_v63  ;;  %v1645_v39 = vpop.f32.mrb[5].mxu0  ;;  %v1716_v9 = vpop.f32.mrb[5].mxu1  ;;  %v6412_v58 = vadd.f32 %v1714_v6, %v6904_v12 }
 0x3b5   :  { %v6397_v4 = vadd.f32 %v1645_v39, %v9036_v34  ;;  %6526 = vtanh.f32 %v7687_v47  ;;  %v6413_v54 = vadd.f32 %v1716_v9, %v6908_v13 }
 0x3b6   :  { %v4749_v35 = vmul.f32 -1.442695, %v6396_v28  ;;  %v4751_v16 = vmul.f32 -1.442695, %v6412_v58 }
 0x3b7   :  { %v4750_v19 = vmul.f32 -1.442695, %v6397_v4 }
 0x3b8   :  { %6528 = vpow2.f32 %v4749_v35 }
 0x3b9   :  { %6530 = vpow2.f32 %v4750_v19 }
 0x3ba   :  { %6532 = vtanh.f32 %v6413_v54 }
 0x3bf   :  { %v6527_v24 = vpop.eup %6526 }
 0x3c0   :  { %v1504_v55 = vmul.f32 %v6527_v24, %v6525_v23 }
 0x3c2   :  { %v6529_v21 = vpop.eup %6528  ;;  %6534 = vtanh.f32 %v1504_v55  ;;  %1939 = vmatprep.mubr.f32.mxu0 %v1504_v55  ;;  %2010 = vmatprep.mubr.f32.mxu1 %v1504_v55  ;;  %v9128_v55 = vld [vmem:[#allocation56_spill] sm:$0xff] }
 0x3c3   :  { %v1732_v30 = vadd.f32 1.0, %v6529_v21  ;;  %v6531_v29 = vpop.eup %6530  ;;  %6536 = vpow2.f32 %v4751_v16  ;;  %v9129_v21 = vld [vmem:[#allocation57_spill] sm:$0xff] }
 0x3c4   :  { %v1733_v20 = vadd.f32 1.0, %v6531_v29  ;;  %v6533_v28 = vpop.eup %6532  ;;  %v9131_v29 = vld [vmem:[#allocation59_spill] sm:$0xff] }
 0x3c5   :  { %6538 = vrcp.f32 %v1732_v30  ;;  %v9130_v30 = vld [vmem:[#allocation58_spill] sm:$0xff] }
 0x3c6   :  { %6540 = vrcp.f32 %v1733_v20  ;;  %v9132_v20 = vld [vmem:[#allocation60_spill] sm:$0xff] }
 0x3cc   :  { %v6535_v39 = vpop.eup %6534 }
 0x3cd   :  { %v6537_v6 = vpop.eup %6536  ;;  %4748 = vst [vmem:[%s8691_s6 + $0x8] sm:$0xff] %v6535_v39  ;;  %v9134_v39 = vld [vmem:[#allocation62_spill] sm:$0xff] }
 0x3ce   :  { %v1734_v19 = vadd.f32 1.0, %v6537_v6  ;;  %v9135_v6 = vld [vmem:[#allocation63_spill] sm:$0xff] }
 0x3cf   :  { %v6539_v9 = vpop.eup %6538 }
 0x3d0   :  { %v1743_v4 = vmul.f32 %v6539_v9, %v6533_v28  ;;  %v6541_v35 = vpop.eup %6540  ;;  %6542 = vrcp.f32 %v1734_v19  ;;  %v9133_v28 = vld [vmem:[#allocation61_spill] sm:$0xff]  ;;  %v9136_v9 = vld [vmem:[#allocation64_spill] sm:$0xff] }
 0x3d1   :  { %v1742_v58 = vmul.f32 %v6541_v35, %v7387_v17  ;;  %v9093_v17 = vld [vmem:[#allocation23_spill] sm:$0xff]  ;;  %v9138_v35 = vld [vmem:[#allocation66_spill] sm:$0xff]  ;;  %v9139_v19 = vld [vmem:[#allocation16_spill] sm:$0xff] }
 0x3d3   :  { %v7698_v54 = vadd.f32 %v1743_v4, %v1742_v58  ;;  %v9137_v4 = vld [vmem:[#allocation65_spill] sm:$0xff] }
 0x3d4   :  { %v9140_v58 = vld [vmem:[#allocation17_spill] sm:$0xff] }
 0x3d5   :  { %6544 = vtanh.f32 %v7698_v54 }
 0x3da   :  { %v6543_v23 = vpop.eup %6542 }
 0x3df   :  { %v6545_v24 = vpop.eup %6544 }
 0x3e0   :  { %v1746_v16 = vmul.f32 %v6545_v24, %v6543_v23  ;;  %v9141_v23 = vld [vmem:[#allocation18_spill] sm:$0xff]  ;;  %v9142_v24 = vld [vmem:[#allocation67_spill] sm:$0xff] }
 0x3e2   :  { %1940 = vmatmul.mubr.f32.vlgmr.msra.gmra.mrb[20].mxu0 %v1746_v16  ;;  %2011 = vmatmul.mubr.f32.vlgmr.msra.gmra.mrb[20].mxu1 %v1746_v16 }
 0x3e3   :  { %5435 = vmatpush1.bf16.msra.mxu0 %v7390_v49  ;;  %5467 = vmatpush1.bf16.msra.mxu1 %v7392_v52  ;;  %v9094_v49 = vld [vmem:[#allocation21_spill] sm:$0xff] }
 0x3e4   :  { %5437 = vmatprep.subr.bf16.mxu0 %v7396_v59  ;;  %5469 = vmatprep.subr.bf16.mxu1 %v7398_v62  ;;  %v9095_v52 = vld [vmem:[#allocation25_spill] sm:$0xff]  ;;  %v9096_v59 = vld [vmem:[#allocation22_spill] sm:$0xff] }
 0x3e5   :  { %2177 = vmatprep.mubr.f32.mxu0 %v8979_v43  ;;  %2248 = vmatprep.mubr.f32.mxu1 %v8979_v43  ;;  %v9097_v62 = vld [vmem:[#allocation26_spill] sm:$0xff] }
 0x3e7   :  { %5439 = vmatpush1.bf16.msra.mxu0 %v7404_v38  ;;  %5471 = vmatpush1.bf16.msra.mxu1 %v7406_v45  ;;  %v9098_v38 = vld [vmem:[#allocation24_spill] sm:$0xff]  ;;  %v9099_v45 = vld [vmem:[#allocation27_spill] sm:$0xff] }
 0x3e8   :  { %5441 = vmatprep.subr.bf16.mxu0 %v7410_v0  ;;  %5473 = vmatprep.subr.bf16.mxu1 %v7412_v14  ;;  %v9100_v0 = vld [vmem:[#allocation28_spill] sm:$0xff]  ;;  %v9101_v14 = vld [vmem:[#allocation29_spill] sm:$0xff] }
 0x3eb   :  { %5443 = vmatpush1.bf16.msra.mxu0 %v7418_v25  ;;  %5475 = vmatpush1.bf16.msra.mxu1 %v7420_v48  ;;  %v9102_v25 = vld [vmem:[#allocation30_spill] sm:$0xff]  ;;  %v9103_v48 = vld [vmem:[#allocation31_spill] sm:$0xff] }
 0x3ec   :  { %5445 = vmatprep.subr.bf16.mxu0 %v7424_v57  ;;  %5477 = vmatprep.subr.bf16.mxu1 %v7426_v7  ;;  %v9104_v57 = vld [vmem:[#allocation32_spill] sm:$0xff]  ;;  %v9105_v7 = vld [vmem:[#allocation33_spill] sm:$0xff] }
 0x3ef   :  { %5447 = vmatpush1.bf16.msra.mxu0 %v7430_v2  ;;  %5479 = vmatpush1.bf16.msra.mxu1 %v7432_v1  ;;  %v9106_v2 = vld [vmem:[#allocation34_spill] sm:$0xff]  ;;  %v9107_v1 = vld [vmem:[#allocation35_spill] sm:$0xff] }
 0x3f0   :  { %5449 = vmatprep.subr.bf16.mxu0 %v7436_v10  ;;  %5481 = vmatprep.subr.bf16.mxu1 %v7438_v11  ;;  %v9108_v10 = vld [vmem:[#allocation36_spill] sm:$0xff]  ;;  %v9109_v11 = vld [vmem:[#allocation37_spill] sm:$0xff] }
 0x3f3   :  { %5451 = vmatpush1.bf16.msra.mxu0 %v7442_v37  ;;  %5483 = vmatpush1.bf16.msra.mxu1 %v7444_v40  ;;  %v9110_v37 = vld [vmem:[#allocation38_spill] sm:$0xff]  ;;  %v9111_v40 = vld [vmem:[#allocation39_spill] sm:$0xff] }
 0x3f4   :  { %5453 = vmatprep.subr.bf16.mxu0 %v7448_v8  ;;  %5485 = vmatprep.subr.bf16.mxu1 %v7450_v18  ;;  %v9112_v8 = vld [vmem:[#allocation40_spill] sm:$0xff]  ;;  %v9113_v18 = vld [vmem:[#allocation41_spill] sm:$0xff] }
 0x3f7   :  { %5455 = vmatpush1.bf16.msra.mxu0 %v7454_v22  ;;  %5487 = vmatpush1.bf16.msra.mxu1 %v7456_v36  ;;  %v9114_v22 = vld [vmem:[#allocation42_spill] sm:$0xff]  ;;  %v9115_v36 = vld [vmem:[#allocation43_spill] sm:$0xff] }
 0x3f8   :  { %5457 = vmatprep.subr.bf16.mxu0 %v7460_v60  ;;  %5489 = vmatprep.subr.bf16.mxu1 %v7462_v61  ;;  %v9116_v60 = vld [vmem:[#allocation44_spill] sm:$0xff]  ;;  %v9117_v61 = vld [vmem:[#allocation45_spill] sm:$0xff] }
 0x3fb   :  { %5459 = vmatpush1.bf16.msra.mxu0 %v7466_v5  ;;  %5491 = vmatpush1.bf16.msra.mxu1 %v7468_v3  ;;  %v9118_v5 = vld [vmem:[#allocation46_spill] sm:$0xff]  ;;  %v9119_v3 = vld [vmem:[#allocation47_spill] sm:$0xff] }
 0x3fc   :  { %5461 = vmatprep.subr.bf16.mxu0 %v7472_v42  ;;  %5493 = vmatprep.subr.bf16.mxu1 %v7474_v15  ;;  %v9120_v42 = vld [vmem:[#allocation48_spill] sm:$0xff]  ;;  %v9121_v15 = vld [vmem:[#allocation49_spill] sm:$0xff] }
 0x3ff   :  { %5463 = vmatpush1.bf16.msra.mxu0 %v7478_v32  ;;  %5495 = vmatpush1.bf16.msra.mxu1 %v7480_v33  ;;  %v9122_v32 = vld [vmem:[#allocation50_spill] sm:$0xff]  ;;  %v9123_v33 = vld [vmem:[#allocation51_spill] sm:$0xff] }
 0x400   :  { %5497 = vmatprep.subr.bf16.mxu0 %v7488_v27  ;;  %5561 = vmatprep.subr.bf16.mxu1 %v7490_v50  ;;  %v9124_v27 = vld [vmem:[#allocation52_spill] sm:$0xff]  ;;  %v9125_v50 = vld [vmem:[#allocation53_spill] sm:$0xff] }
 0x402   :  { %2178 = vmatmul.mubr.f32.vlgmr.msra.gmra.mrb[6].mxu0 %v1746_v16  ;;  %2249 = vmatmul.mubr.f32.vlgmr.msra.gmra.mrb[6].mxu1 %v1746_v16  ;;  %v9143_v16 = vld [vmem:[#allocation68_spill] sm:$0xff] }
 0x403   :  { %5499 = vmatpush1.bf16.msra.mxu0 %v7492_v41  ;;  %5563 = vmatpush1.bf16.msra.mxu1 %v7495_v26  ;;  %v9126_v41 = vld [vmem:[#allocation54_spill] sm:$0xff]  ;;  %v9127_v26 = vld [vmem:[#allocation55_spill] sm:$0xff] }
 0x404   :  { %5501 = vmatprep.subr.bf16.mxu0 %v9093_v17  ;;  %5565 = vmatprep.subr.bf16.mxu1 %v9094_v49  ;;  %v9144_v17 = vld [vmem:[#allocation69_spill] sm:$0xff]  ;;  %v9145_v49 = vld [vmem:[#allocation70_spill] sm:$0xff] }
 0x407   :  { %5503 = vmatpush1.bf16.msra.mxu0 %v9095_v52  ;;  %5567 = vmatpush1.bf16.msra.mxu1 %v9096_v59  ;;  %v9146_v52 = vld [vmem:[#allocation71_spill] sm:$0xff]  ;;  %v9147_v59 = vld [vmem:[#allocation72_spill] sm:$0xff] }
 0x408   :  { %5505 = vmatprep.subr.bf16.mxu0 %v9097_v62  ;;  %5569 = vmatprep.subr.bf16.mxu1 %v9098_v38  ;;  %v9148_v62 = vld [vmem:[#allocation73_spill] sm:$0xff] }
 0x409   :  { %v2586_v38 = vld [vmem:[#allocation7 + $0x8] sm:$0xff] }
 0x40b   :  { %5507 = vmatpush1.bf16.msra.mxu0 %v9099_v45  ;;  %5571 = vmatpush1.bf16.msra.mxu1 %v9100_v0  ;;  %v2590_v45 = vld [vmem:[#allocation7 + $0x28] sm:$0xff]  ;;  %v2588_v0 = vld [vmem:[#allocation7 + $0x18] sm:$0xff] }
 0x40c   :  { %5509 = vmatprep.subr.bf16.mxu0 %v9101_v14  ;;  %5573 = vmatprep.subr.bf16.mxu1 %v9102_v25  ;;  %v7797_v14 = vpack.c.bf16 %v2590_v45, %v2586_v38 }
 0x40f   :  { %5511 = vmatpush1.bf16.msra.mxu0 %v9103_v48  ;;  %5575 = vmatpush1.bf16.msra.mxu1 %v9104_v57 }
 0x410   :  { %5513 = vmatprep.subr.bf16.mxu0 %v9105_v7  ;;  %5577 = vmatprep.subr.bf16.mxu1 %v9106_v2 }
 0x413   :  { %5515 = vmatpush1.bf16.msra.mxu0 %v9107_v1  ;;  %5579 = vmatpush1.bf16.msra.mxu1 %v9108_v10 }
 0x414   :  { %5517 = vmatprep.subr.bf16.mxu0 %v9109_v11  ;;  %5581 = vmatprep.subr.bf16.mxu1 %v9110_v37  ;;  %v9150_v11 = vld [vmem:[#allocation20_spill] sm:$0xff] }
 0x417   :  { %5519 = vmatpush1.bf16.msra.mxu0 %v9111_v40  ;;  %5583 = vmatpush1.bf16.msra.mxu1 %v9112_v8 }
 0x418   :  { %5521 = vmatprep.subr.bf16.mxu0 %v9113_v18  ;;  %5585 = vmatprep.subr.bf16.mxu1 %v9114_v22 }
 0x41b   :  { %5523 = vmatpush1.bf16.msra.mxu0 %v9115_v36  ;;  %5587 = vmatpush1.bf16.msra.mxu1 %v9116_v60 }
 0x41c   :  { %5525 = vmatprep.subr.bf16.mxu0 %v9117_v61  ;;  %5589 = vmatprep.subr.bf16.mxu1 %v9118_v5 }
 0x41f   :  { %5527 = vmatpush1.bf16.msra.mxu0 %v9119_v3  ;;  %5591 = vmatpush1.bf16.msra.mxu1 %v9120_v42 }
 0x420   :  { %5529 = vmatprep.subr.bf16.mxu0 %v9121_v15  ;;  %5593 = vmatprep.subr.bf16.mxu1 %v9122_v32 }
 0x423   :  { %5531 = vmatpush1.bf16.msra.mxu0 %v9123_v33  ;;  %5595 = vmatpush1.bf16.msra.mxu1 %v9124_v27 }
 0x424   :  { %5533 = vmatprep.subr.bf16.mxu0 %v9125_v50  ;;  %5597 = vmatprep.subr.bf16.mxu1 %v9126_v41 }
 0x427   :  { %5535 = vmatpush1.bf16.msra.mxu0 %v9127_v26  ;;  %5599 = vmatpush1.bf16.msra.mxu1 %v9128_v55 }
 0x428   :  { %5537 = vmatprep.subr.bf16.mxu0 %v9129_v21  ;;  %5601 = vmatprep.subr.bf16.mxu1 %v9130_v30 }
 0x42b   :  { %5539 = vmatpush1.bf16.msra.mxu0 %v9131_v29  ;;  %5603 = vmatpush1.bf16.msra.mxu1 %v9132_v20 }
 0x42c   :  { %5541 = vmatprep.subr.bf16.mxu0 %v9133_v28  ;;  %5605 = vmatprep.subr.bf16.mxu1 %v9134_v39 }
 0x42f   :  { %5543 = vmatpush1.bf16.msra.mxu0 %v9135_v6  ;;  %5607 = vmatpush1.bf16.msra.mxu1 %v9136_v9 }
 0x430   :  { %5545 = vmatprep.subr.bf16.mxu0 %v9137_v4  ;;  %5609 = vmatprep.subr.bf16.mxu1 %v9138_v35 }
 0x433   :  { %5547 = vmatpush1.bf16.msra.mxu0 %v9139_v19  ;;  %5611 = vmatpush1.bf16.msra.mxu1 %v9140_v58 }
 0x434   :  { %5549 = vmatprep.subr.bf16.mxu0 %v9141_v23  ;;  %5613 = vmatprep.subr.bf16.mxu1 %v9142_v24 }
 0x437   :  { %5551 = vmatpush1.bf16.msra.mxu0 %v9143_v16  ;;  %5615 = vmatpush1.bf16.msra.mxu1 %v9144_v17 }
 0x438   :  { %5553 = vmatprep.subr.bf16.mxu0 %v7655_v53  ;;  %5617 = vmatprep.subr.bf16.mxu1 %v7658_v46  ;;  %v2592_v53 = vld [vmem:[#allocation7 + $0x38] sm:$0xff] }
 0x439   :  { %v7799_v25 = vpack.c.bf16 %v2592_v53, %v2588_v0  ;;  %v2585_v0 = vld [vmem:[#allocation7] sm:$0xff] }
 0x43a   :  { %v2589_v53 = vld [vmem:[#allocation7 + $0x20] sm:$0xff] }
 0x43b   :  { %5555 = vmatpush1.bf16.msra.mxu0 %v7660_v56  ;;  %5619 = vmatpush1.bf16.msra.mxu1 %v7663_v51  ;;  %v9149_v56 = vld [vmem:[#allocation19_spill] sm:$0xff] }
 0x43c   :  { %5557 = vmatprep.subr.bf16.mxu0 %v9145_v49  ;;  %5621 = vmatprep.subr.bf16.mxu1 %v9146_v52 }
 0x43f   :  { %5559 = vmatpush1.bf16.msra.mxu0 %v9147_v59  ;;  %5623 = vmatpush1.bf16.msra.mxu1 %v9148_v62 }
 0x440   :  { %5625 = vmatprep.subr.bf16.mxu0 %v7797_v14  ;;  %5657 = vmatprep.subr.bf16.mxu1 %v7799_v25 }
 0x4b5   :  { %v1941_v51 = vpop.f32.mrb[20].mxu0  ;;  %v2012_v46 = vpop.f32.mrb[20].mxu1 }
 0x4b6   :  { %v1942_v48 = vadd.f32 %v1941_v51, %v9149_v56  ;;  %v1943_v57 = vpop.f32.mrb[21].mxu0  ;;  %v2014_v7 = vpop.f32.mrb[21].mxu1  ;;  %v2013_v37 = vadd.f32 %v2012_v46, %v9150_v11  ;;  %v2587_v51 = vld [vmem:[#allocation7 + $0x10] sm:$0xff] }
 0x4b7   :  { %v1944_v2 = vadd.f32 %v1943_v57, %v7362_v31  ;;  %v2015_v40 = vadd.f32 %v2014_v7, %v7372_v44  ;;  %v2591_v46 = vld [vmem:[#allocation7 + $0x30] sm:$0xff]  ;;  %v2598_v57 = vld [vmem:[#allocation7 + $0x68] sm:$0xff]  ;;  %v2596_v7 = vld [vmem:[#allocation7 + $0x58] sm:$0xff] }
 0x4b8   :  { %v4752_v1 = vmul.f32 -1.442695, %v1942_v48  ;;  %v4754_v8 = vmul.f32 -1.442695, %v2013_v37  ;;  %v2594_v48 = vld [vmem:[#allocation7 + $0x48] sm:$0xff]  ;;  %v7822_v37 = vpack.c.bf16 %v2589_v53, %v2585_v0 }
 0x4b9   :  { %v4753_v10 = vmul.f32 -1.442695, %v1944_v2  ;;  %v2600_v2 = vld [vmem:[#allocation7 + $0x78] sm:$0xff] }
 0x4ba   :  { %6546 = vpow2.f32 %v4752_v1 }
 0x4bb   :  { %6548 = vpow2.f32 %v4753_v10 }
 0x4bc   :  { %6550 = vtanh.f32 %v2015_v40  ;;  %v7824_v40 = vpack.c.bf16 %v2591_v46, %v2587_v51  ;;  %v2619_v51 = vld [vmem:[#allocation7 + $0x110] sm:$0xff] }
 0x4bd   :  { %6552 = vpow2.f32 %v4754_v8  ;;  %v2597_v8 = vld [vmem:[#allocation7 + $0x60] sm:$0xff]  ;;  %v2623_v46 = vld [vmem:[#allocation7 + $0x130] sm:$0xff] }
 0x4c4   :  { %v6547_v18 = vpop.eup %6546 }
 0x4c5   :  { %v2026_v22 = vadd.f32 1.0, %v6547_v18  ;;  %v6549_v36 = vpop.eup %6548 }
 0x4c6   :  { %v2027_v60 = vadd.f32 1.0, %v6549_v36  ;;  %v6551_v61 = vpop.eup %6550  ;;  %v7830_v36 = vpack.c.bf16 %v2600_v2, %v2596_v7  ;;  %v2628_v7 = vld [vmem:[#allocation7 + $0x158] sm:$0xff] }
 0x4c7   :  { %6554 = vrcp.f32 %v2026_v22  ;;  %v6553_v5 = vpop.eup %6552  ;;  %v7828_v22 = vpack.c.bf16 %v2598_v57, %v2594_v48  ;;  %v2626_v48 = vld [vmem:[#allocation7 + $0x148] sm:$0xff]  ;;  %v2632_v2 = vld [vmem:[#allocation7 + $0x178] sm:$0xff] }
 0x4c8   :  { %6556 = vrcp.f32 %v2027_v60  ;;  %v2028_v32 = vadd.f32 1.0, %v6553_v5  ;;  %v2595_v60 = vld [vmem:[#allocation7 + $0x50] sm:$0xff]  ;;  %v2602_v5 = vld [vmem:[#allocation7 + $0x88] sm:$0xff] }
 0x4c9   :  { %v2630_v57 = vld [vmem:[#allocation7 + $0x168] sm:$0xff] }
 0x4ca   :  { %6558 = vrcp.f32 %v2028_v32 }
 0x4d1   :  { %v6555_v3 = vpop.eup %6554 }
 0x4d2   :  { %v2037_v42 = vmul.f32 %v6555_v3, %v6551_v61  ;;  %v6557_v15 = vpop.eup %6556  ;;  %v2599_v61 = vld [vmem:[#allocation7 + $0x70] sm:$0xff]  ;;  %v2606_v3 = vld [vmem:[#allocation7 + $0xa8] sm:$0xff] }
 0x4d3   :  { %v2036_v33 = vmul.f32 %v6557_v15, %v7687_v47  ;;  %v2608_v15 = vld [vmem:[#allocation7 + $0xb8] sm:$0xff] }
 0x4d4   :  { %v6559_v39 = vpop.eup %6558 }
 0x4d5   :  { %v2179_v27 = vpop.f32.mrb[6].mxu0  ;;  %v2250_v50 = vpop.f32.mrb[6].mxu1  ;;  %v7808_v41 = vadd.f32 %v2037_v42, %v2036_v33  ;;  %v2604_v42 = vld [vmem:[#allocation7 + $0x98] sm:$0xff]  ;;  %v7838_v33 = vpack.c.bf16 %v2599_v61, %v2595_v60  ;;  %v7880_v60 = vpack.c.bf16 %v2630_v57, %v2626_v48  ;;  %v7882_v61 = vpack.c.bf16 %v2632_v2, %v2628_v7  ;;  %v2643_v48 = vld [vmem:[#allocation7 + $0x1d0] sm:$0xff] }
 0x4d6   :  { %v6398_v26 = vadd.f32 %v2179_v27, %v9035_v63  ;;  %v2181_v55 = vpop.f32.mrb[7].mxu0  ;;  %v2252_v21 = vpop.f32.mrb[7].mxu1  ;;  %v6414_v28 = vadd.f32 %v2250_v50, %v6904_v12  ;;  %v2601_v27 = vld [vmem:[#allocation7 + $0x80] sm:$0xff]  ;;  %v2647_v57 = vld [vmem:[#allocation7 + $0x1f0] sm:$0xff] }
 0x4d7   :  { %v6399_v30 = vadd.f32 %v2181_v55, %v9036_v34  ;;  %6560 = vtanh.f32 %v7808_v41  ;;  %v6415_v47 = vadd.f32 %v2252_v21, %v6908_v13  ;;  %v2605_v50 = vld [vmem:[#allocation7 + $0xa0] sm:$0xff]  ;;  %v7844_v55 = vpack.c.bf16 %v2608_v15, %v2604_v42  ;;  %v2603_v21 = vld [vmem:[#allocation7 + $0x90] sm:$0xff]  ;;  %v2634_v42 = vld [vmem:[#allocation7 + $0x188] sm:$0xff] }
 0x4d8   :  { %v4756_v29 = vmul.f32 -1.442695, %v6398_v26  ;;  %v4758_v9 = vmul.f32 -1.442695, %v6414_v28  ;;  %v7842_v26 = vpack.c.bf16 %v2606_v3, %v2602_v5  ;;  %v2612_v28 = vld [vmem:[#allocation7 + $0xd8] sm:$0xff]  ;;  %v2627_v5 = vld [vmem:[#allocation7 + $0x150] sm:$0xff]  ;;  %v7912_v2 = vpack.c.bf16 %v2647_v57, %v2643_v48 }
 0x4d9   :  { %v4757_v20 = vmul.f32 -1.442695, %v6399_v30  ;;  %v2607_v30 = vld [vmem:[#allocation7 + $0xb0] sm:$0xff]  ;;  %v2638_v15 = vld [vmem:[#allocation7 + $0x1a8] sm:$0xff] }
 0x4da   :  { %6562 = vpow2.f32 %v4756_v29  ;;  %v2610_v29 = vld [vmem:[#allocation7 + $0xc8] sm:$0xff]  ;;  %v2631_v3 = vld [vmem:[#allocation7 + $0x170] sm:$0xff] }
 0x4db   :  { %6564 = vpow2.f32 %v4757_v20  ;;  %v2614_v20 = vld [vmem:[#allocation7 + $0xe8] sm:$0xff] }
 0x4dc   :  { %6566 = vtanh.f32 %v6415_v47  ;;  %v2616_v47 = vld [vmem:[#allocation7 + $0xf8] sm:$0xff] }
 0x4e1   :  { %v6561_v6 = vpop.eup %6560 }
 0x4e2   :  { %v2040_v4 = vmul.f32 %v6561_v6, %v6559_v39  ;;  %v7850_v39 = vpack.c.bf16 %v2605_v50, %v2601_v27  ;;  %v7852_v6 = vpack.c.bf16 %v2607_v30, %v2603_v21  ;;  %v2636_v27 = vld [vmem:[#allocation7 + $0x198] sm:$0xff]  ;;  %v7888_v30 = vpack.c.bf16 %v2631_v3, %v2627_v5 }
 0x4e3   :  { %v2640_v50 = vld [vmem:[#allocation7 + $0x1b8] sm:$0xff] }
 0x4e4   :  { %v6563_v35 = vpop.eup %6562  ;;  %6568 = vtanh.f32 %v2040_v4  ;;  %2475 = vmatprep.mubr.f32.mxu0 %v2040_v4  ;;  %2546 = vmatprep.mubr.f32.mxu1 %v2040_v4  ;;  %v2613_v4 = vld [vmem:[#allocation7 + $0xe0] sm:$0xff]  ;;  %v2822_v5 = vld [vmem:[#allocation3 + $0x18] sm:$0xff] }
 0x4e5   :  { %v2268_v19 = vadd.f32 1.0, %v6563_v35  ;;  %v6565_v58 = vpop.eup %6564  ;;  %6570 = vpow2.f32 %v4758_v9  ;;  %v2609_v9 = vld [vmem:[#allocation7 + $0xc0] sm:$0xff]  ;;  %v7856_v35 = vpack.c.bf16 %v2614_v20, %v2610_v29 }
 0x4e6   :  { %v2269_v23 = vadd.f32 1.0, %v6565_v58  ;;  %v6567_v24 = vpop.eup %6566  ;;  %v2611_v58 = vld [vmem:[#allocation7 + $0xd0] sm:$0xff]  ;;  %v2633_v29 = vld [vmem:[#allocation7 + $0x180] sm:$0xff] }
 0x4e7   :  { %6572 = vrcp.f32 %v2268_v19  ;;  %v7858_v19 = vpack.c.bf16 %v2616_v47, %v2612_v28  ;;  %v2637_v20 = vld [vmem:[#allocation7 + $0x1a0] sm:$0xff]  ;;  %v7892_v28 = vpack.c.bf16 %v2638_v15, %v2634_v42  ;;  %v7894_v47 = vpack.c.bf16 %v2640_v50, %v2636_v27  ;;  %v2826_v42 = vld [vmem:[#allocation3 + $0x38] sm:$0xff] }
 0x4e8   :  { %6574 = vrcp.f32 %v2269_v23  ;;  %v2615_v23 = vld [vmem:[#allocation7 + $0xf0] sm:$0xff]  ;;  %v2819_v15 = vld [vmem:[#allocation3] sm:$0xff]  ;;  %v7922_v50 = vpack.c.bf16 %v2826_v42, %v2822_v5  ;;  %v2836_v42 = vld [vmem:[#allocation3 + $0x88] sm:$0xff] }
 0x4e9   :  { %v2823_v27 = vld [vmem:[#allocation3 + $0x20] sm:$0xff] }
 0x4ee   :  { %v6569_v16 = vpop.eup %6568 }
 0x4ef   :  { %v6571_v17 = vpop.eup %6570  ;;  %4755 = vst [vmem:[%s8691_s6 + $0x10] sm:$0xff] %v6569_v16  ;;  %v2622_v16 = vld [vmem:[#allocation7 + $0x128] sm:$0xff] }
 0x4f0   :  { %v2270_v62 = vadd.f32 1.0, %v6571_v17  ;;  %v2620_v17 = vld [vmem:[#allocation7 + $0x118] sm:$0xff] }
 0x4f1   :  { %v6573_v49 = vpop.eup %6572 }
 0x4f2   :  { %v2279_v52 = vmul.f32 %v6573_v49, %v6567_v24  ;;  %v6575_v59 = vpop.eup %6574  ;;  %6576 = vrcp.f32 %v2270_v62  ;;  %v2618_v24 = vld [vmem:[#allocation7 + $0x108] sm:$0xff]  ;;  %v2624_v49 = vld [vmem:[#allocation7 + $0x138] sm:$0xff]  ;;  %v2617_v62 = vld [vmem:[#allocation7 + $0x100] sm:$0xff] }
 0x4f3   :  { %v2278_v38 = vmul.f32 %v6575_v59, %v7698_v54  ;;  %v2593_v54 = vld [vmem:[#allocation7 + $0x40] sm:$0xff]  ;;  %v7864_v59 = vpack.c.bf16 %v2615_v23, %v2611_v58  ;;  %v7868_v0 = vpack.c.bf16 %v2622_v16, %v2618_v24  ;;  %v7870_v53 = vpack.c.bf16 %v2624_v49, %v2620_v17  ;;  %v2642_v58 = vld [vmem:[#allocation7 + $0x1c8] sm:$0xff]  ;;  %v2644_v24 = vld [vmem:[#allocation7 + $0x1d8] sm:$0xff] }
 0x4f4   :  { %v7836_v32 = vpack.c.bf16 %v2597_v8, %v2593_v54  ;;  %v2625_v54 = vld [vmem:[#allocation7 + $0x140] sm:$0xff]  ;;  %v2646_v23 = vld [vmem:[#allocation7 + $0x1e8] sm:$0xff]  ;;  %v2648_v16 = vld [vmem:[#allocation7 + $0x1f8] sm:$0xff]  ;;  %v7898_v17 = vpack.c.bf16 %v2637_v20, %v2633_v29  ;;  %v7924_v29 = vpack.c.bf16 %v2823_v27, %v2819_v15 }
 0x4f5   :  { %v7819_v45 = vadd.f32 %v2279_v52, %v2278_v38  ;;  %v7862_v52 = vpack.c.bf16 %v2613_v4, %v2609_v9  ;;  %v2621_v38 = vld [vmem:[#allocation7 + $0x120] sm:$0xff]  ;;  %v2635_v9 = vld [vmem:[#allocation7 + $0x190] sm:$0xff]  ;;  %v2840_v15 = vld [vmem:[#allocation3 + $0xa8] sm:$0xff] }
 0x4f6   :  { %v2629_v8 = vld [vmem:[#allocation7 + $0x160] sm:$0xff]  ;;  %v2639_v4 = vld [vmem:[#allocation7 + $0x1b0] sm:$0xff]  ;;  %v2838_v27 = vld [vmem:[#allocation3 + $0x98] sm:$0xff] }
 0x4f7   :  { %6578 = vtanh.f32 %v7819_v45  ;;  %v7886_v21 = vpack.c.bf16 %v2629_v8, %v2625_v54  ;;  %v7900_v49 = vpack.c.bf16 %v2639_v4, %v2635_v9  ;;  %v2820_v54 = vld [vmem:[#allocation3 + $0x8] sm:$0xff]  ;;  %v2821_v20 = vld [vmem:[#allocation3 + $0x10] sm:$0xff] }
 0x4f8   :  { %v2824_v8 = vld [vmem:[#allocation3 + $0x28] sm:$0xff]  ;;  %v2825_v9 = vld [vmem:[#allocation3 + $0x30] sm:$0xff] }
 0x4f9   :  { %v7920_v3 = vpack.c.bf16 %v2824_v8, %v2820_v54  ;;  %v7927_v4 = vpack.c.bf16 %v2825_v9, %v2821_v20  ;;  %v2829_v54 = vld [vmem:[#allocation3 + $0x50] sm:$0xff]  ;;  %v7944_v20 = vpack.c.bf16 %v2840_v15, %v2836_v42  ;;  %v2842_v9 = vld [vmem:[#allocation3 + $0xb8] sm:$0xff]  ;;  %v2848_v42 = vld [vmem:[#allocation3 + $0xe8] sm:$0xff] }
 0x4fa   :  { %v2833_v8 = vld [vmem:[#allocation3 + $0x70] sm:$0xff]  ;;  %v2846_v15 = vld [vmem:[#allocation3 + $0xd8] sm:$0xff] }
 0x4fb   :  { %v7939_v5 = vpack.c.bf16 %v2833_v8, %v2829_v54  ;;  %9155 = vst [vmem:[#allocation26_spill] sm:$0xff] %v7944_v20  ;;  %v2844_v8 = vld [vmem:[#allocation3 + $0xc8] sm:$0xff] }
 0x4fc   :  { %v6577_v1 = vpop.eup %6576 }
 0x4fd   :  { %9154 = vst [vmem:[#allocation22_spill] sm:$0xff] %v7939_v5 }
 0x501   :  { %v6579_v10 = vpop.eup %6578 }
 0x502   :  { %v7826_v18 = vmul.f32 %v6579_v10, %v6577_v1  ;;  %v7874_v1 = vpack.c.bf16 %v2621_v38, %v2617_v62  ;;  %v7876_v10 = vpack.c.bf16 %v2623_v46, %v2619_v51  ;;  %v2641_v62 = vld [vmem:[#allocation7 + $0x1c0] sm:$0xff]  ;;  %v7904_v38 = vpack.c.bf16 %v2646_v23, %v2642_v58  ;;  %v2832_v58 = vld [vmem:[#allocation3 + $0x68] sm:$0xff]  ;;  %v2830_v23 = vld [vmem:[#allocation3 + $0x58] sm:$0xff] }
 0x503   :  { %v7906_v51 = vpack.c.bf16 %v2648_v16, %v2644_v24  ;;  %v2645_v46 = vld [vmem:[#allocation7 + $0x1e0] sm:$0xff]  ;;  %v2834_v16 = vld [vmem:[#allocation3 + $0x78] sm:$0xff] }
 0x504   :  { %2476 = vmatmul.mubr.f32.vlgmr.msra.gmra.mrb[22].mxu0 %v7826_v18  ;;  %2547 = vmatmul.mubr.f32.vlgmr.msra.gmra.mrb[22].mxu1 %v7826_v18  ;;  %v7910_v7 = vpack.c.bf16 %v2645_v46, %v2641_v62  ;;  %v2827_v62 = vld [vmem:[#allocation3 + $0x40] sm:$0xff]  ;;  %v7934_v48 = vpack.c.bf16 %v2834_v16, %v2830_v23  ;;  %v7946_v23 = vpack.c.bf16 %v2842_v9, %v2838_v27  ;;  %v2850_v27 = vld [vmem:[#allocation3 + $0xf8] sm:$0xff] }
 0x505   :  { %5627 = vmatpush1.bf16.msra.mxu0 %v7822_v37  ;;  %5659 = vmatpush1.bf16.msra.mxu1 %v7824_v40  ;;  %v2831_v46 = vld [vmem:[#allocation3 + $0x60] sm:$0xff] }
 0x506   :  { %5629 = vmatprep.subr.bf16.mxu0 %v7828_v22  ;;  %5661 = vmatprep.subr.bf16.mxu1 %v7830_v36  ;;  %9152 = vst [vmem:[#allocation21_spill] sm:$0xff] %v7934_v48  ;;  %v7936_v57 = vpack.c.bf16 %v2831_v46, %v2827_v62  ;;  %9156 = vst [vmem:[#allocation24_spill] sm:$0xff] %v7946_v23  ;;  %v2837_v62 = vld [vmem:[#allocation3 + $0x90] sm:$0xff]  ;;  %v2843_v9 = vld [vmem:[#allocation3 + $0xc0] sm:$0xff] }
 0x507   :  { %2713 = vmatprep.mubr.f32.mxu0 %v8979_v43  ;;  %2784 = vmatprep.mubr.f32.mxu1 %v8979_v43  ;;  %v2841_v46 = vld [vmem:[#allocation3 + $0xb0] sm:$0xff] }
 0x508   :  { %9153 = vst [vmem:[#allocation25_spill] sm:$0xff] %v7936_v57  ;;  %v7951_v54 = vpack.c.bf16 %v2841_v46, %v2837_v62  ;;  %v2845_v62 = vld [vmem:[#allocation3 + $0xd0] sm:$0xff] }
 0x509   :  { %5631 = vmatpush1.bf16.msra.mxu0 %v7836_v32  ;;  %5663 = vmatpush1.bf16.msra.mxu1 %v7838_v33  ;;  %v2849_v46 = vld [vmem:[#allocation3 + $0xf0] sm:$0xff] }
 0x50a   :  { %5633 = vmatprep.subr.bf16.mxu0 %v7842_v26  ;;  %5665 = vmatprep.subr.bf16.mxu1 %v7844_v55  ;;  %9158 = vst [vmem:[#allocation28_spill] sm:$0xff] %v7951_v54 }
 0x50d   :  { %5635 = vmatpush1.bf16.msra.mxu0 %v7850_v39  ;;  %5667 = vmatpush1.bf16.msra.mxu1 %v7852_v6 }
 0x50e   :  { %5637 = vmatprep.subr.bf16.mxu0 %v7856_v35  ;;  %5669 = vmatprep.subr.bf16.mxu1 %v7858_v19 }
 0x511   :  { %5639 = vmatpush1.bf16.msra.mxu0 %v7862_v52  ;;  %5671 = vmatpush1.bf16.msra.mxu1 %v7864_v59 }
 0x512   :  { %5641 = vmatprep.subr.bf16.mxu0 %v7868_v0  ;;  %5673 = vmatprep.subr.bf16.mxu1 %v7870_v53 }
 0x515   :  { %5643 = vmatpush1.bf16.msra.mxu0 %v7874_v1  ;;  %5675 = vmatpush1.bf16.msra.mxu1 %v7876_v10 }
 0x516   :  { %5645 = vmatprep.subr.bf16.mxu0 %v7880_v60  ;;  %5677 = vmatprep.subr.bf16.mxu1 %v7882_v61 }
 0x519   :  { %5647 = vmatpush1.bf16.msra.mxu0 %v7886_v21  ;;  %5679 = vmatpush1.bf16.msra.mxu1 %v7888_v30 }
 0x51a   :  { %5649 = vmatprep.subr.bf16.mxu0 %v7892_v28  ;;  %5681 = vmatprep.subr.bf16.mxu1 %v7894_v47 }
 0x51d   :  { %5651 = vmatpush1.bf16.msra.mxu0 %v7898_v17  ;;  %5683 = vmatpush1.bf16.msra.mxu1 %v7900_v49 }
 0x51e   :  { %5653 = vmatprep.subr.bf16.mxu0 %v7904_v38  ;;  %5685 = vmatprep.subr.bf16.mxu1 %v7906_v51 }
 0x521   :  { %5655 = vmatpush1.bf16.msra.mxu0 %v7910_v7  ;;  %5687 = vmatpush1.bf16.msra.mxu1 %v7912_v2 }
 0x522   :  { %5689 = vmatprep.subr.bf16.mxu0 %v7920_v3  ;;  %5753 = vmatprep.subr.bf16.mxu1 %v7922_v50 }
 0x524   :  { %2714 = vmatmul.mubr.f32.vlgmr.msra.gmra.mrb[8].mxu0 %v7826_v18  ;;  %2785 = vmatmul.mubr.f32.vlgmr.msra.gmra.mrb[8].mxu1 %v7826_v18  ;;  %v2828_v18 = vld [vmem:[#allocation3 + $0x48] sm:$0xff] }
 0x525   :  { %5691 = vmatpush1.bf16.msra.mxu0 %v7924_v29  ;;  %5755 = vmatpush1.bf16.msra.mxu1 %v7927_v4  ;;  %v7932_v24 = vpack.c.bf16 %v2832_v58, %v2828_v18  ;;  %v2835_v18 = vld [vmem:[#allocation3 + $0x80] sm:$0xff] }
 0x526   :  { %5757 = vmatprep.subr.bf16.mxu1 %v7934_v48  ;;  %v2839_v58 = vld [vmem:[#allocation3 + $0xa0] sm:$0xff]  ;;  %v2934_v48 = vld [vmem:[#allocation3 + $0x398] sm:$0xff] }
 0x527   :  { %9151 = vst [vmem:[#allocation23_spill] sm:$0xff] %v7932_v24  ;;  %5693 = vmatprep.subr.bf16.mxu0 %v7932_v24  ;;  %v7948_v16 = vpack.c.bf16 %v2839_v58, %v2835_v18  ;;  %v2847_v18 = vld [vmem:[#allocation3 + $0xe0] sm:$0xff]  ;;  %v7958_v58 = vpack.c.bf16 %v2850_v27, %v2846_v15  ;;  %v2858_v15 = vld [vmem:[#allocation3 + $0x138] sm:$0xff] }
 0x528   :  { %v2851_v27 = vld [vmem:[#allocation3 + $0x100] sm:$0xff] }
 0x529   :  { %5695 = vmatpush1.bf16.msra.mxu0 %v7936_v57  ;;  %5759 = vmatpush1.bf16.msra.mxu1 %v7939_v5  ;;  %9157 = vst [vmem:[#allocation27_spill] sm:$0xff] %v7948_v16  ;;  %v7956_v5 = vpack.c.bf16 %v2848_v42, %v2844_v8  ;;  %9160 = vst [vmem:[#allocation30_spill] sm:$0xff] %v7958_v58  ;;  %v7960_v57 = vpack.c.bf16 %v2847_v18, %v2843_v9  ;;  %v2856_v8 = vld [vmem:[#allocation3 + $0x128] sm:$0xff]  ;;  %v2854_v42 = vld [vmem:[#allocation3 + $0x118] sm:$0xff] }
 0x52a   :  { %5697 = vmatprep.subr.bf16.mxu0 %v7944_v20  ;;  %5761 = vmatprep.subr.bf16.mxu1 %v7946_v23  ;;  %v7963_v23 = vpack.c.bf16 %v2849_v46, %v2845_v62  ;;  %v2855_v9 = vld [vmem:[#allocation3 + $0x120] sm:$0xff]  ;;  %v7970_v18 = vpack.c.bf16 %v2858_v15, %v2854_v42  ;;  %v2853_v62 = vld [vmem:[#allocation3 + $0x110] sm:$0xff]  ;;  %v2866_v42 = vld [vmem:[#allocation3 + $0x178] sm:$0xff] }
 0x52b   :  { %9159 = vst [vmem:[#allocation29_spill] sm:$0xff] %v7956_v5  ;;  %9161 = vst [vmem:[#allocation31_spill] sm:$0xff] %v7960_v57  ;;  %v7972_v20 = vpack.c.bf16 %v2855_v9, %v2851_v27  ;;  %v2857_v46 = vld [vmem:[#allocation3 + $0x130] sm:$0xff]  ;;  %v2859_v15 = vld [vmem:[#allocation3 + $0x140] sm:$0xff] }
 0x52c   :  { %9162 = vst [vmem:[#allocation32_spill] sm:$0xff] %v7963_v23  ;;  %9164 = vst [vmem:[#allocation34_spill] sm:$0xff] %v7970_v18  ;;  %v2863_v27 = vld [vmem:[#allocation3 + $0x160] sm:$0xff] }
 0x52d   :  { %5699 = vmatpush1.bf16.msra.mxu0 %v7948_v16  ;;  %5763 = vmatpush1.bf16.msra.mxu1 %v7951_v54  ;;  %v2852_v54 = vld [vmem:[#allocation3 + $0x108] sm:$0xff]  ;;  %9165 = vst [vmem:[#allocation35_spill] sm:$0xff] %v7972_v20 }
 0x52e   :  { %5701 = vmatprep.subr.bf16.mxu0 %v7956_v5  ;;  %5765 = vmatprep.subr.bf16.mxu1 %v7958_v58  ;;  %v7968_v16 = vpack.c.bf16 %v2856_v8, %v2852_v54  ;;  %v7975_v58 = vpack.c.bf16 %v2857_v46, %v2853_v62  ;;  %v2860_v54 = vld [vmem:[#allocation3 + $0x148] sm:$0xff]  ;;  %v7984_v5 = vpack.c.bf16 %v2863_v27, %v2859_v15  ;;  %v2861_v62 = vld [vmem:[#allocation3 + $0x150] sm:$0xff]  ;;  %v2871_v15 = vld [vmem:[#allocation3 + $0x1a0] sm:$0xff] }
 0x52f   :  { %v2864_v8 = vld [vmem:[#allocation3 + $0x168] sm:$0xff]  ;;  %v2865_v46 = vld [vmem:[#allocation3 + $0x170] sm:$0xff] }
 0x530   :  { %9163 = vst [vmem:[#allocation33_spill] sm:$0xff] %v7968_v16  ;;  %9166 = vst [vmem:[#allocation36_spill] sm:$0xff] %v7975_v58 }
 0x531   :  { %5703 = vmatpush1.bf16.msra.mxu0 %v7960_v57  ;;  %5767 = vmatpush1.bf16.msra.mxu1 %v7963_v23  ;;  %v2862_v23 = vld [vmem:[#allocation3 + $0x158] sm:$0xff]  ;;  %v7980_v57 = vpack.c.bf16 %v2864_v8, %v2860_v54  ;;  %9169 = vst [vmem:[#allocation39_spill] sm:$0xff] %v7984_v5  ;;  %v2872_v54 = vld [vmem:[#allocation3 + $0x1a8] sm:$0xff] }
 0x532   :  { %5705 = vmatprep.subr.bf16.mxu0 %v7968_v16  ;;  %5769 = vmatprep.subr.bf16.mxu1 %v7970_v18  ;;  %v7982_v9 = vpack.c.bf16 %v2866_v42, %v2862_v23  ;;  %v7987_v18 = vpack.c.bf16 %v2865_v46, %v2861_v62  ;;  %v2870_v8 = vld [vmem:[#allocation3 + $0x198] sm:$0xff]  ;;  %v2867_v42 = vld [vmem:[#allocation3 + $0x180] sm:$0xff]  ;;  %v2869_v62 = vld [vmem:[#allocation3 + $0x190] sm:$0xff] }
 0x533   :  { %9167 = vst [vmem:[#allocation37_spill] sm:$0xff] %v7980_v57  ;;  %v2874_v23 = vld [vmem:[#allocation3 + $0x1b8] sm:$0xff]  ;;  %v7996_v16 = vpack.c.bf16 %v2871_v15, %v2867_v42  ;;  %v2873_v46 = vld [vmem:[#allocation3 + $0x1b0] sm:$0xff]  ;;  %v2879_v42 = vld [vmem:[#allocation3 + $0x1e0] sm:$0xff] }
 0x534   :  { %9168 = vst [vmem:[#allocation38_spill] sm:$0xff] %v7982_v9  ;;  %9170 = vst [vmem:[#allocation40_spill] sm:$0xff] %v7987_v18  ;;  %v7994_v27 = vpack.c.bf16 %v2874_v23, %v2870_v8  ;;  %v2882_v8 = vld [vmem:[#allocation3 + $0x1f8] sm:$0xff]  ;;  %v2875_v23 = vld [vmem:[#allocation3 + $0x1c0] sm:$0xff] }
 0x535   :  { %5707 = vmatpush1.bf16.msra.mxu0 %v7972_v20  ;;  %5771 = vmatpush1.bf16.msra.mxu1 %v7975_v58  ;;  %v2868_v58 = vld [vmem:[#allocation3 + $0x188] sm:$0xff]  ;;  %9173 = vst [vmem:[#allocation43_spill] sm:$0xff] %v7996_v16 }
 0x536   :  { %5709 = vmatprep.subr.bf16.mxu0 %v7980_v57  ;;  %5773 = vmatprep.subr.bf16.mxu1 %v7982_v9  ;;  %v7992_v20 = vpack.c.bf16 %v2872_v54, %v2868_v58  ;;  %9172 = vst [vmem:[#allocation42_spill] sm:$0xff] %v7994_v27  ;;  %v7999_v9 = vpack.c.bf16 %v2873_v46, %v2869_v62  ;;  %v2880_v58 = vld [vmem:[#allocation3 + $0x1e8] sm:$0xff]  ;;  %v2878_v54 = vld [vmem:[#allocation3 + $0x1d8] sm:$0xff]  ;;  %v2877_v62 = vld [vmem:[#allocation3 + $0x1d0] sm:$0xff] }
 0x537   :  { %v8006_v15 = vpack.c.bf16 %v2882_v8, %v2878_v54  ;;  %v8008_v57 = vpack.c.bf16 %v2879_v42, %v2875_v23  ;;  %v2881_v46 = vld [vmem:[#allocation3 + $0x1f0] sm:$0xff]  ;;  %v2890_v54 = vld [vmem:[#allocation3 + $0x238] sm:$0xff]  ;;  %v2883_v8 = vld [vmem:[#allocation3 + $0x200] sm:$0xff] }
 0x538   :  { %9171 = vst [vmem:[#allocation41_spill] sm:$0xff] %v7992_v20  ;;  %9174 = vst [vmem:[#allocation44_spill] sm:$0xff] %v7999_v9  ;;  %v2887_v23 = vld [vmem:[#allocation3 + $0x220] sm:$0xff] }
 0x539   :  { %5711 = vmatpush1.bf16.msra.mxu0 %v7984_v5  ;;  %5775 = vmatpush1.bf16.msra.mxu1 %v7987_v18  ;;  %v2876_v18 = vld [vmem:[#allocation3 + $0x1c8] sm:$0xff]  ;;  %9176 = vst [vmem:[#allocation46_spill] sm:$0xff] %v8006_v15  ;;  %9177 = vst [vmem:[#allocation47_spill] sm:$0xff] %v8008_v57 }
 0x53a   :  { %5713 = vmatprep.subr.bf16.mxu0 %v7992_v20  ;;  %5777 = vmatprep.subr.bf16.mxu1 %v7994_v27  ;;  %v8004_v5 = vpack.c.bf16 %v2880_v58, %v2876_v18  ;;  %v8011_v27 = vpack.c.bf16 %v2881_v46, %v2877_v62  ;;  %v2888_v18 = vld [vmem:[#allocation3 + $0x228] sm:$0xff]  ;;  %v2886_v58 = vld [vmem:[#allocation3 + $0x218] sm:$0xff]  ;;  %v8020_v20 = vpack.c.bf16 %v2887_v23, %v2883_v8  ;;  %v2885_v62 = vld [vmem:[#allocation3 + $0x210] sm:$0xff] }
 0x53b   :  { %v8018_v42 = vpack.c.bf16 %v2890_v54, %v2886_v58  ;;  %v2889_v46 = vld [vmem:[#allocation3 + $0x230] sm:$0xff]  ;;  %v2898_v58 = vld [vmem:[#allocation3 + $0x278] sm:$0xff]  ;;  %v2891_v54 = vld [vmem:[#allocation3 + $0x240] sm:$0xff] }
 0x53c   :  { %9175 = vst [vmem:[#allocation45_spill] sm:$0xff] %v8004_v5  ;;  %9178 = vst [vmem:[#allocation48_spill] sm:$0xff] %v8011_v27  ;;  %v2895_v8 = vld [vmem:[#allocation3 + $0x260] sm:$0xff] }
 0x53d   :  { %5715 = vmatpush1.bf16.msra.mxu0 %v7996_v16  ;;  %5779 = vmatpush1.bf16.msra.mxu1 %v7999_v9  ;;  %v2884_v9 = vld [vmem:[#allocation3 + $0x208] sm:$0xff]  ;;  %9180 = vst [vmem:[#allocation50_spill] sm:$0xff] %v8018_v42  ;;  %9181 = vst [vmem:[#allocation51_spill] sm:$0xff] %v8020_v20 }
 0x53e   :  { %5717 = vmatprep.subr.bf16.mxu0 %v8004_v5  ;;  %5781 = vmatprep.subr.bf16.mxu1 %v8006_v15  ;;  %v8016_v16 = vpack.c.bf16 %v2888_v18, %v2884_v9  ;;  %v8023_v15 = vpack.c.bf16 %v2889_v46, %v2885_v62  ;;  %v2896_v9 = vld [vmem:[#allocation3 + $0x268] sm:$0xff]  ;;  %v2894_v18 = vld [vmem:[#allocation3 + $0x258] sm:$0xff]  ;;  %v8032_v5 = vpack.c.bf16 %v2895_v8, %v2891_v54  ;;  %v2893_v62 = vld [vmem:[#allocation3 + $0x250] sm:$0xff] }
 0x53f   :  { %v8030_v23 = vpack.c.bf16 %v2898_v58, %v2894_v18  ;;  %v2897_v46 = vld [vmem:[#allocation3 + $0x270] sm:$0xff]  ;;  %v2906_v18 = vld [vmem:[#allocation3 + $0x2b8] sm:$0xff]  ;;  %v2899_v58 = vld [vmem:[#allocation3 + $0x280] sm:$0xff] }
 0x540   :  { %9179 = vst [vmem:[#allocation49_spill] sm:$0xff] %v8016_v16  ;;  %9182 = vst [vmem:[#allocation52_spill] sm:$0xff] %v8023_v15  ;;  %v2903_v54 = vld [vmem:[#allocation3 + $0x2a0] sm:$0xff] }
 0x541   :  { %5719 = vmatpush1.bf16.msra.mxu0 %v8008_v57  ;;  %5783 = vmatpush1.bf16.msra.mxu1 %v8011_v27  ;;  %v2892_v27 = vld [vmem:[#allocation3 + $0x248] sm:$0xff]  ;;  %9184 = vst [vmem:[#allocation54_spill] sm:$0xff] %v8030_v23  ;;  %9185 = vst [vmem:[#allocation55_spill] sm:$0xff] %v8032_v5 }
 0x542   :  { %5721 = vmatprep.subr.bf16.mxu0 %v8016_v16  ;;  %5785 = vmatprep.subr.bf16.mxu1 %v8018_v42  ;;  %v8028_v57 = vpack.c.bf16 %v2896_v9, %v2892_v27  ;;  %v8035_v42 = vpack.c.bf16 %v2897_v46, %v2893_v62  ;;  %v2904_v27 = vld [vmem:[#allocation3 + $0x2a8] sm:$0xff]  ;;  %v2902_v9 = vld [vmem:[#allocation3 + $0x298] sm:$0xff]  ;;  %v8044_v16 = vpack.c.bf16 %v2903_v54, %v2899_v58  ;;  %v2901_v62 = vld [vmem:[#allocation3 + $0x290] sm:$0xff] }
 0x543   :  { %v8042_v8 = vpack.c.bf16 %v2906_v18, %v2902_v9  ;;  %v2905_v46 = vld [vmem:[#allocation3 + $0x2b0] sm:$0xff]  ;;  %v2914_v9 = vld [vmem:[#allocation3 + $0x2f8] sm:$0xff]  ;;  %v2907_v18 = vld [vmem:[#allocation3 + $0x2c0] sm:$0xff] }
 0x544   :  { %9183 = vst [vmem:[#allocation53_spill] sm:$0xff] %v8028_v57  ;;  %9186 = vst [vmem:[#allocation56_spill] sm:$0xff] %v8035_v42  ;;  %v2911_v58 = vld [vmem:[#allocation3 + $0x2e0] sm:$0xff] }
 0x545   :  { %5723 = vmatpush1.bf16.msra.mxu0 %v8020_v20  ;;  %5787 = vmatpush1.bf16.msra.mxu1 %v8023_v15  ;;  %v2900_v15 = vld [vmem:[#allocation3 + $0x288] sm:$0xff]  ;;  %9188 = vst [vmem:[#allocation58_spill] sm:$0xff] %v8042_v8  ;;  %9189 = vst [vmem:[#allocation59_spill] sm:$0xff] %v8044_v16 }
 0x546   :  { %5725 = vmatprep.subr.bf16.mxu0 %v8028_v57  ;;  %5789 = vmatprep.subr.bf16.mxu1 %v8030_v23  ;;  %v8040_v20 = vpack.c.bf16 %v2904_v27, %v2900_v15  ;;  %v8047_v23 = vpack.c.bf16 %v2905_v46, %v2901_v62  ;;  %v2912_v15 = vld [vmem:[#allocation3 + $0x2e8] sm:$0xff]  ;;  %v2910_v27 = vld [vmem:[#allocation3 + $0x2d8] sm:$0xff]  ;;  %v8056_v57 = vpack.c.bf16 %v2911_v58, %v2907_v18  ;;  %v2909_v62 = vld [vmem:[#allocation3 + $0x2d0] sm:$0xff] }
 0x547   :  { %v8054_v54 = vpack.c.bf16 %v2914_v9, %v2910_v27  ;;  %v2913_v46 = vld [vmem:[#allocation3 + $0x2f0] sm:$0xff]  ;;  %v2922_v27 = vld [vmem:[#allocation3 + $0x338] sm:$0xff]  ;;  %v2915_v9 = vld [vmem:[#allocation3 + $0x300] sm:$0xff] }
 0x548   :  { %9187 = vst [vmem:[#allocation57_spill] sm:$0xff] %v8040_v20  ;;  %9190 = vst [vmem:[#allocation60_spill] sm:$0xff] %v8047_v23  ;;  %v2919_v18 = vld [vmem:[#allocation3 + $0x320] sm:$0xff] }
 0x549   :  { %5727 = vmatpush1.bf16.msra.mxu0 %v8032_v5  ;;  %5791 = vmatpush1.bf16.msra.mxu1 %v8035_v42  ;;  %v2908_v42 = vld [vmem:[#allocation3 + $0x2c8] sm:$0xff]  ;;  %9192 = vst [vmem:[#allocation62_spill] sm:$0xff] %v8054_v54  ;;  %9193 = vst [vmem:[#allocation63_spill] sm:$0xff] %v8056_v57 }
 0x54a   :  { %5729 = vmatprep.subr.bf16.mxu0 %v8040_v20  ;;  %5793 = vmatprep.subr.bf16.mxu1 %v8042_v8  ;;  %v8052_v5 = vpack.c.bf16 %v2912_v15, %v2908_v42  ;;  %v8059_v8 = vpack.c.bf16 %v2913_v46, %v2909_v62  ;;  %v2920_v42 = vld [vmem:[#allocation3 + $0x328] sm:$0xff]  ;;  %v2918_v15 = vld [vmem:[#allocation3 + $0x318] sm:$0xff]  ;;  %v8068_v20 = vpack.c.bf16 %v2919_v18, %v2915_v9  ;;  %v2917_v62 = vld [vmem:[#allocation3 + $0x310] sm:$0xff] }
 0x54b   :  { %v8066_v58 = vpack.c.bf16 %v2922_v27, %v2918_v15  ;;  %v2921_v46 = vld [vmem:[#allocation3 + $0x330] sm:$0xff]  ;;  %v2930_v15 = vld [vmem:[#allocation3 + $0x378] sm:$0xff]  ;;  %v2923_v27 = vld [vmem:[#allocation3 + $0x340] sm:$0xff] }
 0x54c   :  { %9191 = vst [vmem:[#allocation61_spill] sm:$0xff] %v8052_v5  ;;  %9194 = vst [vmem:[#allocation64_spill] sm:$0xff] %v8059_v8  ;;  %v2927_v9 = vld [vmem:[#allocation3 + $0x360] sm:$0xff] }
 0x54d   :  { %5731 = vmatpush1.bf16.msra.mxu0 %v8044_v16  ;;  %5795 = vmatpush1.bf16.msra.mxu1 %v8047_v23  ;;  %v2916_v23 = vld [vmem:[#allocation3 + $0x308] sm:$0xff]  ;;  %9196 = vst [vmem:[#allocation66_spill] sm:$0xff] %v8066_v58  ;;  %9197 = vst [vmem:[#allocation16_spill] sm:$0xff] %v8068_v20 }
 0x54e   :  { %5733 = vmatprep.subr.bf16.mxu0 %v8052_v5  ;;  %5797 = vmatprep.subr.bf16.mxu1 %v8054_v54  ;;  %v8064_v16 = vpack.c.bf16 %v2920_v42, %v2916_v23  ;;  %v8071_v54 = vpack.c.bf16 %v2921_v46, %v2917_v62  ;;  %v2928_v23 = vld [vmem:[#allocation3 + $0x368] sm:$0xff]  ;;  %v2926_v42 = vld [vmem:[#allocation3 + $0x358] sm:$0xff]  ;;  %v8080_v5 = vpack.c.bf16 %v2927_v9, %v2923_v27  ;;  %v2925_v62 = vld [vmem:[#allocation3 + $0x350] sm:$0xff] }
 0x54f   :  { %v8078_v18 = vpack.c.bf16 %v2930_v15, %v2926_v42  ;;  %v2929_v46 = vld [vmem:[#allocation3 + $0x370] sm:$0xff]  ;;  %v2931_v42 = vld [vmem:[#allocation3 + $0x380] sm:$0xff] }
 0x550   :  { %9195 = vst [vmem:[#allocation65_spill] sm:$0xff] %v8064_v16  ;;  %9198 = vst [vmem:[#allocation17_spill] sm:$0xff] %v8071_v54  ;;  %v2935_v15 = vld [vmem:[#allocation3 + $0x3a0] sm:$0xff] }
 0x551   :  { %5735 = vmatpush1.bf16.msra.mxu0 %v8056_v57  ;;  %5799 = vmatpush1.bf16.msra.mxu1 %v8059_v8  ;;  %v2924_v8 = vld [vmem:[#allocation3 + $0x348] sm:$0xff]  ;;  %9200 = vst [vmem:[#allocation67_spill] sm:$0xff] %v8078_v18  ;;  %9201 = vst [vmem:[#allocation68_spill] sm:$0xff] %v8080_v5  ;;  %v8092_v9 = vpack.c.bf16 %v2935_v15, %v2931_v42  ;;  %v2941_v42 = vld [vmem:[#allocation3 + $0x3d0] sm:$0xff] }
 0x552   :  { %5737 = vmatprep.subr.bf16.mxu0 %v8064_v16  ;;  %5801 = vmatprep.subr.bf16.mxu1 %v8066_v58  ;;  %v8076_v57 = vpack.c.bf16 %v2928_v23, %v2924_v8  ;;  %v8083_v58 = vpack.c.bf16 %v2929_v46, %v2925_v62  ;;  %v2936_v16 = vld [vmem:[#allocation3 + $0x3a8] sm:$0xff]  ;;  %v2938_v23 = vld [vmem:[#allocation3 + $0x3b8] sm:$0xff]  ;;  %v2933_v62 = vld [vmem:[#allocation3 + $0x390] sm:$0xff] }
 0x553   :  { %v8090_v27 = vpack.c.bf16 %v2938_v23, %v2934_v48  ;;  %v2937_v46 = vld [vmem:[#allocation3 + $0x3b0] sm:$0xff]  ;;  %v2939_v48 = vld [vmem:[#allocation3 + $0x3c0] sm:$0xff] }
 0x554   :  { %9199 = vst [vmem:[#allocation18_spill] sm:$0xff] %v8076_v57  ;;  %9202 = vst [vmem:[#allocation69_spill] sm:$0xff] %v8083_v58  ;;  %v2943_v23 = vld [vmem:[#allocation3 + $0x3e0] sm:$0xff] }
 0x555   :  { %5739 = vmatpush1.bf16.msra.mxu0 %v8068_v20  ;;  %5803 = vmatpush1.bf16.msra.mxu1 %v8071_v54  ;;  %v2932_v20 = vld [vmem:[#allocation3 + $0x388] sm:$0xff]  ;;  %v8095_v54 = vpack.c.bf16 %v2937_v46, %v2933_v62  ;;  %v8103_v15 = vpack.c.bf16 %v2943_v23, %v2939_v48 }
 0x556   :  { %5741 = vmatprep.subr.bf16.mxu0 %v8076_v57  ;;  %5805 = vmatprep.subr.bf16.mxu1 %v8078_v18  ;;  %v8087_v8 = vpack.c.bf16 %v2936_v16, %v2932_v20  ;;  %v2940_v57 = vld [vmem:[#allocation3 + $0x3c8] sm:$0xff]  ;;  %v2946_v20 = vld [vmem:[#allocation3 + $0x3f8] sm:$0xff] }
 0x557   :  { %v2944_v18 = vld [vmem:[#allocation3 + $0x3e8] sm:$0xff]  ;;  %9205 = vst [vmem:[#allocation72_spill] sm:$0xff] %v8103_v15 }
 0x558   :  { %v8098_v16 = vpack.c.bf16 %v2944_v18, %v2940_v57 }
 0x559   :  { %5743 = vmatpush1.bf16.msra.mxu0 %v8080_v5  ;;  %5807 = vmatpush1.bf16.msra.mxu1 %v8083_v58  ;;  %v2942_v5 = vld [vmem:[#allocation3 + $0x3d8] sm:$0xff]  ;;  %v2945_v58 = vld [vmem:[#allocation3 + $0x3f0] sm:$0xff] }
 0x55a   :  { %5745 = vmatprep.subr.bf16.mxu0 %v8087_v8  ;;  %5809 = vmatprep.subr.bf16.mxu1 %v8090_v27  ;;  %9203 = vst [vmem:[#allocation70_spill] sm:$0xff] %v8098_v16  ;;  %v8100_v24 = vpack.c.bf16 %v2946_v20, %v2942_v5  ;;  %v8107_v62 = vpack.c.bf16 %v2945_v58, %v2941_v42 }
 0x55c   :  { %9204 = vst [vmem:[#allocation71_spill] sm:$0xff] %v8100_v24  ;;  %9206 = vst [vmem:[#allocation73_spill] sm:$0xff] %v8107_v62 }
 0x55d   :  { %5747 = vmatpush1.bf16.msra.mxu0 %v8092_v9  ;;  %5811 = vmatpush1.bf16.msra.mxu1 %v8095_v54 }
 0x55e   :  { %5749 = vmatprep.subr.bf16.mxu0 %v8098_v16  ;;  %5813 = vmatprep.subr.bf16.mxu1 %v8100_v24 }
 0x561   :  { %5751 = vmatpush1.bf16.msra.mxu0 %v8103_v15  ;;  %5815 = vmatpush1.bf16.msra.mxu1 %v8107_v62 }
 0x562   :  { %5817 = vmatprep.subr.bf16.mxu0 %v7797_v14  ;;  %5849 = vmatprep.subr.bf16.mxu1 %v7799_v25 }
 0x5d7   :  { %v2477_v57 = vpop.f32.mrb[22].mxu0  ;;  %v2548_v5 = vpop.f32.mrb[22].mxu1 }
 0x5d8   :  { %v2478_v18 = vadd.f32 %v2477_v57, %v9149_v56  ;;  %v2479_v46 = vpop.f32.mrb[23].mxu0  ;;  %v2550_v20 = vpop.f32.mrb[23].mxu1  ;;  %v2549_v42 = vadd.f32 %v2548_v5, %v9150_v11 }
 0x5d9   :  { %v2480_v48 = vadd.f32 %v2479_v46, %v7362_v31  ;;  %v2551_v62 = vadd.f32 %v2550_v20, %v7372_v44 }
 0x5da   :  { %v4759_v58 = vmul.f32 -1.442695, %v2478_v18  ;;  %v4761_v15 = vmul.f32 -1.442695, %v2549_v42 }
 0x5db   :  { %v4760_v23 = vmul.f32 -1.442695, %v2480_v48 }
 0x5dc   :  { %6580 = vpow2.f32 %v4759_v58 }
 0x5dd   :  { %6582 = vpow2.f32 %v4760_v23 }
 0x5de   :  { %6584 = vtanh.f32 %v2551_v62 }
 0x5df   :  { %6586 = vpow2.f32 %v4761_v15 }
 0x5e6   :  { %v6581_v14 = vpop.eup %6580 }
 0x5e7   :  { %v2562_v24 = vadd.f32 1.0, %v6581_v14  ;;  %v6583_v25 = vpop.eup %6582 }
 0x5e8   :  { %v2563_v57 = vadd.f32 1.0, %v6583_v25  ;;  %v6585_v56 = vpop.eup %6584 }
 0x5e9   :  { %6588 = vrcp.f32 %v2562_v24  ;;  %v6587_v16 = vpop.eup %6586 }
 0x5ea   :  { %6590 = vrcp.f32 %v2563_v57  ;;  %v2564_v58 = vadd.f32 1.0, %v6587_v16 }
 0x5ec   :  { %6592 = vrcp.f32 %v2564_v58 }
 0x5f3   :  { %v6589_v46 = vpop.eup %6588 }
 0x5f4   :  { %v2573_v18 = vmul.f32 %v6589_v46, %v6585_v56  ;;  %v6591_v48 = vpop.eup %6590 }
 0x5f5   :  { %v2572_v23 = vmul.f32 %v6591_v48, %v7808_v41 }
 0x5f6   :  { %v6593_v16 = vpop.eup %6592 }
 0x5f7   :  { %v2715_v5 = vpop.f32.mrb[8].mxu0  ;;  %v2786_v11 = vpop.f32.mrb[8].mxu1  ;;  %v8119_v20 = vadd.f32 %v2573_v18, %v2572_v23 }
 0x5f8   :  { %v6400_v42 = vadd.f32 %v2715_v5, %v9035_v63  ;;  %v2717_v62 = vpop.f32.mrb[9].mxu0  ;;  %v2788_v14 = vpop.f32.mrb[9].mxu1  ;;  %v6416_v56 = vadd.f32 %v2786_v11, %v6904_v12 }
 0x5f9   :  { %v6401_v24 = vadd.f32 %v2717_v62, %v9036_v34  ;;  %6594 = vtanh.f32 %v8119_v20  ;;  %v6417_v41 = vadd.f32 %v2788_v14, %v6908_v13 }
 0x5fa   :  { %v4763_v15 = vmul.f32 -1.442695, %v6400_v42  ;;  %v4765_v46 = vmul.f32 -1.442695, %v6416_v56 }
 0x5fb   :  { %v4764_v25 = vmul.f32 -1.442695, %v6401_v24 }
 0x5fc   :  { %6596 = vpow2.f32 %v4763_v15 }
 0x5fd   :  { %6598 = vpow2.f32 %v4764_v25 }
 0x5fe   :  { %6600 = vtanh.f32 %v6417_v41 }
 0x603   :  { %v6595_v57 = vpop.eup %6594 }
 0x604   :  { %v2576_v18 = vmul.f32 %v6595_v57, %v6593_v16 }
 0x606   :  { %v6597_v48 = vpop.eup %6596  ;;  %6602 = vtanh.f32 %v2576_v18  ;;  %3011 = vmatprep.mubr.f32.mxu0 %v2576_v18  ;;  %3082 = vmatprep.mubr.f32.mxu1 %v2576_v18  ;;  %v9242_v18 = vld [vmem:[#allocation56_spill] sm:$0xff] }
 0x607   :  { %v2804_v23 = vadd.f32 1.0, %v6597_v48  ;;  %v6599_v58 = vpop.eup %6598  ;;  %6604 = vpow2.f32 %v4765_v46  ;;  %v9243_v48 = vld [vmem:[#allocation57_spill] sm:$0xff] }
 0x608   :  { %v2805_v5 = vadd.f32 1.0, %v6599_v58  ;;  %v6601_v42 = vpop.eup %6600  ;;  %v9245_v58 = vld [vmem:[#allocation59_spill] sm:$0xff] }
 0x609   :  { %6606 = vrcp.f32 %v2804_v23  ;;  %v9244_v23 = vld [vmem:[#allocation58_spill] sm:$0xff] }
 0x60a   :  { %6608 = vrcp.f32 %v2805_v5  ;;  %v9246_v5 = vld [vmem:[#allocation60_spill] sm:$0xff] }
 0x610   :  { %v6603_v62 = vpop.eup %6602 }
 0x611   :  { %v6605_v11 = vpop.eup %6604  ;;  %4762 = vst [vmem:[%s8691_s6 + $0x18] sm:$0xff] %v6603_v62  ;;  %v9248_v62 = vld [vmem:[#allocation62_spill] sm:$0xff] }
 0x612   :  { %v2806_v25 = vadd.f32 1.0, %v6605_v11  ;;  %v9249_v11 = vld [vmem:[#allocation63_spill] sm:$0xff] }
 0x613   :  { %v6607_v14 = vpop.eup %6606 }
 0x614   :  { %v2815_v24 = vmul.f32 %v6607_v14, %v6601_v42  ;;  %v6609_v15 = vpop.eup %6608  ;;  %6610 = vrcp.f32 %v2806_v25  ;;  %v9247_v42 = vld [vmem:[#allocation61_spill] sm:$0xff]  ;;  %v9250_v14 = vld [vmem:[#allocation64_spill] sm:$0xff] }
 0x615   :  { %v2814_v56 = vmul.f32 %v6609_v15, %v7819_v45  ;;  %v9207_v45 = vld [vmem:[#allocation23_spill] sm:$0xff]  ;;  %v9252_v15 = vld [vmem:[#allocation66_spill] sm:$0xff]  ;;  %v9253_v25 = vld [vmem:[#allocation16_spill] sm:$0xff] }
 0x617   :  { %v8130_v41 = vadd.f32 %v2815_v24, %v2814_v56  ;;  %v9251_v24 = vld [vmem:[#allocation65_spill] sm:$0xff] }
 0x618   :  { %v9254_v56 = vld [vmem:[#allocation17_spill] sm:$0xff] }
 0x619   :  { %6612 = vtanh.f32 %v8130_v41 }
 0x61e   :  { %v6611_v16 = vpop.eup %6610 }
 0x623   :  { %v6613_v57 = vpop.eup %6612 }
 0x624   :  { %v2818_v46 = vmul.f32 %v6613_v57, %v6611_v16  ;;  %v9255_v16 = vld [vmem:[#allocation18_spill] sm:$0xff]  ;;  %v9256_v57 = vld [vmem:[#allocation67_spill] sm:$0xff] }
 0x626   :  { %3012 = vmatmul.mubr.f32.vlgmr.msra.gmra.mrb[24].mxu0 %v2818_v46  ;;  %3083 = vmatmul.mubr.f32.vlgmr.msra.gmra.mrb[24].mxu1 %v2818_v46 }
 0x627   :  { %5819 = vmatpush1.bf16.msra.mxu0 %v7822_v37  ;;  %5851 = vmatpush1.bf16.msra.mxu1 %v7824_v40  ;;  %v9208_v37 = vld [vmem:[#allocation21_spill] sm:$0xff] }
 0x628   :  { %5821 = vmatprep.subr.bf16.mxu0 %v7828_v22  ;;  %5853 = vmatprep.subr.bf16.mxu1 %v7830_v36  ;;  %v9209_v40 = vld [vmem:[#allocation25_spill] sm:$0xff]  ;;  %v9210_v22 = vld [vmem:[#allocation22_spill] sm:$0xff] }
 0x629   :  { %3249 = vmatprep.mubr.f32.mxu0 %v8979_v43  ;;  %3320 = vmatprep.mubr.f32.mxu1 %v8979_v43  ;;  %v9211_v36 = vld [vmem:[#allocation26_spill] sm:$0xff] }
 0x62b   :  { %5823 = vmatpush1.bf16.msra.mxu0 %v7836_v32  ;;  %5855 = vmatpush1.bf16.msra.mxu1 %v7838_v33  ;;  %v9212_v32 = vld [vmem:[#allocation24_spill] sm:$0xff]  ;;  %v9213_v33 = vld [vmem:[#allocation27_spill] sm:$0xff] }
 0x62c   :  { %5825 = vmatprep.subr.bf16.mxu0 %v7842_v26  ;;  %5857 = vmatprep.subr.bf16.mxu1 %v7844_v55  ;;  %v9214_v26 = vld [vmem:[#allocation28_spill] sm:$0xff]  ;;  %v9215_v55 = vld [vmem:[#allocation29_spill] sm:$0xff] }
 0x62f   :  { %5827 = vmatpush1.bf16.msra.mxu0 %v7850_v39  ;;  %5859 = vmatpush1.bf16.msra.mxu1 %v7852_v6  ;;  %v9216_v39 = vld [vmem:[#allocation30_spill] sm:$0xff]  ;;  %v9217_v6 = vld [vmem:[#allocation31_spill] sm:$0xff] }
 0x630   :  { %5829 = vmatprep.subr.bf16.mxu0 %v7856_v35  ;;  %5861 = vmatprep.subr.bf16.mxu1 %v7858_v19  ;;  %v9218_v35 = vld [vmem:[#allocation32_spill] sm:$0xff]  ;;  %v9219_v19 = vld [vmem:[#allocation33_spill] sm:$0xff] }
 0x633   :  { %5831 = vmatpush1.bf16.msra.mxu0 %v7862_v52  ;;  %5863 = vmatpush1.bf16.msra.mxu1 %v7864_v59  ;;  %v9220_v52 = vld [vmem:[#allocation34_spill] sm:$0xff]  ;;  %v9221_v59 = vld [vmem:[#allocation35_spill] sm:$0xff] }
 0x634   :  { %5833 = vmatprep.subr.bf16.mxu0 %v7868_v0  ;;  %5865 = vmatprep.subr.bf16.mxu1 %v7870_v53  ;;  %v9222_v0 = vld [vmem:[#allocation36_spill] sm:$0xff]  ;;  %v9223_v53 = vld [vmem:[#allocation37_spill] sm:$0xff] }
 0x637   :  { %5835 = vmatpush1.bf16.msra.mxu0 %v7874_v1  ;;  %5867 = vmatpush1.bf16.msra.mxu1 %v7876_v10  ;;  %v9224_v1 = vld [vmem:[#allocation38_spill] sm:$0xff]  ;;  %v9225_v10 = vld [vmem:[#allocation39_spill] sm:$0xff] }
 0x638   :  { %5837 = vmatprep.subr.bf16.mxu0 %v7880_v60  ;;  %5869 = vmatprep.subr.bf16.mxu1 %v7882_v61  ;;  %v9226_v60 = vld [vmem:[#allocation40_spill] sm:$0xff]  ;;  %v9227_v61 = vld [vmem:[#allocation41_spill] sm:$0xff] }
 0x63b   :  { %5839 = vmatpush1.bf16.msra.mxu0 %v7886_v21  ;;  %5871 = vmatpush1.bf16.msra.mxu1 %v7888_v30  ;;  %v9228_v21 = vld [vmem:[#allocation42_spill] sm:$0xff]  ;;  %v9229_v30 = vld [vmem:[#allocation43_spill] sm:$0xff] }
 0x63c   :  { %5841 = vmatprep.subr.bf16.mxu0 %v7892_v28  ;;  %5873 = vmatprep.subr.bf16.mxu1 %v7894_v47  ;;  %v9230_v28 = vld [vmem:[#allocation44_spill] sm:$0xff]  ;;  %v9231_v47 = vld [vmem:[#allocation45_spill] sm:$0xff] }
 0x63f   :  { %5843 = vmatpush1.bf16.msra.mxu0 %v7898_v17  ;;  %5875 = vmatpush1.bf16.msra.mxu1 %v7900_v49  ;;  %v9232_v17 = vld [vmem:[#allocation46_spill] sm:$0xff]  ;;  %v9233_v49 = vld [vmem:[#allocation47_spill] sm:$0xff] }
 0x640   :  { %5845 = vmatprep.subr.bf16.mxu0 %v7904_v38  ;;  %5877 = vmatprep.subr.bf16.mxu1 %v7906_v51  ;;  %v9234_v38 = vld [vmem:[#allocation48_spill] sm:$0xff]  ;;  %v9235_v51 = vld [vmem:[#allocation49_spill] sm:$0xff] }
 0x643   :  { %5847 = vmatpush1.bf16.msra.mxu0 %v7910_v7  ;;  %5879 = vmatpush1.bf16.msra.mxu1 %v7912_v2  ;;  %v9236_v7 = vld [vmem:[#allocation50_spill] sm:$0xff]  ;;  %v9237_v2 = vld [vmem:[#allocation51_spill] sm:$0xff] }
 0x644   :  { %5881 = vmatprep.subr.bf16.mxu0 %v7920_v3  ;;  %5945 = vmatprep.subr.bf16.mxu1 %v7922_v50  ;;  %v9238_v3 = vld [vmem:[#allocation52_spill] sm:$0xff]  ;;  %v9239_v50 = vld [vmem:[#allocation53_spill] sm:$0xff] }
 0x646   :  { %3250 = vmatmul.mubr.f32.vlgmr.msra.gmra.mrb[10].mxu0 %v2818_v46  ;;  %3321 = vmatmul.mubr.f32.vlgmr.msra.gmra.mrb[10].mxu1 %v2818_v46  ;;  %v9257_v46 = vld [vmem:[#allocation68_spill] sm:$0xff] }
 0x647   :  { %5883 = vmatpush1.bf16.msra.mxu0 %v7924_v29  ;;  %5947 = vmatpush1.bf16.msra.mxu1 %v7927_v4  ;;  %v9240_v29 = vld [vmem:[#allocation54_spill] sm:$0xff]  ;;  %v9241_v4 = vld [vmem:[#allocation55_spill] sm:$0xff] }
 0x648   :  { %5885 = vmatprep.subr.bf16.mxu0 %v9207_v45  ;;  %5949 = vmatprep.subr.bf16.mxu1 %v9208_v37  ;;  %v9258_v45 = vld [vmem:[#allocation69_spill] sm:$0xff]  ;;  %v9259_v37 = vld [vmem:[#allocation70_spill] sm:$0xff] }
 0x64b   :  { %5887 = vmatpush1.bf16.msra.mxu0 %v9209_v40  ;;  %5951 = vmatpush1.bf16.msra.mxu1 %v9210_v22  ;;  %v9260_v40 = vld [vmem:[#allocation71_spill] sm:$0xff]  ;;  %v9261_v22 = vld [vmem:[#allocation72_spill] sm:$0xff] }
 0x64c   :  { %5889 = vmatprep.subr.bf16.mxu0 %v9211_v36  ;;  %5953 = vmatprep.subr.bf16.mxu1 %v9212_v32  ;;  %v9262_v36 = vld [vmem:[#allocation73_spill] sm:$0xff] }
 0x64d   :  { %v3658_v32 = vld [vmem:[#allocation7 + $0x8] sm:$0xff] }
 0x64f   :  { %5891 = vmatpush1.bf16.msra.mxu0 %v9213_v33  ;;  %5955 = vmatpush1.bf16.msra.mxu1 %v9214_v26  ;;  %v3662_v33 = vld [vmem:[#allocation7 + $0x28] sm:$0xff]  ;;  %v3660_v26 = vld [vmem:[#allocation7 + $0x18] sm:$0xff] }
 0x650   :  { %5893 = vmatprep.subr.bf16.mxu0 %v9215_v55  ;;  %5957 = vmatprep.subr.bf16.mxu1 %v9216_v39  ;;  %v8229_v55 = vpack.c.bf16 %v3662_v33, %v3658_v32 }
 0x653   :  { %5895 = vmatpush1.bf16.msra.mxu0 %v9217_v6  ;;  %5959 = vmatpush1.bf16.msra.mxu1 %v9218_v35 }
 0x654   :  { %5897 = vmatprep.subr.bf16.mxu0 %v9219_v19  ;;  %5961 = vmatprep.subr.bf16.mxu1 %v9220_v52 }
 0x657   :  { %5899 = vmatpush1.bf16.msra.mxu0 %v9221_v59  ;;  %5963 = vmatpush1.bf16.msra.mxu1 %v9222_v0 }
 0x658   :  { %5901 = vmatprep.subr.bf16.mxu0 %v9223_v53  ;;  %5965 = vmatprep.subr.bf16.mxu1 %v9224_v1  ;;  %v9264_v53 = vld [vmem:[#allocation20_spill] sm:$0xff] }
 0x65b   :  { %5903 = vmatpush1.bf16.msra.mxu0 %v9225_v10  ;;  %5967 = vmatpush1.bf16.msra.mxu1 %v9226_v60 }
 0x65c   :  { %5905 = vmatprep.subr.bf16.mxu0 %v9227_v61  ;;  %5969 = vmatprep.subr.bf16.mxu1 %v9228_v21 }
 0x65f   :  { %5907 = vmatpush1.bf16.msra.mxu0 %v9229_v30  ;;  %5971 = vmatpush1.bf16.msra.mxu1 %v9230_v28 }
 0x660   :  { %5909 = vmatprep.subr.bf16.mxu0 %v9231_v47  ;;  %5973 = vmatprep.subr.bf16.mxu1 %v9232_v17 }
 0x663   :  { %5911 = vmatpush1.bf16.msra.mxu0 %v9233_v49  ;;  %5975 = vmatpush1.bf16.msra.mxu1 %v9234_v38 }
 0x664   :  { %5913 = vmatprep.subr.bf16.mxu0 %v9235_v51  ;;  %5977 = vmatprep.subr.bf16.mxu1 %v9236_v7 }
 0x667   :  { %5915 = vmatpush1.bf16.msra.mxu0 %v9237_v2  ;;  %5979 = vmatpush1.bf16.msra.mxu1 %v9238_v3 }
 0x668   :  { %5917 = vmatprep.subr.bf16.mxu0 %v9239_v50  ;;  %5981 = vmatprep.subr.bf16.mxu1 %v9240_v29 }
 0x66b   :  { %5919 = vmatpush1.bf16.msra.mxu0 %v9241_v4  ;;  %5983 = vmatpush1.bf16.msra.mxu1 %v9242_v18 }
 0x66c   :  { %5921 = vmatprep.subr.bf16.mxu0 %v9243_v48  ;;  %5985 = vmatprep.subr.bf16.mxu1 %v9244_v23 }
 0x66f   :  { %5923 = vmatpush1.bf16.msra.mxu0 %v9245_v58  ;;  %5987 = vmatpush1.bf16.msra.mxu1 %v9246_v5 }
 0x670   :  { %5925 = vmatprep.subr.bf16.mxu0 %v9247_v42  ;;  %5989 = vmatprep.subr.bf16.mxu1 %v9248_v62 }
 0x673   :  { %5927 = vmatpush1.bf16.msra.mxu0 %v9249_v11  ;;  %5991 = vmatpush1.bf16.msra.mxu1 %v9250_v14 }
 0x674   :  { %5929 = vmatprep.subr.bf16.mxu0 %v9251_v24  ;;  %5993 = vmatprep.subr.bf16.mxu1 %v9252_v15 }
 0x677   :  { %5931 = vmatpush1.bf16.msra.mxu0 %v9253_v25  ;;  %5995 = vmatpush1.bf16.msra.mxu1 %v9254_v56 }
 0x678   :  { %5933 = vmatprep.subr.bf16.mxu0 %v9255_v16  ;;  %5997 = vmatprep.subr.bf16.mxu1 %v9256_v57 }
 0x67b   :  { %5935 = vmatpush1.bf16.msra.mxu0 %v9257_v46  ;;  %5999 = vmatpush1.bf16.msra.mxu1 %v9258_v45 }
 0x67c   :  { %5937 = vmatprep.subr.bf16.mxu0 %v8087_v8  ;;  %6001 = vmatprep.subr.bf16.mxu1 %v8090_v27  ;;  %v3664_v8 = vld [vmem:[#allocation7 + $0x38] sm:$0xff] }
 0x67d   :  { %v8231_v39 = vpack.c.bf16 %v3664_v8, %v3660_v26  ;;  %v3657_v26 = vld [vmem:[#allocation7] sm:$0xff] }
 0x67e   :  { %v3661_v8 = vld [vmem:[#allocation7 + $0x20] sm:$0xff] }
 0x67f   :  { %5939 = vmatpush1.bf16.msra.mxu0 %v8092_v9  ;;  %6003 = vmatpush1.bf16.msra.mxu1 %v8095_v54  ;;  %v9263_v9 = vld [vmem:[#allocation19_spill] sm:$0xff] }
 0x680   :  { %5941 = vmatprep.subr.bf16.mxu0 %v9259_v37  ;;  %6005 = vmatprep.subr.bf16.mxu1 %v9260_v40 }
 0x683   :  { %5943 = vmatpush1.bf16.msra.mxu0 %v9261_v22  ;;  %6007 = vmatpush1.bf16.msra.mxu1 %v9262_v36 }
 0x684   :  { %6009 = vmatprep.subr.bf16.mxu0 %v8229_v55  ;;  %6041 = vmatprep.subr.bf16.mxu1 %v8231_v39 }
 0x6f9   :  { %v3013_v54 = vpop.f32.mrb[24].mxu0  ;;  %v3084_v27 = vpop.f32.mrb[24].mxu1 }
 0x6fa   :  { %v3014_v6 = vadd.f32 %v3013_v54, %v9263_v9  ;;  %v3015_v35 = vpop.f32.mrb[25].mxu0  ;;  %v3086_v19 = vpop.f32.mrb[25].mxu1  ;;  %v3085_v1 = vadd.f32 %v3084_v27, %v9264_v53  ;;  %v3659_v54 = vld [vmem:[#allocation7 + $0x10] sm:$0xff] }
 0x6fb   :  { %v3016_v52 = vadd.f32 %v3015_v35, %v7362_v31  ;;  %v3087_v10 = vadd.f32 %v3086_v19, %v7372_v44  ;;  %v3663_v27 = vld [vmem:[#allocation7 + $0x30] sm:$0xff]  ;;  %v3670_v35 = vld [vmem:[#allocation7 + $0x68] sm:$0xff]  ;;  %v3668_v19 = vld [vmem:[#allocation7 + $0x58] sm:$0xff] }
 0x6fc   :  { %v4766_v59 = vmul.f32 -1.442695, %v3014_v6  ;;  %v4768_v60 = vmul.f32 -1.442695, %v3085_v1  ;;  %v3666_v6 = vld [vmem:[#allocation7 + $0x48] sm:$0xff]  ;;  %v8254_v1 = vpack.c.bf16 %v3661_v8, %v3657_v26 }
 0x6fd   :  { %v4767_v0 = vmul.f32 -1.442695, %v3016_v52  ;;  %v3672_v52 = vld [vmem:[#allocation7 + $0x78] sm:$0xff] }
 0x6fe   :  { %6614 = vpow2.f32 %v4766_v59 }
 0x6ff   :  { %6616 = vpow2.f32 %v4767_v0 }
 0x700   :  { %6618 = vtanh.f32 %v3087_v10  ;;  %v8256_v10 = vpack.c.bf16 %v3663_v27, %v3659_v54  ;;  %v3691_v54 = vld [vmem:[#allocation7 + $0x110] sm:$0xff] }
 0x701   :  { %6620 = vpow2.f32 %v4768_v60  ;;  %v3669_v60 = vld [vmem:[#allocation7 + $0x60] sm:$0xff]  ;;  %v3695_v27 = vld [vmem:[#allocation7 + $0x130] sm:$0xff] }
 0x708   :  { %v6615_v61 = vpop.eup %6614 }
 0x709   :  { %v3098_v21 = vadd.f32 1.0, %v6615_v61  ;;  %v6617_v30 = vpop.eup %6616 }
 0x70a   :  { %v3099_v28 = vadd.f32 1.0, %v6617_v30  ;;  %v6619_v47 = vpop.eup %6618  ;;  %v8262_v30 = vpack.c.bf16 %v3672_v52, %v3668_v19  ;;  %v3700_v19 = vld [vmem:[#allocation7 + $0x158] sm:$0xff] }
 0x70b   :  { %6622 = vrcp.f32 %v3098_v21  ;;  %v6621_v17 = vpop.eup %6620  ;;  %v8260_v21 = vpack.c.bf16 %v3670_v35, %v3666_v6  ;;  %v3698_v6 = vld [vmem:[#allocation7 + $0x148] sm:$0xff]  ;;  %v3704_v52 = vld [vmem:[#allocation7 + $0x178] sm:$0xff] }
 0x70c   :  { %6624 = vrcp.f32 %v3099_v28  ;;  %v3100_v7 = vadd.f32 1.0, %v6621_v17  ;;  %v3667_v28 = vld [vmem:[#allocation7 + $0x50] sm:$0xff]  ;;  %v3674_v17 = vld [vmem:[#allocation7 + $0x88] sm:$0xff] }
 0x70d   :  { %v3702_v35 = vld [vmem:[#allocation7 + $0x168] sm:$0xff] }
 0x70e   :  { %6626 = vrcp.f32 %v3100_v7 }
 0x715   :  { %v6623_v49 = vpop.eup %6622 }
 0x716   :  { %v3109_v38 = vmul.f32 %v6623_v49, %v6619_v47  ;;  %v6625_v51 = vpop.eup %6624  ;;  %v3671_v47 = vld [vmem:[#allocation7 + $0x70] sm:$0xff]  ;;  %v3678_v49 = vld [vmem:[#allocation7 + $0xa8] sm:$0xff] }
 0x717   :  { %v3108_v2 = vmul.f32 %v6625_v51, %v8119_v20  ;;  %v3680_v51 = vld [vmem:[#allocation7 + $0xb8] sm:$0xff] }
 0x718   :  { %v6627_v62 = vpop.eup %6626 }
 0x719   :  { %v3251_v3 = vpop.f32.mrb[10].mxu0  ;;  %v3322_v50 = vpop.f32.mrb[10].mxu1  ;;  %v8240_v29 = vadd.f32 %v3109_v38, %v3108_v2  ;;  %v3676_v38 = vld [vmem:[#allocation7 + $0x98] sm:$0xff]  ;;  %v8270_v2 = vpack.c.bf16 %v3671_v47, %v3667_v28  ;;  %v8312_v28 = vpack.c.bf16 %v3702_v35, %v3698_v6  ;;  %v8314_v47 = vpack.c.bf16 %v3704_v52, %v3700_v19  ;;  %v3715_v6 = vld [vmem:[#allocation7 + $0x1d0] sm:$0xff] }
 0x71a   :  { %v6402_v4 = vadd.f32 %v3251_v3, %v9035_v63  ;;  %v3253_v18 = vpop.f32.mrb[11].mxu0  ;;  %v3324_v48 = vpop.f32.mrb[11].mxu1  ;;  %v6418_v42 = vadd.f32 %v3322_v50, %v6904_v12  ;;  %v3673_v3 = vld [vmem:[#allocation7 + $0x80] sm:$0xff]  ;;  %v3719_v35 = vld [vmem:[#allocation7 + $0x1f0] sm:$0xff] }
 0x71b   :  { %v6403_v23 = vadd.f32 %v3253_v18, %v9036_v34  ;;  %6628 = vtanh.f32 %v8240_v29  ;;  %v6419_v20 = vadd.f32 %v3324_v48, %v6908_v13  ;;  %v3677_v50 = vld [vmem:[#allocation7 + $0xa0] sm:$0xff]  ;;  %v8276_v18 = vpack.c.bf16 %v3680_v51, %v3676_v38  ;;  %v3675_v48 = vld [vmem:[#allocation7 + $0x90] sm:$0xff]  ;;  %v3706_v38 = vld [vmem:[#allocation7 + $0x188] sm:$0xff] }
 0x71c   :  { %v4770_v58 = vmul.f32 -1.442695, %v6402_v4  ;;  %v4772_v14 = vmul.f32 -1.442695, %v6418_v42  ;;  %v8274_v4 = vpack.c.bf16 %v3678_v49, %v3674_v17  ;;  %v3684_v42 = vld [vmem:[#allocation7 + $0xd8] sm:$0xff]  ;;  %v3699_v17 = vld [vmem:[#allocation7 + $0x150] sm:$0xff]  ;;  %v8344_v52 = vpack.c.bf16 %v3719_v35, %v3715_v6 }
 0x71d   :  { %v4771_v5 = vmul.f32 -1.442695, %v6403_v23  ;;  %v3679_v23 = vld [vmem:[#allocation7 + $0xb0] sm:$0xff]  ;;  %v3710_v51 = vld [vmem:[#allocation7 + $0x1a8] sm:$0xff] }
 0x71e   :  { %6630 = vpow2.f32 %v4770_v58  ;;  %v3682_v58 = vld [vmem:[#allocation7 + $0xc8] sm:$0xff]  ;;  %v3703_v49 = vld [vmem:[#allocation7 + $0x170] sm:$0xff] }
 0x71f   :  { %6632 = vpow2.f32 %v4771_v5  ;;  %v3686_v5 = vld [vmem:[#allocation7 + $0xe8] sm:$0xff] }
 0x720   :  { %6634 = vtanh.f32 %v6419_v20  ;;  %v3688_v20 = vld [vmem:[#allocation7 + $0xf8] sm:$0xff] }
 0x725   :  { %v6629_v11 = vpop.eup %6628 }
 0x726   :  { %v3112_v24 = vmul.f32 %v6629_v11, %v6627_v62  ;;  %v8282_v62 = vpack.c.bf16 %v3677_v50, %v3673_v3  ;;  %v8284_v11 = vpack.c.bf16 %v3679_v23, %v3675_v48  ;;  %v3708_v3 = vld [vmem:[#allocation7 + $0x198] sm:$0xff]  ;;  %v8320_v23 = vpack.c.bf16 %v3703_v49, %v3699_v17 }
 0x727   :  { %v3712_v50 = vld [vmem:[#allocation7 + $0x1b8] sm:$0xff] }
 0x728   :  { %v6631_v15 = vpop.eup %6630  ;;  %6636 = vtanh.f32 %v3112_v24  ;;  %3547 = vmatprep.mubr.f32.mxu0 %v3112_v24  ;;  %3618 = vmatprep.mubr.f32.mxu1 %v3112_v24  ;;  %v3685_v24 = vld [vmem:[#allocation7 + $0xe0] sm:$0xff]  ;;  %v3894_v17 = vld [vmem:[#allocation3 + $0x18] sm:$0xff] }
 0x729   :  { %v3340_v25 = vadd.f32 1.0, %v6631_v15  ;;  %v6633_v56 = vpop.eup %6632  ;;  %6638 = vpow2.f32 %v4772_v14  ;;  %v3681_v14 = vld [vmem:[#allocation7 + $0xc0] sm:$0xff]  ;;  %v8288_v15 = vpack.c.bf16 %v3686_v5, %v3682_v58 }
 0x72a   :  { %v3341_v16 = vadd.f32 1.0, %v6633_v56  ;;  %v6635_v57 = vpop.eup %6634  ;;  %v3683_v56 = vld [vmem:[#allocation7 + $0xd0] sm:$0xff]  ;;  %v3705_v58 = vld [vmem:[#allocation7 + $0x180] sm:$0xff] }
 0x72b   :  { %6640 = vrcp.f32 %v3340_v25  ;;  %v8290_v25 = vpack.c.bf16 %v3688_v20, %v3684_v42  ;;  %v3709_v5 = vld [vmem:[#allocation7 + $0x1a0] sm:$0xff]  ;;  %v8324_v42 = vpack.c.bf16 %v3710_v51, %v3706_v38  ;;  %v8326_v20 = vpack.c.bf16 %v3712_v50, %v3708_v3  ;;  %v3898_v38 = vld [vmem:[#allocation3 + $0x38] sm:$0xff] }
 0x72c   :  { %6642 = vrcp.f32 %v3341_v16  ;;  %v3687_v16 = vld [vmem:[#allocation7 + $0xf0] sm:$0xff]  ;;  %v3891_v51 = vld [vmem:[#allocation3] sm:$0xff]  ;;  %v8354_v50 = vpack.c.bf16 %v3898_v38, %v3894_v17  ;;  %v3908_v38 = vld [vmem:[#allocation3 + $0x88] sm:$0xff] }
 0x72d   :  { %v3895_v3 = vld [vmem:[#allocation3 + $0x20] sm:$0xff] }
 0x732   :  { %v6637_v46 = vpop.eup %6636 }
 0x733   :  { %v6639_v45 = vpop.eup %6638  ;;  %4769 = vst [vmem:[%s8691_s6 + $0x20] sm:$0xff] %v6637_v46  ;;  %v3694_v46 = vld [vmem:[#allocation7 + $0x128] sm:$0xff] }
 0x734   :  { %v3342_v36 = vadd.f32 1.0, %v6639_v45  ;;  %v3692_v45 = vld [vmem:[#allocation7 + $0x118] sm:$0xff] }
 0x735   :  { %v6641_v37 = vpop.eup %6640 }
 0x736   :  { %v3351_v40 = vmul.f32 %v6641_v37, %v6635_v57  ;;  %v6643_v22 = vpop.eup %6642  ;;  %6644 = vrcp.f32 %v3342_v36  ;;  %v3690_v57 = vld [vmem:[#allocation7 + $0x108] sm:$0xff]  ;;  %v3696_v37 = vld [vmem:[#allocation7 + $0x138] sm:$0xff]  ;;  %v3689_v36 = vld [vmem:[#allocation7 + $0x100] sm:$0xff] }
 0x737   :  { %v3350_v32 = vmul.f32 %v6643_v22, %v8130_v41  ;;  %v3665_v41 = vld [vmem:[#allocation7 + $0x40] sm:$0xff]  ;;  %v8296_v22 = vpack.c.bf16 %v3687_v16, %v3683_v56  ;;  %v8300_v26 = vpack.c.bf16 %v3694_v46, %v3690_v57  ;;  %v8302_v8 = vpack.c.bf16 %v3696_v37, %v3692_v45  ;;  %v3714_v56 = vld [vmem:[#allocation7 + $0x1c8] sm:$0xff]  ;;  %v3716_v57 = vld [vmem:[#allocation7 + $0x1d8] sm:$0xff] }
 0x738   :  { %v8268_v7 = vpack.c.bf16 %v3669_v60, %v3665_v41  ;;  %v3697_v41 = vld [vmem:[#allocation7 + $0x140] sm:$0xff]  ;;  %v3718_v16 = vld [vmem:[#allocation7 + $0x1e8] sm:$0xff]  ;;  %v3720_v46 = vld [vmem:[#allocation7 + $0x1f8] sm:$0xff]  ;;  %v8330_v45 = vpack.c.bf16 %v3709_v5, %v3705_v58  ;;  %v8356_v58 = vpack.c.bf16 %v3895_v3, %v3891_v51 }
 0x739   :  { %v8251_v33 = vadd.f32 %v3351_v40, %v3350_v32  ;;  %v8294_v40 = vpack.c.bf16 %v3685_v24, %v3681_v14  ;;  %v3693_v32 = vld [vmem:[#allocation7 + $0x120] sm:$0xff]  ;;  %v3707_v14 = vld [vmem:[#allocation7 + $0x190] sm:$0xff]  ;;  %v3912_v51 = vld [vmem:[#allocation3 + $0xa8] sm:$0xff] }
 0x73a   :  { %v3701_v60 = vld [vmem:[#allocation7 + $0x160] sm:$0xff]  ;;  %v3711_v24 = vld [vmem:[#allocation7 + $0x1b0] sm:$0xff]  ;;  %v3910_v3 = vld [vmem:[#allocation3 + $0x98] sm:$0xff] }
 0x73b   :  { %6646 = vtanh.f32 %v8251_v33  ;;  %v8318_v48 = vpack.c.bf16 %v3701_v60, %v3697_v41  ;;  %v8332_v37 = vpack.c.bf16 %v3711_v24, %v3707_v14  ;;  %v3892_v41 = vld [vmem:[#allocation3 + $0x8] sm:$0xff]  ;;  %v3893_v5 = vld [vmem:[#allocation3 + $0x10] sm:$0xff] }
 0x73c   :  { %v3896_v60 = vld [vmem:[#allocation3 + $0x28] sm:$0xff]  ;;  %v3897_v14 = vld [vmem:[#allocation3 + $0x30] sm:$0xff] }
 0x73d   :  { %v8352_v49 = vpack.c.bf16 %v3896_v60, %v3892_v41  ;;  %v8359_v24 = vpack.c.bf16 %v3897_v14, %v3893_v5  ;;  %v3901_v41 = vld [vmem:[#allocation3 + $0x50] sm:$0xff]  ;;  %v8376_v5 = vpack.c.bf16 %v3912_v51, %v3908_v38  ;;  %v3914_v14 = vld [vmem:[#allocation3 + $0xb8] sm:$0xff]  ;;  %v3920_v38 = vld [vmem:[#allocation3 + $0xe8] sm:$0xff] }
 0x73e   :  { %v3905_v60 = vld [vmem:[#allocation3 + $0x70] sm:$0xff]  ;;  %v3918_v51 = vld [vmem:[#allocation3 + $0xd8] sm:$0xff] }
 0x73f   :  { %v8371_v17 = vpack.c.bf16 %v3905_v60, %v3901_v41  ;;  %9269 = vst [vmem:[#allocation26_spill] sm:$0xff] %v8376_v5  ;;  %v3916_v60 = vld [vmem:[#allocation3 + $0xc8] sm:$0xff] }
 0x740   :  { %v6645_v59 = vpop.eup %6644 }
 0x741   :  { %9268 = vst [vmem:[#allocation22_spill] sm:$0xff] %v8371_v17 }
 0x745   :  { %v6647_v0 = vpop.eup %6646 }
 0x746   :  { %v8258_v61 = vmul.f32 %v6647_v0, %v6645_v59  ;;  %v8306_v59 = vpack.c.bf16 %v3693_v32, %v3689_v36  ;;  %v8308_v0 = vpack.c.bf16 %v3695_v27, %v3691_v54  ;;  %v3713_v36 = vld [vmem:[#allocation7 + $0x1c0] sm:$0xff]  ;;  %v8336_v32 = vpack.c.bf16 %v3718_v16, %v3714_v56  ;;  %v3904_v56 = vld [vmem:[#allocation3 + $0x68] sm:$0xff]  ;;  %v3902_v16 = vld [vmem:[#allocation3 + $0x58] sm:$0xff] }
 0x747   :  { %v8338_v54 = vpack.c.bf16 %v3720_v46, %v3716_v57  ;;  %v3717_v27 = vld [vmem:[#allocation7 + $0x1e0] sm:$0xff]  ;;  %v3906_v46 = vld [vmem:[#allocation3 + $0x78] sm:$0xff] }
 0x748   :  { %3548 = vmatmul.mubr.f32.vlgmr.msra.gmra.mrb[26].mxu0 %v8258_v61  ;;  %3619 = vmatmul.mubr.f32.vlgmr.msra.gmra.mrb[26].mxu1 %v8258_v61  ;;  %v8342_v19 = vpack.c.bf16 %v3717_v27, %v3713_v36  ;;  %v3899_v36 = vld [vmem:[#allocation3 + $0x40] sm:$0xff]  ;;  %v8366_v6 = vpack.c.bf16 %v3906_v46, %v3902_v16  ;;  %v8378_v16 = vpack.c.bf16 %v3914_v14, %v3910_v3  ;;  %v3922_v3 = vld [vmem:[#allocation3 + $0xf8] sm:$0xff] }
 0x749   :  { %6011 = vmatpush1.bf16.msra.mxu0 %v8254_v1  ;;  %6043 = vmatpush1.bf16.msra.mxu1 %v8256_v10  ;;  %v3903_v27 = vld [vmem:[#allocation3 + $0x60] sm:$0xff] }
 0x74a   :  { %6013 = vmatprep.subr.bf16.mxu0 %v8260_v21  ;;  %6045 = vmatprep.subr.bf16.mxu1 %v8262_v30  ;;  %9266 = vst [vmem:[#allocation21_spill] sm:$0xff] %v8366_v6  ;;  %v8368_v35 = vpack.c.bf16 %v3903_v27, %v3899_v36  ;;  %9270 = vst [vmem:[#allocation24_spill] sm:$0xff] %v8378_v16  ;;  %v3909_v36 = vld [vmem:[#allocation3 + $0x90] sm:$0xff]  ;;  %v3915_v14 = vld [vmem:[#allocation3 + $0xc0] sm:$0xff] }
 0x74b   :  { %3785 = vmatprep.mubr.f32.mxu0 %v8979_v43  ;;  %3856 = vmatprep.mubr.f32.mxu1 %v8979_v43  ;;  %v3913_v27 = vld [vmem:[#allocation3 + $0xb0] sm:$0xff] }
 0x74c   :  { %9267 = vst [vmem:[#allocation25_spill] sm:$0xff] %v8368_v35  ;;  %v8383_v41 = vpack.c.bf16 %v3913_v27, %v3909_v36  ;;  %v3917_v36 = vld [vmem:[#allocation3 + $0xd0] sm:$0xff] }
 0x74d   :  { %6015 = vmatpush1.bf16.msra.mxu0 %v8268_v7  ;;  %6047 = vmatpush1.bf16.msra.mxu1 %v8270_v2  ;;  %v3921_v27 = vld [vmem:[#allocation3 + $0xf0] sm:$0xff] }
 0x74e   :  { %6017 = vmatprep.subr.bf16.mxu0 %v8274_v4  ;;  %6049 = vmatprep.subr.bf16.mxu1 %v8276_v18  ;;  %9272 = vst [vmem:[#allocation28_spill] sm:$0xff] %v8383_v41 }
 0x751   :  { %6019 = vmatpush1.bf16.msra.mxu0 %v8282_v62  ;;  %6051 = vmatpush1.bf16.msra.mxu1 %v8284_v11 }
 0x752   :  { %6021 = vmatprep.subr.bf16.mxu0 %v8288_v15  ;;  %6053 = vmatprep.subr.bf16.mxu1 %v8290_v25 }
 0x755   :  { %6023 = vmatpush1.bf16.msra.mxu0 %v8294_v40  ;;  %6055 = vmatpush1.bf16.msra.mxu1 %v8296_v22 }
 0x756   :  { %6025 = vmatprep.subr.bf16.mxu0 %v8300_v26  ;;  %6057 = vmatprep.subr.bf16.mxu1 %v8302_v8 }
 0x759   :  { %6027 = vmatpush1.bf16.msra.mxu0 %v8306_v59  ;;  %6059 = vmatpush1.bf16.msra.mxu1 %v8308_v0 }
 0x75a   :  { %6029 = vmatprep.subr.bf16.mxu0 %v8312_v28  ;;  %6061 = vmatprep.subr.bf16.mxu1 %v8314_v47 }
 0x75d   :  { %6031 = vmatpush1.bf16.msra.mxu0 %v8318_v48  ;;  %6063 = vmatpush1.bf16.msra.mxu1 %v8320_v23 }
 0x75e   :  { %6033 = vmatprep.subr.bf16.mxu0 %v8324_v42  ;;  %6065 = vmatprep.subr.bf16.mxu1 %v8326_v20 }
 0x761   :  { %6035 = vmatpush1.bf16.msra.mxu0 %v8330_v45  ;;  %6067 = vmatpush1.bf16.msra.mxu1 %v8332_v37 }
 0x762   :  { %6037 = vmatprep.subr.bf16.mxu0 %v8336_v32  ;;  %6069 = vmatprep.subr.bf16.mxu1 %v8338_v54 }
 0x765   :  { %6039 = vmatpush1.bf16.msra.mxu0 %v8342_v19  ;;  %6071 = vmatpush1.bf16.msra.mxu1 %v8344_v52 }
 0x766   :  { %6073 = vmatprep.subr.bf16.mxu0 %v8352_v49  ;;  %6137 = vmatprep.subr.bf16.mxu1 %v8354_v50 }
 0x768   :  { %3786 = vmatmul.mubr.f32.vlgmr.msra.gmra.mrb[12].mxu0 %v8258_v61  ;;  %3857 = vmatmul.mubr.f32.vlgmr.msra.gmra.mrb[12].mxu1 %v8258_v61  ;;  %v3900_v61 = vld [vmem:[#allocation3 + $0x48] sm:$0xff] }
 0x769   :  { %6075 = vmatpush1.bf16.msra.mxu0 %v8356_v58  ;;  %6139 = vmatpush1.bf16.msra.mxu1 %v8359_v24  ;;  %v8364_v57 = vpack.c.bf16 %v3904_v56, %v3900_v61  ;;  %v3907_v61 = vld [vmem:[#allocation3 + $0x80] sm:$0xff] }
 0x76a   :  { %6141 = vmatprep.subr.bf16.mxu1 %v8366_v6  ;;  %v3911_v56 = vld [vmem:[#allocation3 + $0xa0] sm:$0xff]  ;;  %v4006_v6 = vld [vmem:[#allocation3 + $0x398] sm:$0xff] }
 0x76b   :  { %9265 = vst [vmem:[#allocation23_spill] sm:$0xff] %v8364_v57  ;;  %6077 = vmatprep.subr.bf16.mxu0 %v8364_v57  ;;  %v8380_v46 = vpack.c.bf16 %v3911_v56, %v3907_v61  ;;  %v3919_v61 = vld [vmem:[#allocation3 + $0xe0] sm:$0xff]  ;;  %v8390_v56 = vpack.c.bf16 %v3922_v3, %v3918_v51  ;;  %v3930_v51 = vld [vmem:[#allocation3 + $0x138] sm:$0xff] }
 0x76c   :  { %v3923_v3 = vld [vmem:[#allocation3 + $0x100] sm:$0xff] }
 0x76d   :  { %6079 = vmatpush1.bf16.msra.mxu0 %v8368_v35  ;;  %6143 = vmatpush1.bf16.msra.mxu1 %v8371_v17  ;;  %9271 = vst [vmem:[#allocation27_spill] sm:$0xff] %v8380_v46  ;;  %v8388_v17 = vpack.c.bf16 %v3920_v38, %v3916_v60  ;;  %9274 = vst [vmem:[#allocation30_spill] sm:$0xff] %v8390_v56  ;;  %v8392_v35 = vpack.c.bf16 %v3919_v61, %v3915_v14  ;;  %v3928_v60 = vld [vmem:[#allocation3 + $0x128] sm:$0xff]  ;;  %v3926_v38 = vld [vmem:[#allocation3 + $0x118] sm:$0xff] }
 0x76e   :  { %6081 = vmatprep.subr.bf16.mxu0 %v8376_v5  ;;  %6145 = vmatprep.subr.bf16.mxu1 %v8378_v16  ;;  %v8395_v16 = vpack.c.bf16 %v3921_v27, %v3917_v36  ;;  %v3927_v14 = vld [vmem:[#allocation3 + $0x120] sm:$0xff]  ;;  %v8402_v61 = vpack.c.bf16 %v3930_v51, %v3926_v38  ;;  %v3925_v36 = vld [vmem:[#allocation3 + $0x110] sm:$0xff]  ;;  %v3938_v38 = vld [vmem:[#allocation3 + $0x178] sm:$0xff] }
 0x76f   :  { %9273 = vst [vmem:[#allocation29_spill] sm:$0xff] %v8388_v17  ;;  %9275 = vst [vmem:[#allocation31_spill] sm:$0xff] %v8392_v35  ;;  %v8404_v5 = vpack.c.bf16 %v3927_v14, %v3923_v3  ;;  %v3929_v27 = vld [vmem:[#allocation3 + $0x130] sm:$0xff]  ;;  %v3931_v51 = vld [vmem:[#allocation3 + $0x140] sm:$0xff] }
 0x770   :  { %9276 = vst [vmem:[#allocation32_spill] sm:$0xff] %v8395_v16  ;;  %9278 = vst [vmem:[#allocation34_spill] sm:$0xff] %v8402_v61  ;;  %v3935_v3 = vld [vmem:[#allocation3 + $0x160] sm:$0xff] }
 0x771   :  { %6083 = vmatpush1.bf16.msra.mxu0 %v8380_v46  ;;  %6147 = vmatpush1.bf16.msra.mxu1 %v8383_v41  ;;  %v3924_v41 = vld [vmem:[#allocation3 + $0x108] sm:$0xff]  ;;  %9279 = vst [vmem:[#allocation35_spill] sm:$0xff] %v8404_v5 }
 0x772   :  { %6085 = vmatprep.subr.bf16.mxu0 %v8388_v17  ;;  %6149 = vmatprep.subr.bf16.mxu1 %v8390_v56  ;;  %v8400_v46 = vpack.c.bf16 %v3928_v60, %v3924_v41  ;;  %v8407_v56 = vpack.c.bf16 %v3929_v27, %v3925_v36  ;;  %v3932_v41 = vld [vmem:[#allocation3 + $0x148] sm:$0xff]  ;;  %v8416_v17 = vpack.c.bf16 %v3935_v3, %v3931_v51  ;;  %v3933_v36 = vld [vmem:[#allocation3 + $0x150] sm:$0xff]  ;;  %v3943_v51 = vld [vmem:[#allocation3 + $0x1a0] sm:$0xff] }
 0x773   :  { %v3936_v60 = vld [vmem:[#allocation3 + $0x168] sm:$0xff]  ;;  %v3937_v27 = vld [vmem:[#allocation3 + $0x170] sm:$0xff] }
 0x774   :  { %9277 = vst [vmem:[#allocation33_spill] sm:$0xff] %v8400_v46  ;;  %9280 = vst [vmem:[#allocation36_spill] sm:$0xff] %v8407_v56 }
 0x775   :  { %6087 = vmatpush1.bf16.msra.mxu0 %v8392_v35  ;;  %6151 = vmatpush1.bf16.msra.mxu1 %v8395_v16  ;;  %v3934_v16 = vld [vmem:[#allocation3 + $0x158] sm:$0xff]  ;;  %v8412_v35 = vpack.c.bf16 %v3936_v60, %v3932_v41  ;;  %9283 = vst [vmem:[#allocation39_spill] sm:$0xff] %v8416_v17  ;;  %v3944_v41 = vld [vmem:[#allocation3 + $0x1a8] sm:$0xff] }
 0x776   :  { %6089 = vmatprep.subr.bf16.mxu0 %v8400_v46  ;;  %6153 = vmatprep.subr.bf16.mxu1 %v8402_v61  ;;  %v8414_v14 = vpack.c.bf16 %v3938_v38, %v3934_v16  ;;  %v8419_v61 = vpack.c.bf16 %v3937_v27, %v3933_v36  ;;  %v3942_v60 = vld [vmem:[#allocation3 + $0x198] sm:$0xff]  ;;  %v3939_v38 = vld [vmem:[#allocation3 + $0x180] sm:$0xff]  ;;  %v3941_v36 = vld [vmem:[#allocation3 + $0x190] sm:$0xff] }
 0x777   :  { %9281 = vst [vmem:[#allocation37_spill] sm:$0xff] %v8412_v35  ;;  %v3946_v16 = vld [vmem:[#allocation3 + $0x1b8] sm:$0xff]  ;;  %v8428_v46 = vpack.c.bf16 %v3943_v51, %v3939_v38  ;;  %v3945_v27 = vld [vmem:[#allocation3 + $0x1b0] sm:$0xff]  ;;  %v3951_v38 = vld [vmem:[#allocation3 + $0x1e0] sm:$0xff] }
 0x778   :  { %9282 = vst [vmem:[#allocation38_spill] sm:$0xff] %v8414_v14  ;;  %9284 = vst [vmem:[#allocation40_spill] sm:$0xff] %v8419_v61  ;;  %v8426_v3 = vpack.c.bf16 %v3946_v16, %v3942_v60  ;;  %v3954_v60 = vld [vmem:[#allocation3 + $0x1f8] sm:$0xff]  ;;  %v3947_v16 = vld [vmem:[#allocation3 + $0x1c0] sm:$0xff] }
 0x779   :  { %6091 = vmatpush1.bf16.msra.mxu0 %v8404_v5  ;;  %6155 = vmatpush1.bf16.msra.mxu1 %v8407_v56  ;;  %v3940_v56 = vld [vmem:[#allocation3 + $0x188] sm:$0xff]  ;;  %9287 = vst [vmem:[#allocation43_spill] sm:$0xff] %v8428_v46 }
 0x77a   :  { %6093 = vmatprep.subr.bf16.mxu0 %v8412_v35  ;;  %6157 = vmatprep.subr.bf16.mxu1 %v8414_v14  ;;  %v8424_v5 = vpack.c.bf16 %v3944_v41, %v3940_v56  ;;  %9286 = vst [vmem:[#allocation42_spill] sm:$0xff] %v8426_v3  ;;  %v8431_v14 = vpack.c.bf16 %v3945_v27, %v3941_v36  ;;  %v3952_v56 = vld [vmem:[#allocation3 + $0x1e8] sm:$0xff]  ;;  %v3950_v41 = vld [vmem:[#allocation3 + $0x1d8] sm:$0xff]  ;;  %v3949_v36 = vld [vmem:[#allocation3 + $0x1d0] sm:$0xff] }
 0x77b   :  { %v8438_v51 = vpack.c.bf16 %v3954_v60, %v3950_v41  ;;  %v8440_v35 = vpack.c.bf16 %v3951_v38, %v3947_v16  ;;  %v3953_v27 = vld [vmem:[#allocation3 + $0x1f0] sm:$0xff]  ;;  %v3962_v41 = vld [vmem:[#allocation3 + $0x238] sm:$0xff]  ;;  %v3955_v60 = vld [vmem:[#allocation3 + $0x200] sm:$0xff] }
 0x77c   :  { %9285 = vst [vmem:[#allocation41_spill] sm:$0xff] %v8424_v5  ;;  %9288 = vst [vmem:[#allocation44_spill] sm:$0xff] %v8431_v14  ;;  %v3959_v16 = vld [vmem:[#allocation3 + $0x220] sm:$0xff] }
 0x77d   :  { %6095 = vmatpush1.bf16.msra.mxu0 %v8416_v17  ;;  %6159 = vmatpush1.bf16.msra.mxu1 %v8419_v61  ;;  %v3948_v61 = vld [vmem:[#allocation3 + $0x1c8] sm:$0xff]  ;;  %9290 = vst [vmem:[#allocation46_spill] sm:$0xff] %v8438_v51  ;;  %9291 = vst [vmem:[#allocation47_spill] sm:$0xff] %v8440_v35 }
 0x77e   :  { %6097 = vmatprep.subr.bf16.mxu0 %v8424_v5  ;;  %6161 = vmatprep.subr.bf16.mxu1 %v8426_v3  ;;  %v8436_v17 = vpack.c.bf16 %v3952_v56, %v3948_v61  ;;  %v8443_v3 = vpack.c.bf16 %v3953_v27, %v3949_v36  ;;  %v3960_v61 = vld [vmem:[#allocation3 + $0x228] sm:$0xff]  ;;  %v3958_v56 = vld [vmem:[#allocation3 + $0x218] sm:$0xff]  ;;  %v8452_v5 = vpack.c.bf16 %v3959_v16, %v3955_v60  ;;  %v3957_v36 = vld [vmem:[#allocation3 + $0x210] sm:$0xff] }
 0x77f   :  { %v8450_v38 = vpack.c.bf16 %v3962_v41, %v3958_v56  ;;  %v3961_v27 = vld [vmem:[#allocation3 + $0x230] sm:$0xff]  ;;  %v3970_v56 = vld [vmem:[#allocation3 + $0x278] sm:$0xff]  ;;  %v3963_v41 = vld [vmem:[#allocation3 + $0x240] sm:$0xff] }
 0x780   :  { %9289 = vst [vmem:[#allocation45_spill] sm:$0xff] %v8436_v17  ;;  %9292 = vst [vmem:[#allocation48_spill] sm:$0xff] %v8443_v3  ;;  %v3967_v60 = vld [vmem:[#allocation3 + $0x260] sm:$0xff] }
 0x781   :  { %6099 = vmatpush1.bf16.msra.mxu0 %v8428_v46  ;;  %6163 = vmatpush1.bf16.msra.mxu1 %v8431_v14  ;;  %v3956_v14 = vld [vmem:[#allocation3 + $0x208] sm:$0xff]  ;;  %9294 = vst [vmem:[#allocation50_spill] sm:$0xff] %v8450_v38  ;;  %9295 = vst [vmem:[#allocation51_spill] sm:$0xff] %v8452_v5 }
 0x782   :  { %6101 = vmatprep.subr.bf16.mxu0 %v8436_v17  ;;  %6165 = vmatprep.subr.bf16.mxu1 %v8438_v51  ;;  %v8448_v46 = vpack.c.bf16 %v3960_v61, %v3956_v14  ;;  %v8455_v51 = vpack.c.bf16 %v3961_v27, %v3957_v36  ;;  %v3968_v14 = vld [vmem:[#allocation3 + $0x268] sm:$0xff]  ;;  %v3966_v61 = vld [vmem:[#allocation3 + $0x258] sm:$0xff]  ;;  %v8464_v17 = vpack.c.bf16 %v3967_v60, %v3963_v41  ;;  %v3965_v36 = vld [vmem:[#allocation3 + $0x250] sm:$0xff] }
 0x783   :  { %v8462_v16 = vpack.c.bf16 %v3970_v56, %v3966_v61  ;;  %v3969_v27 = vld [vmem:[#allocation3 + $0x270] sm:$0xff]  ;;  %v3978_v61 = vld [vmem:[#allocation3 + $0x2b8] sm:$0xff]  ;;  %v3971_v56 = vld [vmem:[#allocation3 + $0x280] sm:$0xff] }
 0x784   :  { %9293 = vst [vmem:[#allocation49_spill] sm:$0xff] %v8448_v46  ;;  %9296 = vst [vmem:[#allocation52_spill] sm:$0xff] %v8455_v51  ;;  %v3975_v41 = vld [vmem:[#allocation3 + $0x2a0] sm:$0xff] }
 0x785   :  { %6103 = vmatpush1.bf16.msra.mxu0 %v8440_v35  ;;  %6167 = vmatpush1.bf16.msra.mxu1 %v8443_v3  ;;  %v3964_v3 = vld [vmem:[#allocation3 + $0x248] sm:$0xff]  ;;  %9298 = vst [vmem:[#allocation54_spill] sm:$0xff] %v8462_v16  ;;  %9299 = vst [vmem:[#allocation55_spill] sm:$0xff] %v8464_v17 }
 0x786   :  { %6105 = vmatprep.subr.bf16.mxu0 %v8448_v46  ;;  %6169 = vmatprep.subr.bf16.mxu1 %v8450_v38  ;;  %v8460_v35 = vpack.c.bf16 %v3968_v14, %v3964_v3  ;;  %v8467_v38 = vpack.c.bf16 %v3969_v27, %v3965_v36  ;;  %v3976_v3 = vld [vmem:[#allocation3 + $0x2a8] sm:$0xff]  ;;  %v3974_v14 = vld [vmem:[#allocation3 + $0x298] sm:$0xff]  ;;  %v8476_v46 = vpack.c.bf16 %v3975_v41, %v3971_v56  ;;  %v3973_v36 = vld [vmem:[#allocation3 + $0x290] sm:$0xff] }
 0x787   :  { %v8474_v60 = vpack.c.bf16 %v3978_v61, %v3974_v14  ;;  %v3977_v27 = vld [vmem:[#allocation3 + $0x2b0] sm:$0xff]  ;;  %v3986_v14 = vld [vmem:[#allocation3 + $0x2f8] sm:$0xff]  ;;  %v3979_v61 = vld [vmem:[#allocation3 + $0x2c0] sm:$0xff] }
 0x788   :  { %9297 = vst [vmem:[#allocation53_spill] sm:$0xff] %v8460_v35  ;;  %9300 = vst [vmem:[#allocation56_spill] sm:$0xff] %v8467_v38  ;;  %v3983_v56 = vld [vmem:[#allocation3 + $0x2e0] sm:$0xff] }
 0x789   :  { %6107 = vmatpush1.bf16.msra.mxu0 %v8452_v5  ;;  %6171 = vmatpush1.bf16.msra.mxu1 %v8455_v51  ;;  %v3972_v51 = vld [vmem:[#allocation3 + $0x288] sm:$0xff]  ;;  %9302 = vst [vmem:[#allocation58_spill] sm:$0xff] %v8474_v60  ;;  %9303 = vst [vmem:[#allocation59_spill] sm:$0xff] %v8476_v46 }
 0x78a   :  { %6109 = vmatprep.subr.bf16.mxu0 %v8460_v35  ;;  %6173 = vmatprep.subr.bf16.mxu1 %v8462_v16  ;;  %v8472_v5 = vpack.c.bf16 %v3976_v3, %v3972_v51  ;;  %v8479_v16 = vpack.c.bf16 %v3977_v27, %v3973_v36  ;;  %v3984_v51 = vld [vmem:[#allocation3 + $0x2e8] sm:$0xff]  ;;  %v3982_v3 = vld [vmem:[#allocation3 + $0x2d8] sm:$0xff]  ;;  %v8488_v35 = vpack.c.bf16 %v3983_v56, %v3979_v61  ;;  %v3981_v36 = vld [vmem:[#allocation3 + $0x2d0] sm:$0xff] }
 0x78b   :  { %v8486_v41 = vpack.c.bf16 %v3986_v14, %v3982_v3  ;;  %v3985_v27 = vld [vmem:[#allocation3 + $0x2f0] sm:$0xff]  ;;  %v3994_v3 = vld [vmem:[#allocation3 + $0x338] sm:$0xff]  ;;  %v3987_v14 = vld [vmem:[#allocation3 + $0x300] sm:$0xff] }
 0x78c   :  { %9301 = vst [vmem:[#allocation57_spill] sm:$0xff] %v8472_v5  ;;  %9304 = vst [vmem:[#allocation60_spill] sm:$0xff] %v8479_v16  ;;  %v3991_v61 = vld [vmem:[#allocation3 + $0x320] sm:$0xff] }
 0x78d   :  { %6111 = vmatpush1.bf16.msra.mxu0 %v8464_v17  ;;  %6175 = vmatpush1.bf16.msra.mxu1 %v8467_v38  ;;  %v3980_v38 = vld [vmem:[#allocation3 + $0x2c8] sm:$0xff]  ;;  %9306 = vst [vmem:[#allocation62_spill] sm:$0xff] %v8486_v41  ;;  %9307 = vst [vmem:[#allocation63_spill] sm:$0xff] %v8488_v35 }
 0x78e   :  { %6113 = vmatprep.subr.bf16.mxu0 %v8472_v5  ;;  %6177 = vmatprep.subr.bf16.mxu1 %v8474_v60  ;;  %v8484_v17 = vpack.c.bf16 %v3984_v51, %v3980_v38  ;;  %v8491_v60 = vpack.c.bf16 %v3985_v27, %v3981_v36  ;;  %v3992_v38 = vld [vmem:[#allocation3 + $0x328] sm:$0xff]  ;;  %v3990_v51 = vld [vmem:[#allocation3 + $0x318] sm:$0xff]  ;;  %v8500_v5 = vpack.c.bf16 %v3991_v61, %v3987_v14  ;;  %v3989_v36 = vld [vmem:[#allocation3 + $0x310] sm:$0xff] }
 0x78f   :  { %v8498_v56 = vpack.c.bf16 %v3994_v3, %v3990_v51  ;;  %v3993_v27 = vld [vmem:[#allocation3 + $0x330] sm:$0xff]  ;;  %v4002_v51 = vld [vmem:[#allocation3 + $0x378] sm:$0xff]  ;;  %v3995_v3 = vld [vmem:[#allocation3 + $0x340] sm:$0xff] }
 0x790   :  { %9305 = vst [vmem:[#allocation61_spill] sm:$0xff] %v8484_v17  ;;  %9308 = vst [vmem:[#allocation64_spill] sm:$0xff] %v8491_v60  ;;  %v3999_v14 = vld [vmem:[#allocation3 + $0x360] sm:$0xff] }
 0x791   :  { %6115 = vmatpush1.bf16.msra.mxu0 %v8476_v46  ;;  %6179 = vmatpush1.bf16.msra.mxu1 %v8479_v16  ;;  %v3988_v16 = vld [vmem:[#allocation3 + $0x308] sm:$0xff]  ;;  %9310 = vst [vmem:[#allocation66_spill] sm:$0xff] %v8498_v56  ;;  %9311 = vst [vmem:[#allocation16_spill] sm:$0xff] %v8500_v5 }
 0x792   :  { %6117 = vmatprep.subr.bf16.mxu0 %v8484_v17  ;;  %6181 = vmatprep.subr.bf16.mxu1 %v8486_v41  ;;  %v8496_v46 = vpack.c.bf16 %v3992_v38, %v3988_v16  ;;  %v8503_v41 = vpack.c.bf16 %v3993_v27, %v3989_v36  ;;  %v4000_v16 = vld [vmem:[#allocation3 + $0x368] sm:$0xff]  ;;  %v3998_v38 = vld [vmem:[#allocation3 + $0x358] sm:$0xff]  ;;  %v8512_v17 = vpack.c.bf16 %v3999_v14, %v3995_v3  ;;  %v3997_v36 = vld [vmem:[#allocation3 + $0x350] sm:$0xff] }
 0x793   :  { %v8510_v61 = vpack.c.bf16 %v4002_v51, %v3998_v38  ;;  %v4001_v27 = vld [vmem:[#allocation3 + $0x370] sm:$0xff]  ;;  %v4003_v38 = vld [vmem:[#allocation3 + $0x380] sm:$0xff] }
 0x794   :  { %9309 = vst [vmem:[#allocation65_spill] sm:$0xff] %v8496_v46  ;;  %9312 = vst [vmem:[#allocation17_spill] sm:$0xff] %v8503_v41  ;;  %v4007_v51 = vld [vmem:[#allocation3 + $0x3a0] sm:$0xff] }
 0x795   :  { %6119 = vmatpush1.bf16.msra.mxu0 %v8488_v35  ;;  %6183 = vmatpush1.bf16.msra.mxu1 %v8491_v60  ;;  %v3996_v60 = vld [vmem:[#allocation3 + $0x348] sm:$0xff]  ;;  %9314 = vst [vmem:[#allocation67_spill] sm:$0xff] %v8510_v61  ;;  %9315 = vst [vmem:[#allocation68_spill] sm:$0xff] %v8512_v17  ;;  %v8524_v14 = vpack.c.bf16 %v4007_v51, %v4003_v38  ;;  %v4013_v38 = vld [vmem:[#allocation3 + $0x3d0] sm:$0xff] }
 0x796   :  { %6121 = vmatprep.subr.bf16.mxu0 %v8496_v46  ;;  %6185 = vmatprep.subr.bf16.mxu1 %v8498_v56  ;;  %v8508_v35 = vpack.c.bf16 %v4000_v16, %v3996_v60  ;;  %v8515_v56 = vpack.c.bf16 %v4001_v27, %v3997_v36  ;;  %v4008_v46 = vld [vmem:[#allocation3 + $0x3a8] sm:$0xff]  ;;  %v4010_v16 = vld [vmem:[#allocation3 + $0x3b8] sm:$0xff]  ;;  %v4005_v36 = vld [vmem:[#allocation3 + $0x390] sm:$0xff] }
 0x797   :  { %v8522_v3 = vpack.c.bf16 %v4010_v16, %v4006_v6  ;;  %v4009_v27 = vld [vmem:[#allocation3 + $0x3b0] sm:$0xff]  ;;  %v4011_v6 = vld [vmem:[#allocation3 + $0x3c0] sm:$0xff] }
 0x798   :  { %9313 = vst [vmem:[#allocation18_spill] sm:$0xff] %v8508_v35  ;;  %9316 = vst [vmem:[#allocation69_spill] sm:$0xff] %v8515_v56  ;;  %v4015_v16 = vld [vmem:[#allocation3 + $0x3e0] sm:$0xff] }
 0x799   :  { %6123 = vmatpush1.bf16.msra.mxu0 %v8500_v5  ;;  %6187 = vmatpush1.bf16.msra.mxu1 %v8503_v41  ;;  %v4004_v5 = vld [vmem:[#allocation3 + $0x388] sm:$0xff]  ;;  %v8527_v41 = vpack.c.bf16 %v4009_v27, %v4005_v36  ;;  %v8535_v51 = vpack.c.bf16 %v4015_v16, %v4011_v6 }
 0x79a   :  { %6125 = vmatprep.subr.bf16.mxu0 %v8508_v35  ;;  %6189 = vmatprep.subr.bf16.mxu1 %v8510_v61  ;;  %v8519_v60 = vpack.c.bf16 %v4008_v46, %v4004_v5  ;;  %v4012_v35 = vld [vmem:[#allocation3 + $0x3c8] sm:$0xff]  ;;  %v4018_v5 = vld [vmem:[#allocation3 + $0x3f8] sm:$0xff] }
 0x79b   :  { %v4016_v61 = vld [vmem:[#allocation3 + $0x3e8] sm:$0xff]  ;;  %9319 = vst [vmem:[#allocation72_spill] sm:$0xff] %v8535_v51 }
 0x79c   :  { %v8530_v46 = vpack.c.bf16 %v4016_v61, %v4012_v35 }
 0x79d   :  { %6127 = vmatpush1.bf16.msra.mxu0 %v8512_v17  ;;  %6191 = vmatpush1.bf16.msra.mxu1 %v8515_v56  ;;  %v4014_v17 = vld [vmem:[#allocation3 + $0x3d8] sm:$0xff]  ;;  %v4017_v56 = vld [vmem:[#allocation3 + $0x3f0] sm:$0xff] }
 0x79e   :  { %6129 = vmatprep.subr.bf16.mxu0 %v8519_v60  ;;  %6193 = vmatprep.subr.bf16.mxu1 %v8522_v3  ;;  %9317 = vst [vmem:[#allocation70_spill] sm:$0xff] %v8530_v46  ;;  %v8532_v57 = vpack.c.bf16 %v4018_v5, %v4014_v17  ;;  %v8539_v36 = vpack.c.bf16 %v4017_v56, %v4013_v38 }
 0x7a0   :  { %9318 = vst [vmem:[#allocation71_spill] sm:$0xff] %v8532_v57  ;;  %9320 = vst [vmem:[#allocation73_spill] sm:$0xff] %v8539_v36 }
 0x7a1   :  { %6131 = vmatpush1.bf16.msra.mxu0 %v8524_v14  ;;  %6195 = vmatpush1.bf16.msra.mxu1 %v8527_v41 }
 0x7a2   :  { %6133 = vmatprep.subr.bf16.mxu0 %v8530_v46  ;;  %6197 = vmatprep.subr.bf16.mxu1 %v8532_v57 }
 0x7a5   :  { %6135 = vmatpush1.bf16.msra.mxu0 %v8535_v51  ;;  %6199 = vmatpush1.bf16.msra.mxu1 %v8539_v36 }
 0x7a6   :  { %6201 = vmatprep.subr.bf16.mxu0 %v8229_v55  ;;  %6233 = vmatprep.subr.bf16.mxu1 %v8231_v39 }
 0x81b   :  { %v3549_v35 = vpop.f32.mrb[26].mxu0  ;;  %v3620_v17 = vpop.f32.mrb[26].mxu1 }
 0x81c   :  { %v3550_v61 = vadd.f32 %v3549_v35, %v9263_v9  ;;  %v3551_v27 = vpop.f32.mrb[27].mxu0  ;;  %v3622_v5 = vpop.f32.mrb[27].mxu1  ;;  %v3621_v38 = vadd.f32 %v3620_v17, %v9264_v53 }
 0x81d   :  { %v3552_v6 = vadd.f32 %v3551_v27, %v7362_v31  ;;  %v3623_v36 = vadd.f32 %v3622_v5, %v7372_v44 }
 0x81e   :  { %v4773_v56 = vmul.f32 -1.442695, %v3550_v61  ;;  %v4775_v51 = vmul.f32 -1.442695, %v3621_v38 }
 0x81f   :  { %v4774_v16 = vmul.f32 -1.442695, %v3552_v6 }
 0x820   :  { %6648 = vpow2.f32 %v4773_v56 }
 0x821   :  { %6650 = vpow2.f32 %v4774_v16 }
 0x822   :  { %6652 = vtanh.f32 %v3623_v36 }
 0x823   :  { %6654 = vpow2.f32 %v4775_v51 }
 0x82a   :  { %v6649_v55 = vpop.eup %6648 }
 0x82b   :  { %v3634_v57 = vadd.f32 1.0, %v6649_v55  ;;  %v6651_v39 = vpop.eup %6650 }
 0x82c   :  { %v3635_v35 = vadd.f32 1.0, %v6651_v39  ;;  %v6653_v9 = vpop.eup %6652 }
 0x82d   :  { %6656 = vrcp.f32 %v3634_v57  ;;  %v6655_v46 = vpop.eup %6654 }
 0x82e   :  { %6658 = vrcp.f32 %v3635_v35  ;;  %v3636_v56 = vadd.f32 1.0, %v6655_v46 }
 0x830   :  { %6660 = vrcp.f32 %v3636_v56 }
 0x837   :  { %v6657_v27 = vpop.eup %6656 }
 0x838   :  { %v3645_v61 = vmul.f32 %v6657_v27, %v6653_v9  ;;  %v6659_v6 = vpop.eup %6658 }
 0x839   :  { %v3644_v16 = vmul.f32 %v6659_v6, %v8240_v29 }
 0x83a   :  { %v6661_v46 = vpop.eup %6660 }
 0x83b   :  { %v3787_v17 = vpop.f32.mrb[12].mxu0  ;;  %v3858_v53 = vpop.f32.mrb[12].mxu1  ;;  %v8551_v5 = vadd.f32 %v3645_v61, %v3644_v16 }
 0x83c   :  { %v6404_v38 = vadd.f32 %v3787_v17, %v9035_v63  ;;  %v3789_v36 = vpop.f32.mrb[13].mxu0  ;;  %v3860_v55 = vpop.f32.mrb[13].mxu1  ;;  %v6420_v9 = vadd.f32 %v3858_v53, %v6904_v12 }
 0x83d   :  { %v6405_v57 = vadd.f32 %v3789_v36, %v9036_v34  ;;  %6662 = vtanh.f32 %v8551_v5  ;;  %v6421_v29 = vadd.f32 %v3860_v55, %v6908_v13 }
 0x83e   :  { %v4777_v51 = vmul.f32 -1.442695, %v6404_v38  ;;  %v4779_v27 = vmul.f32 -1.442695, %v6420_v9 }
 0x83f   :  { %v4778_v39 = vmul.f32 -1.442695, %v6405_v57 }
 0x840   :  { %6664 = vpow2.f32 %v4777_v51 }
 0x841   :  { %6666 = vpow2.f32 %v4778_v39 }
 0x842   :  { %6668 = vtanh.f32 %v6421_v29 }
 0x847   :  { %v6663_v35 = vpop.eup %6662 }
 0x848   :  { %v3648_v61 = vmul.f32 %v6663_v35, %v6661_v46 }
 0x84a   :  { %v6665_v6 = vpop.eup %6664  ;;  %6670 = vtanh.f32 %v3648_v61  ;;  %4083 = vmatprep.mubr.f32.mxu0 %v3648_v61  ;;  %4154 = vmatprep.mubr.f32.mxu1 %v3648_v61  ;;  %v9357_v61 = vld [vmem:[#allocation57_spill] sm:$0xff] }
 0x84b   :  { %v3876_v16 = vadd.f32 1.0, %v6665_v6  ;;  %v6667_v56 = vpop.eup %6666  ;;  %6672 = vpow2.f32 %v4779_v27  ;;  %v9358_v6 = vld [vmem:[#allocation58_spill] sm:$0xff] }
 0x84c   :  { %v3877_v17 = vadd.f32 1.0, %v6667_v56  ;;  %v6669_v38 = vpop.eup %6668  ;;  %v9360_v56 = vld [vmem:[#allocation60_spill] sm:$0xff] }
 0x84d   :  { %6674 = vrcp.f32 %v3876_v16  ;;  %v9359_v16 = vld [vmem:[#allocation59_spill] sm:$0xff] }
 0x84e   :  { %6676 = vrcp.f32 %v3877_v17  ;;  %v9361_v17 = vld [vmem:[#allocation61_spill] sm:$0xff] }
 0x854   :  { %v6671_v36 = vpop.eup %6670 }
 0x855   :  { %v6673_v53 = vpop.eup %6672  ;;  %4776 = vst [vmem:[%s8691_s6 + $0x28] sm:$0xff] %v6671_v36  ;;  %v9363_v36 = vld [vmem:[#allocation63_spill] sm:$0xff] }
 0x856   :  { %v3878_v39 = vadd.f32 1.0, %v6673_v53  ;;  %v9364_v53 = vld [vmem:[#allocation64_spill] sm:$0xff] }
 0x857   :  { %v6675_v55 = vpop.eup %6674 }
 0x858   :  { %v3887_v57 = vmul.f32 %v6675_v55, %v6669_v38  ;;  %v6677_v51 = vpop.eup %6676  ;;  %6678 = vrcp.f32 %v3878_v39  ;;  %v9362_v38 = vld [vmem:[#allocation62_spill] sm:$0xff]  ;;  %v9365_v55 = vld [vmem:[#allocation65_spill] sm:$0xff] }
 0x859   :  { %v3886_v9 = vmul.f32 %v6677_v51, %v8251_v33  ;;  %v9322_v33 = vld [vmem:[#allocation21_spill] sm:$0xff]  ;;  %v9367_v51 = vld [vmem:[#allocation16_spill] sm:$0xff] }
 0x85a   :  { %v9368_v39 = vld [vmem:[#allocation17_spill] sm:$0xff] }
 0x85b   :  { %v8562_v29 = vadd.f32 %v3887_v57, %v3886_v9  ;;  %v9366_v57 = vld [vmem:[#allocation66_spill] sm:$0xff] }
 0x85c   :  { %v9369_v9 = vld [vmem:[#allocation18_spill] sm:$0xff] }
 0x85d   :  { %6680 = vtanh.f32 %v8562_v29 }
 0x862   :  { %v6679_v46 = vpop.eup %6678 }
 0x867   :  { %v6681_v35 = vpop.eup %6680 }
 0x868   :  { %v3890_v27 = vmul.f32 %v6681_v35, %v6679_v46  ;;  %v9370_v46 = vld [vmem:[#allocation67_spill] sm:$0xff]  ;;  %v9371_v35 = vld [vmem:[#allocation68_spill] sm:$0xff] }
 0x86a   :  { %4084 = vmatmul.mubr.f32.vlgmr.msra.gmra.mrb[28].mxu0 %v3890_v27  ;;  %4155 = vmatmul.mubr.f32.vlgmr.msra.gmra.mrb[28].mxu1 %v3890_v27 }
 0x86b   :  { %6203 = vmatpush1.bf16.msra.mxu0 %v8254_v1  ;;  %6235 = vmatpush1.bf16.msra.mxu1 %v8256_v10  ;;  %v9323_v1 = vld [vmem:[#allocation25_spill] sm:$0xff]  ;;  %v9324_v10 = vld [vmem:[#allocation22_spill] sm:$0xff] }
 0x86c   :  { %6205 = vmatprep.subr.bf16.mxu0 %v8260_v21  ;;  %6237 = vmatprep.subr.bf16.mxu1 %v8262_v30  ;;  %v9325_v21 = vld [vmem:[#allocation26_spill] sm:$0xff]  ;;  %v9326_v30 = vld [vmem:[#allocation24_spill] sm:$0xff] }
 0x86d   :  { %4321 = vmatprep.mubr.f32.mxu0 %v8979_v43  ;;  %4392 = vmatprep.mubr.f32.mxu1 %v8979_v43  ;;  %v9321_v43 = vld [vmem:[#allocation23_spill] sm:$0xff] }
 0x86f   :  { %6207 = vmatpush1.bf16.msra.mxu0 %v8268_v7  ;;  %6239 = vmatpush1.bf16.msra.mxu1 %v8270_v2  ;;  %v9327_v7 = vld [vmem:[#allocation27_spill] sm:$0xff]  ;;  %v9328_v2 = vld [vmem:[#allocation28_spill] sm:$0xff] }
 0x870   :  { %6209 = vmatprep.subr.bf16.mxu0 %v8274_v4  ;;  %6241 = vmatprep.subr.bf16.mxu1 %v8276_v18  ;;  %v9329_v4 = vld [vmem:[#allocation29_spill] sm:$0xff]  ;;  %v9330_v18 = vld [vmem:[#allocation30_spill] sm:$0xff] }
 0x873   :  { %6211 = vmatpush1.bf16.msra.mxu0 %v8282_v62  ;;  %6243 = vmatpush1.bf16.msra.mxu1 %v8284_v11  ;;  %v9331_v62 = vld [vmem:[#allocation31_spill] sm:$0xff]  ;;  %v9332_v11 = vld [vmem:[#allocation32_spill] sm:$0xff] }
 0x874   :  { %6213 = vmatprep.subr.bf16.mxu0 %v8288_v15  ;;  %6245 = vmatprep.subr.bf16.mxu1 %v8290_v25  ;;  %v9333_v15 = vld [vmem:[#allocation33_spill] sm:$0xff]  ;;  %v9334_v25 = vld [vmem:[#allocation34_spill] sm:$0xff] }
 0x877   :  { %6215 = vmatpush1.bf16.msra.mxu0 %v8294_v40  ;;  %6247 = vmatpush1.bf16.msra.mxu1 %v8296_v22  ;;  %v9335_v40 = vld [vmem:[#allocation35_spill] sm:$0xff]  ;;  %v9336_v22 = vld [vmem:[#allocation36_spill] sm:$0xff] }
 0x878   :  { %6217 = vmatprep.subr.bf16.mxu0 %v8300_v26  ;;  %6249 = vmatprep.subr.bf16.mxu1 %v8302_v8  ;;  %v9337_v26 = vld [vmem:[#allocation37_spill] sm:$0xff]  ;;  %v9338_v8 = vld [vmem:[#allocation38_spill] sm:$0xff] }
 0x87b   :  { %6219 = vmatpush1.bf16.msra.mxu0 %v8306_v59  ;;  %6251 = vmatpush1.bf16.msra.mxu1 %v8308_v0  ;;  %v9339_v59 = vld [vmem:[#allocation39_spill] sm:$0xff]  ;;  %v9340_v0 = vld [vmem:[#allocation40_spill] sm:$0xff] }
 0x87c   :  { %6221 = vmatprep.subr.bf16.mxu0 %v8312_v28  ;;  %6253 = vmatprep.subr.bf16.mxu1 %v8314_v47  ;;  %v9341_v28 = vld [vmem:[#allocation41_spill] sm:$0xff]  ;;  %v9342_v47 = vld [vmem:[#allocation42_spill] sm:$0xff] }
 0x87f   :  { %6223 = vmatpush1.bf16.msra.mxu0 %v8318_v48  ;;  %6255 = vmatpush1.bf16.msra.mxu1 %v8320_v23  ;;  %v9343_v48 = vld [vmem:[#allocation43_spill] sm:$0xff]  ;;  %v9344_v23 = vld [vmem:[#allocation44_spill] sm:$0xff] }
 0x880   :  { %6225 = vmatprep.subr.bf16.mxu0 %v8324_v42  ;;  %6257 = vmatprep.subr.bf16.mxu1 %v8326_v20  ;;  %v9345_v42 = vld [vmem:[#allocation45_spill] sm:$0xff]  ;;  %v9346_v20 = vld [vmem:[#allocation46_spill] sm:$0xff] }
 0x883   :  { %6227 = vmatpush1.bf16.msra.mxu0 %v8330_v45  ;;  %6259 = vmatpush1.bf16.msra.mxu1 %v8332_v37  ;;  %v9347_v45 = vld [vmem:[#allocation47_spill] sm:$0xff]  ;;  %v9348_v37 = vld [vmem:[#allocation48_spill] sm:$0xff] }
 0x884   :  { %6229 = vmatprep.subr.bf16.mxu0 %v8336_v32  ;;  %6261 = vmatprep.subr.bf16.mxu1 %v8338_v54  ;;  %v9349_v32 = vld [vmem:[#allocation49_spill] sm:$0xff]  ;;  %v9350_v54 = vld [vmem:[#allocation50_spill] sm:$0xff] }
 0x887   :  { %6231 = vmatpush1.bf16.msra.mxu0 %v8342_v19  ;;  %6263 = vmatpush1.bf16.msra.mxu1 %v8344_v52  ;;  %v9351_v19 = vld [vmem:[#allocation51_spill] sm:$0xff]  ;;  %v9352_v52 = vld [vmem:[#allocation52_spill] sm:$0xff] }
 0x888   :  { %6265 = vmatprep.subr.bf16.mxu0 %v8352_v49  ;;  %6329 = vmatprep.subr.bf16.mxu1 %v8354_v50  ;;  %v9353_v49 = vld [vmem:[#allocation53_spill] sm:$0xff]  ;;  %v9354_v50 = vld [vmem:[#allocation54_spill] sm:$0xff] }
 0x88a   :  { %4322 = vmatmul.mubr.f32.vlgmr.msra.gmra.mrb[14].mxu0 %v3890_v27  ;;  %4393 = vmatmul.mubr.f32.vlgmr.msra.gmra.mrb[14].mxu1 %v3890_v27  ;;  %v9372_v27 = vld [vmem:[#allocation69_spill] sm:$0xff] }
 0x88b   :  { %6267 = vmatpush1.bf16.msra.mxu0 %v8356_v58  ;;  %6331 = vmatpush1.bf16.msra.mxu1 %v8359_v24  ;;  %v9355_v58 = vld [vmem:[#allocation55_spill] sm:$0xff]  ;;  %v9356_v24 = vld [vmem:[#allocation56_spill] sm:$0xff] }
 0x88c   :  { %6269 = vmatprep.subr.bf16.mxu0 %v9321_v43  ;;  %6333 = vmatprep.subr.bf16.mxu1 %v9322_v33  ;;  %v9373_v43 = vld [vmem:[#allocation70_spill] sm:$0xff]  ;;  %v9374_v33 = vld [vmem:[#allocation71_spill] sm:$0xff] }
 0x88f   :  { %6271 = vmatpush1.bf16.msra.mxu0 %v9323_v1  ;;  %6335 = vmatpush1.bf16.msra.mxu1 %v9324_v10  ;;  %v9375_v1 = vld [vmem:[#allocation72_spill] sm:$0xff]  ;;  %v9376_v10 = vld [vmem:[#allocation73_spill] sm:$0xff] }
 0x890   :  { %6273 = vmatprep.subr.bf16.mxu0 %v9325_v21  ;;  %6337 = vmatprep.subr.bf16.mxu1 %v9326_v30 }
 0x893   :  { %6275 = vmatpush1.bf16.msra.mxu0 %v9327_v7  ;;  %6339 = vmatpush1.bf16.msra.mxu1 %v9328_v2  ;;  %v9377_v7 = vld [vmem:[#allocation19_spill] sm:$0xff] }
 0x894   :  { %6277 = vmatprep.subr.bf16.mxu0 %v9329_v4  ;;  %6341 = vmatprep.subr.bf16.mxu1 %v9330_v18 }
 0x897   :  { %6279 = vmatpush1.bf16.msra.mxu0 %v9331_v62  ;;  %6343 = vmatpush1.bf16.msra.mxu1 %v9332_v11 }
 0x898   :  { %6281 = vmatprep.subr.bf16.mxu0 %v9333_v15  ;;  %6345 = vmatprep.subr.bf16.mxu1 %v9334_v25 }
 0x89b   :  { %6283 = vmatpush1.bf16.msra.mxu0 %v9335_v40  ;;  %6347 = vmatpush1.bf16.msra.mxu1 %v9336_v22 }
 0x89c   :  { %6285 = vmatprep.subr.bf16.mxu0 %v9337_v26  ;;  %6349 = vmatprep.subr.bf16.mxu1 %v9338_v8 }
 0x89f   :  { %6287 = vmatpush1.bf16.msra.mxu0 %v9339_v59  ;;  %6351 = vmatpush1.bf16.msra.mxu1 %v9340_v0 }
 0x8a0   :  { %6289 = vmatprep.subr.bf16.mxu0 %v9341_v28  ;;  %6353 = vmatprep.subr.bf16.mxu1 %v9342_v47 }
 0x8a3   :  { %6291 = vmatpush1.bf16.msra.mxu0 %v9343_v48  ;;  %6355 = vmatpush1.bf16.msra.mxu1 %v9344_v23 }
 0x8a4   :  { %6293 = vmatprep.subr.bf16.mxu0 %v9345_v42  ;;  %6357 = vmatprep.subr.bf16.mxu1 %v9346_v20 }
 0x8a7   :  { %6295 = vmatpush1.bf16.msra.mxu0 %v9347_v45  ;;  %6359 = vmatpush1.bf16.msra.mxu1 %v9348_v37 }
 0x8a8   :  { %6297 = vmatprep.subr.bf16.mxu0 %v9349_v32  ;;  %6361 = vmatprep.subr.bf16.mxu1 %v9350_v54 }
 0x8ab   :  { %6299 = vmatpush1.bf16.msra.mxu0 %v9351_v19  ;;  %6363 = vmatpush1.bf16.msra.mxu1 %v9352_v52 }
 0x8ac   :  { %6301 = vmatprep.subr.bf16.mxu0 %v9353_v49  ;;  %6365 = vmatprep.subr.bf16.mxu1 %v9354_v50 }
 0x8af   :  { %6303 = vmatpush1.bf16.msra.mxu0 %v9355_v58  ;;  %6367 = vmatpush1.bf16.msra.mxu1 %v9356_v24 }
 0x8b0   :  { %6305 = vmatprep.subr.bf16.mxu0 %v9357_v61  ;;  %6369 = vmatprep.subr.bf16.mxu1 %v9358_v6 }
 0x8b3   :  { %6307 = vmatpush1.bf16.msra.mxu0 %v9359_v16  ;;  %6371 = vmatpush1.bf16.msra.mxu1 %v9360_v56 }
 0x8b4   :  { %6309 = vmatprep.subr.bf16.mxu0 %v9361_v17  ;;  %6373 = vmatprep.subr.bf16.mxu1 %v9362_v38 }
 0x8b7   :  { %6311 = vmatpush1.bf16.msra.mxu0 %v9363_v36  ;;  %6375 = vmatpush1.bf16.msra.mxu1 %v9364_v53 }
 0x8b8   :  { %6313 = vmatprep.subr.bf16.mxu0 %v9365_v55  ;;  %6377 = vmatprep.subr.bf16.mxu1 %v9366_v57 }
 0x8bb   :  { %6315 = vmatpush1.bf16.msra.mxu0 %v9367_v51  ;;  %6379 = vmatpush1.bf16.msra.mxu1 %v9368_v39 }
 0x8bc   :  { %6317 = vmatprep.subr.bf16.mxu0 %v9369_v9  ;;  %6381 = vmatprep.subr.bf16.mxu1 %v9370_v46 }
 0x8bf   :  { %6319 = vmatpush1.bf16.msra.mxu0 %v9371_v35  ;;  %6383 = vmatpush1.bf16.msra.mxu1 %v9372_v27 }
 0x8c0   :  { %6321 = vmatprep.subr.bf16.mxu0 %v8519_v60  ;;  %6385 = vmatprep.subr.bf16.mxu1 %v8522_v3 }
 0x8c3   :  { %6323 = vmatpush1.bf16.msra.mxu0 %v8524_v14  ;;  %6387 = vmatpush1.bf16.msra.mxu1 %v8527_v41  ;;  %v9378_v41 = vld [vmem:[#allocation20_spill] sm:$0xff] }
 0x8c4   :  { %6325 = vmatprep.subr.bf16.mxu0 %v9373_v43  ;;  %6389 = vmatprep.subr.bf16.mxu1 %v9374_v33 }
 0x8c7   :  { %6327 = vmatpush1.bf16.msra.mxu0 %v9375_v1  ;;  %6391 = vmatpush1.bf16.msra.mxu1 %v9376_v10 }
 0x93d   :  { %v4085_v21 = vpop.f32.mrb[28].mxu0  ;;  %v4156_v30 = vpop.f32.mrb[28].mxu1 }
 0x93e   :  { %v4086_v2 = vadd.f32 %v4085_v21, %v9377_v7  ;;  %v4087_v4 = vpop.f32.mrb[29].mxu0  ;;  %v4158_v60 = vpop.f32.mrb[29].mxu1  ;;  %v4157_v62 = vadd.f32 %v4156_v30, %v9378_v41 }
 0x93f   :  { %v4088_v3 = vadd.f32 %v4087_v4, %v7362_v31  ;;  %v4159_v11 = vadd.f32 %v4158_v60, %v7372_v44 }
 0x940   :  { %v4780_v18 = vmul.f32 -1.442695, %v4086_v2  ;;  %v4782_v15 = vmul.f32 -1.442695, %v4157_v62 }
 0x941   :  { %v4781_v14 = vmul.f32 -1.442695, %v4088_v3 }
 0x942   :  { %6682 = vpow2.f32 %v4780_v18 }
 0x943   :  { %6684 = vpow2.f32 %v4781_v14 }
 0x944   :  { %6686 = vtanh.f32 %v4159_v11 }
 0x945   :  { %6688 = vpow2.f32 %v4782_v15 }
 0x94c   :  { %v6683_v25 = vpop.eup %6682 }
 0x94d   :  { %v4170_v40 = vadd.f32 1.0, %v6683_v25  ;;  %v6685_v22 = vpop.eup %6684 }
 0x94e   :  { %v4171_v26 = vadd.f32 1.0, %v6685_v22  ;;  %v6687_v8 = vpop.eup %6686 }
 0x94f   :  { %6690 = vrcp.f32 %v4170_v40  ;;  %v6689_v59 = vpop.eup %6688 }
 0x950   :  { %6692 = vrcp.f32 %v4171_v26  ;;  %v4172_v48 = vadd.f32 1.0, %v6689_v59 }
 0x952   :  { %6694 = vrcp.f32 %v4172_v48 }
 0x959   :  { %v6691_v0 = vpop.eup %6690 }
 0x95a   :  { %v4181_v28 = vmul.f32 %v6691_v0, %v6687_v8  ;;  %v6693_v47 = vpop.eup %6692 }
 0x95b   :  { %v4180_v23 = vmul.f32 %v6693_v47, %v8551_v5 }
 0x95c   :  { %v6695_v58 = vpop.eup %6694 }
 0x95d   :  { %v4323_v42 = vpop.f32.mrb[14].mxu0  ;;  %v4394_v20 = vpop.f32.mrb[14].mxu1  ;;  %v8666_v45 = vadd.f32 %v4181_v28, %v4180_v23 }
 0x95e   :  { %v6406_v37 = vadd.f32 %v4323_v42, %v9035_v63  ;;  %v4325_v32 = vpop.f32.mrb[15].mxu0  ;;  %v4396_v54 = vpop.f32.mrb[15].mxu1  ;;  %v6422_v50 = vadd.f32 %v4394_v20, %v6904_v12 }
 0x95f   :  { %v6407_v19 = vadd.f32 %v4325_v32, %v9036_v34  ;;  %6696 = vtanh.f32 %v8666_v45  ;;  %v6423_v5 = vadd.f32 %v4396_v54, %v6908_v13 }
 0x960   :  { %v4784_v52 = vmul.f32 -1.442695, %v6406_v37  ;;  %v4786_v61 = vmul.f32 -1.442695, %v6422_v50 }
 0x961   :  { %v4785_v49 = vmul.f32 -1.442695, %v6407_v19 }
 0x962   :  { %6698 = vpow2.f32 %v4784_v52 }
 0x963   :  { %6700 = vpow2.f32 %v4785_v49 }
 0x964   :  { %6702 = vtanh.f32 %v6423_v5 }
 0x969   :  { %v6697_v24 = vpop.eup %6696 }
 0x96a   :  { %v4184_v6 = vmul.f32 %v6697_v24, %v6695_v58 }
 0x96c   :  { %v6699_v63 = vpop.eup %6698  ;;  %6704 = vtanh.f32 %v4184_v6  ;;  %4619 = vmatprep.mubr.f32.mxu0 %v4184_v6  ;;  %4690 = vmatprep.mubr.f32.mxu1 %v4184_v6 }
 0x96d   :  { %v4412_v16 = vadd.f32 1.0, %v6699_v63  ;;  %v6701_v34 = vpop.eup %6700  ;;  %6706 = vpow2.f32 %v4786_v61 }
 0x96e   :  { %v4413_v56 = vadd.f32 1.0, %v6701_v34  ;;  %v6703_v17 = vpop.eup %6702 }
 0x96f   :  { %6708 = vrcp.f32 %v4412_v16 }
 0x970   :  { %6710 = vrcp.f32 %v4413_v56 }
 0x976   :  { %v6705_v38 = vpop.eup %6704 }
 0x977   :  { %v6707_v12 = vpop.eup %6706  ;;  %4783 = vst [vmem:[%s8691_s6 + $0x30] sm:$0xff] %v6705_v38 }
 0x978   :  { %v4414_v55 = vadd.f32 1.0, %v6707_v12 }
 0x979   :  { %v6709_v13 = vpop.eup %6708 }
 0x97a   :  { %v4423_v36 = vmul.f32 %v6709_v13, %v6703_v17  ;;  %v6711_v53 = vpop.eup %6710  ;;  %6712 = vrcp.f32 %v4414_v55 }
 0x97b   :  { %v4422_v57 = vmul.f32 %v6711_v53, %v8562_v29 }
 0x97d   :  { %v4424_v51 = vadd.f32 %v4423_v36, %v4422_v57 }
 0x97f   :  { %6714 = vtanh.f32 %v4424_v51 }
 0x984   :  { %v6713_v39 = vpop.eup %6712 }
 0x989   :  { %v6715_v9 = vpop.eup %6714 }
 0x98a   :  { %v4426_v46 = vmul.f32 %v6715_v9, %v6713_v39 }
 0x98c   :  { %4620 = vmatmul.mubr.f32.vlgmr.msra.gmra.mrb[30].mxu0 %v4426_v46  ;;  %4691 = vmatmul.mubr.f32.vlgmr.msra.gmra.mrb[30].mxu1 %v4426_v46 }
 0xa5f   :  { %v4621_v35 = vpop.f32.mrb[30].mxu0  ;;  %v4692_v27 = vpop.f32.mrb[30].mxu1 }
 0xa60   :  { %v4622_v43 = vadd.f32 %v4621_v35, %v9377_v7  ;;  %v4623_v33 = vpop.f32.mrb[31].mxu0  ;;  %v4694_v1 = vpop.f32.mrb[31].mxu1  ;;  %v4693_v29 = vadd.f32 %v4692_v27, %v9378_v41 }
 0xa61   :  { %v4624_v10 = vadd.f32 %v4623_v33, %v7362_v31  ;;  %v4695_v2 = vadd.f32 %v4694_v1, %v7372_v44 }
 0xa62   :  { %v4787_v21 = vmul.f32 -1.442695, %v4622_v43  ;;  %v4789_v4 = vmul.f32 -1.442695, %v4693_v29 }
 0xa63   :  { %v4788_v30 = vmul.f32 -1.442695, %v4624_v10 }
 0xa64   :  { %6716 = vpow2.f32 %v4787_v21 }
 0xa65   :  { %6718 = vpow2.f32 %v4788_v30 }
 0xa66   :  { %6720 = vtanh.f32 %v4695_v2 }
 0xa67   :  { %6722 = vpow2.f32 %v4789_v4 }
 0xa6e   :  { %v6717_v60 = vpop.eup %6716 }
 0xa6f   :  { %v4706_v3 = vadd.f32 1.0, %v6717_v60  ;;  %v6719_v18 = vpop.eup %6718 }
 0xa70   :  { %v4707_v7 = vadd.f32 1.0, %v6719_v18  ;;  %v6721_v14 = vpop.eup %6720 }
 0xa71   :  { %6724 = vrcp.f32 %v4706_v3  ;;  %v6723_v62 = vpop.eup %6722 }
 0xa72   :  { %6726 = vrcp.f32 %v4707_v7  ;;  %v4708_v25 = vadd.f32 1.0, %v6723_v62 }
 0xa74   :  { %6728 = vrcp.f32 %v4708_v25 }
 0xa7b   :  { %v6725_v31 = vpop.eup %6724 }
 0xa7c   :  { %v4717_v11 = vmul.f32 %v6725_v31, %v6721_v14  ;;  %v6727_v15 = vpop.eup %6726 }
 0xa7d   :  { %v4716_v40 = vmul.f32 %v6727_v15, %v8666_v45 }
 0xa7e   :  { %v6729_v44 = vpop.eup %6728 }
 0xa7f   :  { %v4718_v41 = vadd.f32 %v4717_v11, %v4716_v40 }
 0xa81   :  { %6730 = vtanh.f32 %v4718_v41 }
 0xa8b   :  { %v6731_v22 = vpop.eup %6730 }
 0xa8c   :  { %v4720_v26 = vmul.f32 %v6731_v22, %v6729_v44 }
 0xa8e   :  { %6732 = vtanh.f32 %v4720_v26 }
 0xa98   :  { %v6733_v8 = vpop.eup %6732 }
 0xa99   :  { %4790 = vst [vmem:[%s8691_s6 + $0x38] sm:$0xff] %v6733_v8 }
 0xa9a   :  { %4728 = vsyncpa [#allocation6], 1 }
 0xa9b   :  { %4729 = vsyncpa [#allocation8], 1 }
 0xa9c   :  { %4730 = vsyncmov [#allocation4] }
 0xa9f   :  { %s4731_s13 = vpop.sfrf %4730 }
 0xaa0   :  { %p4791_p10 = scmp.ne.s32.totalorder %s4731_s13, 0 }
 0xaa2   :  { %4735 = shalt.err (%p4791_p10)  }

</bundles_post_ra>
